<compile_context>
chip_gen: v7x
topology: tpu7x:2x2x1
jax: 0.10.0
libtpu: 0.0.40
codegen_flags: <defaults>
</compile_context>

<pallas_src>
import functools

import jax
import jax.numpy as jnp
import numpy as np
from jax.experimental import pallas as pl
from jax.experimental.pallas import tpu as pltpu

IN_FEATURES = 6400
HIDDEN = 200
HIDDEN_PAD = 256      # lane-padded hidden dim (bf16 HBM tiling pads to 256 anyway)
OUT_PAD = 128         # packed head output: lanes [0:NA) probs, lane NA value
NUM_ACTIONS = 2


def _policy_kernel(num_actions, x_ref, w1_ref, b1_ref, w2_ref, b2_ref,
                   out_ref, acc_ref):
    k = pl.program_id(0)
    tk = w1_ref.shape[0]

    @pl.when(k == 0)
    def _():
        acc_ref[...] = jnp.zeros_like(acc_ref)

    # x lives untiled in VMEM; slice the current K chunk locally (no per-step
    # x DMA).  bf16 x bf16 -> f32 accumulation on the MXU.
    start = pl.multiple_of(k * tk, 128)
    x_blk = x_ref[:, pl.ds(start, tk)]
    acc_ref[...] += jnp.dot(x_blk, w1_ref[...],
                            preferred_element_type=jnp.float32)

    @pl.when(k == pl.num_programs(0) - 1)
    def _():
        # Epilogue entirely in f32 (v5e VPU/EUP have no bf16 arithmetic).
        h = jnp.maximum(acc_ref[...] + b1_ref[...], 0.0)

        # Both heads fused into one lane-dense (HIDDEN_PAD, OUT_PAD) matmul.
        z2 = jnp.dot(h, w2_ref[...],
                     preferred_element_type=jnp.float32) + b2_ref[...]

        lane = jax.lax.broadcasted_iota(jnp.int32, z2.shape, 1)
        act_mask = lane < num_actions

        # Softmax over the `num_actions` valid lanes only.  Exponentiate the
        # already-masked logits so value/padding lanes give exp(-inf) = 0 and
        # can never overflow before the select.
        logits = jnp.where(act_mask, z2, -jnp.inf)
        m = jnp.max(logits, axis=-1, keepdims=True)
        e = jnp.exp(logits - m)
        s = jnp.sum(e, axis=-1, keepdims=True)
        probs = e / s

        # lanes < NA : probs, lane == NA : state value, lanes > NA : 0.
        out_ref[...] = jnp.where(lane == num_actions, z2, probs)


def policy_forward(x, params, *, num_actions=NUM_ACTIONS, tk=IN_FEATURES):
    """x: (B, 6400) f32 -> (probs (B, num_actions), values (B, 1))."""
    w1, b1, w_a, b_a, w_v, b_v = params  # PyTorch Linear layouts (out, in)
    B, K = x.shape
    assert K == IN_FEATURES
    assert K % tk == 0 and tk % 128 == 0

    # Dominant HBM stream: W1 transposed to (K, HIDDEN), cast to bf16 and
    # lane-padded to 256 so the DMA is contiguous and tile aligned.
    w1t = jnp.asarray(w1, jnp.float32).T.astype(jnp.bfloat16)        # (K, 200)
    w1p = jnp.zeros((K, HIDDEN_PAD), jnp.bfloat16).at[:, :HIDDEN].set(w1t)

    b1p = jnp.zeros((1, HIDDEN_PAD), jnp.float32).at[:, :HIDDEN].set(
        jnp.asarray(b1, jnp.float32).reshape(1, HIDDEN))

    # Heads packed into one 128-wide f32 output slab (tiny, stays f32).
    w2p = jnp.zeros((HIDDEN_PAD, OUT_PAD), jnp.float32)
    w2p = w2p.at[:HIDDEN, :num_actions].set(jnp.asarray(w_a, jnp.float32).T)
    w2p = w2p.at[:HIDDEN, num_actions:num_actions + 1].set(
        jnp.asarray(w_v, jnp.float32).T)
    b2p = jnp.zeros((1, OUT_PAD), jnp.float32)
    b2p = b2p.at[:, :num_actions].set(jnp.asarray(b_a, jnp.float32))
    b2p = b2p.at[:, num_actions:num_actions + 1].set(
        jnp.asarray(b_v, jnp.float32).reshape(1, 1))

    xb = x.astype(jnp.bfloat16)   # activations into the MXU also bf16

    kernel = functools.partial(_policy_kernel, num_actions)

    out = pl.pallas_call(
        kernel,
        out_shape=jax.ShapeDtypeStruct((B, OUT_PAD), jnp.float32),
        grid_spec=pltpu.PrefetchScalarGridSpec(
            num_scalar_prefetch=0,
            grid=(K // tk,),                                     # default: 1 step
            in_specs=[
                # x: single untiled (B, K) block, constant index -> one DMA.
                pl.BlockSpec((B, K), lambda k: (0, 0)),
                pl.BlockSpec((tk, HIDDEN_PAD), lambda k: (k, 0)),     # W1 stream
                pl.BlockSpec((1, HIDDEN_PAD), lambda k: (0, 0)),      # b1
                pl.BlockSpec((HIDDEN_PAD, OUT_PAD), lambda k: (0, 0)),  # fused heads
                pl.BlockSpec((1, OUT_PAD), lambda k: (0, 0)),         # fused bias
            ],
            out_specs=pl.BlockSpec((B, OUT_PAD), lambda k: (0, 0)),
            scratch_shapes=[pltpu.VMEM((B, HIDDEN_PAD), jnp.float32)],
        ),
        compiler_params=pltpu.CompilerParams(
            dimension_semantics=("arbitrary",),
            # ~6.6 MB of double-buffered bf16 W1 at tk=6400; 32 MiB leaves
            # headroom for raising B (re-check before B*tk tiles approach this,
            # v7x physical VMEM is only 64 MiB).
            vmem_limit_bytes=32 * 1024 * 1024),
    )(xb, w1p, b1p, w2p, b2p)

    probs = out[:, :num_actions]
    values = out[:, num_actions:num_actions + 1]
    return probs, values


def ref_forward(x, params, *, quantize_bf16=False):
    """Pure-JAX reference.  quantize_bf16=True applies the same bf16 rounding
    of x / W1 that the kernel uses (f32 math otherwise)."""
    w1, b1, w_a, b_a, w_v, b_v = (jnp.asarray(p, jnp.float32) for p in params)
    xr = jnp.asarray(x, jnp.float32)
    if quantize_bf16:
        xr = xr.astype(jnp.bfloat16).astype(jnp.float32)
        w1 = w1.astype(jnp.bfloat16).astype(jnp.float32)
    hi = jax.lax.Precision.HIGHEST
    h = jnp.maximum(jnp.dot(xr, w1.T, precision=hi) + b1, 0.0)
    probs = jax.nn.softmax(jnp.dot(h, w_a.T, precision=hi) + b_a, axis=1)
    values = jnp.dot(h, w_v.T, precision=hi) + b_v
    return probs, values


def init_params(key, num_actions=NUM_ACTIONS):
    """Deterministic init mimicking nn.Linear's uniform(+/-1/sqrt(fan_in))."""
    ks = jax.random.split(key, 6)

    def u(k, shape, fan_in):
        bound = 1.0 / np.sqrt(fan_in)
        return jax.random.uniform(k, shape, jnp.float32, -bound, bound)

    w1 = u(ks[0], (HIDDEN, IN_FEATURES), IN_FEATURES)
    b1 = u(ks[1], (HIDDEN,), IN_FEATURES)
    w_a = u(ks[2], (num_actions, HIDDEN), HIDDEN)
    b_a = u(ks[3], (num_actions,), HIDDEN)
    w_v = u(ks[4], (1, HIDDEN), HIDDEN)
    b_v = u(ks[5], (1,), HIDDEN)
    return (w1, b1, w_a, b_a, w_v, b_v)


if __name__ == "__main__":
    key = jax.random.PRNGKey(0)
    pkey, xkey = jax.random.split(key)
    params = init_params(pkey)

    B = 2
    x = jax.random.normal(xkey, (B, IN_FEATURES), jnp.float32)

    probs, values = policy_forward(x, params)
    jax.block_until_ready((probs, values))
    assert probs.shape == (B, NUM_ACTIONS) and values.shape == (B, 1)

    # Check 1: against a reference using the SAME bf16 rounding of x / W1
    # (tests the kernel math itself, independent of the quantization choice).
    q_probs, q_values = ref_forward(x, params, quantize_bf16=True)
    np.testing.assert_allclose(np.asarray(probs), np.asarray(q_probs),
                               rtol=1e-2, atol=1e-2)
    np.testing.assert_allclose(np.asarray(values), np.asarray(q_values),
                               rtol=1e-2, atol=1e-2)

    # Check 2: against the full-f32 module (tolerance relaxed for the bf16
    # weight/activation stream; accumulation and epilogue remain f32).
    f_probs, f_values = ref_forward(x, params, quantize_bf16=False)
    np.testing.assert_allclose(np.asarray(probs), np.asarray(f_probs),
                               rtol=5e-2, atol=5e-2)
    np.testing.assert_allclose(np.asarray(values), np.asarray(f_values),
                               rtol=5e-2, atol=5e-2)

    np.testing.assert_allclose(np.asarray(probs).sum(axis=1),
                               np.ones(B), rtol=1e-5, atol=1e-5)

    print("KERNEL_OK")
</pallas_src>

<mosaic_0001>
module attributes {stable_mosaic.version = 11 : i64} {
  func.func @_policy_kernel(%arg0: i32, %arg1: memref<2x6400xbf16, #tpu.memory_space<vmem>>, %arg2: memref<6400x256xbf16, #tpu.memory_space<vmem>>, %arg3: memref<1x256xf32, #tpu.memory_space<vmem>>, %arg4: memref<256x128xf32, #tpu.memory_space<vmem>>, %arg5: memref<1x128xf32, #tpu.memory_space<vmem>>, %arg6: memref<2x128xf32, #tpu.memory_space<vmem>>, %arg7: memref<2x256xf32, #tpu.memory_space<vmem>>) attributes {dimension_semantics = [#tpu.dimension_semantics<arbitrary>], iteration_bounds = array<i64: 1>, scalar_prefetch = 0 : i64, scratch_operands = 1 : i64, tpu.core_type = #tpu.core_type<tc>, window_params = [{pipeline_mode = #tpu.pipeline_mode<synchronous>, transform_indices = @transform_0, window_bounds = array<i64: 2, 6400>}, {transform_indices = @transform_1, window_bounds = array<i64: 6400, 256>}, {pipeline_mode = #tpu.pipeline_mode<synchronous>, transform_indices = @transform_2, window_bounds = array<i64: 1, 256>}, {pipeline_mode = #tpu.pipeline_mode<synchronous>, transform_indices = @transform_3, window_bounds = array<i64: 256, 128>}, {pipeline_mode = #tpu.pipeline_mode<synchronous>, transform_indices = @transform_4, window_bounds = array<i64: 1, 128>}, {pipeline_mode = #tpu.pipeline_mode<synchronous>, transform_indices = @transform_5, window_bounds = array<i64: 2, 128>}]} {
    %c0_i32 = arith.constant 0 : i32
    %0 = arith.cmpi eq, %arg0, %c0_i32 : i32
    %1 = arith.extui %0 : i1 to i32
    %c0_i32_0 = arith.constant 0 : i32
    %2 = arith.cmpi ne, %1, %c0_i32_0 : i32
    scf.if %2 {
      %cst_9 = arith.constant 0.000000e+00 : f32
      %15 = vector.broadcast %cst_9 : f32 to vector<2x256xf32>
      %c0_10 = arith.constant 0 : index
      %c0_11 = arith.constant 0 : index
      %16 = vector.load %arg7[%c0_10, %c0_11] : memref<2x256xf32, #tpu.memory_space<vmem>>, vector<2x256xf32>
      tpu.vector_store %arg7[%c0_10, %c0_11], %15 {strides = array<i32>} : memref<2x256xf32, #tpu.memory_space<vmem>>, vector<2x256xf32>,
    } else {
    }
    %c6400_i32 = arith.constant 6400 : i32
    %3 = arith.muli %arg0, %c6400_i32 : i32
    %4 = tpu.assume_multiple %3, 128 : i32
    %c0 = arith.constant 0 : index
    %5 = arith.index_cast %4 : i32 to index
    %6 = vector.load %arg1[%c0, %5] : memref<2x6400xbf16, #tpu.memory_space<vmem>>, vector<2x6400xbf16>
    %c0_1 = arith.constant 0 : index
    %c0_2 = arith.constant 0 : index
    %7 = vector.load %arg7[%c0_1, %c0_2] : memref<2x256xf32, #tpu.memory_space<vmem>>, vector<2x256xf32>
    %c0_3 = arith.constant 0 : index
    %c0_4 = arith.constant 0 : index
    %8 = vector.load %arg2[%c0_3, %c0_4] : memref<6400x256xbf16, #tpu.memory_space<vmem>>, vector<6400x256xbf16>
    %cst = arith.constant dense<0.000000e+00> : vector<2x256xf32>
    %9 = tpu.matmul %6, %8, %cst {dimension_numbers = #tpu.dot_dimension_numbers<[1], [0], [0], [1], [0, 0, 1, 1], [], []>} : vector<2x6400xbf16>, vector<6400x256xbf16>, vector<2x256xf32> -> vector<2x256xf32>
    %10 = arith.addf %7, %9 : vector<2x256xf32>
    %c0_5 = arith.constant 0 : index
    %c0_6 = arith.constant 0 : index
    %11 = vector.load %arg7[%c0_5, %c0_6] : memref<2x256xf32, #tpu.memory_space<vmem>>, vector<2x256xf32>
    tpu.vector_store %arg7[%c0_5, %c0_6], %10 {strides = array<i32>} : memref<2x256xf32, #tpu.memory_space<vmem>>, vector<2x256xf32>,
    %c0_i32_7 = arith.constant 0 : i32
    %12 = arith.cmpi eq, %arg0, %c0_i32_7 : i32
    %13 = arith.extui %12 : i1 to i32
    %c0_i32_8 = arith.constant 0 : i32
    %14 = arith.cmpi ne, %13, %c0_i32_8 : i32
    scf.if %14 {
      %c0_9 = arith.constant 0 : index
      %c0_10 = arith.constant 0 : index
      %15 = vector.load %arg7[%c0_9, %c0_10] : memref<2x256xf32, #tpu.memory_space<vmem>>, vector<2x256xf32>
      %c0_11 = arith.constant 0 : index
      %c0_12 = arith.constant 0 : index
      %16 = vector.load %arg3[%c0_11, %c0_12] : memref<1x256xf32, #tpu.memory_space<vmem>>, vector<1x256xf32>
      %17 = vector.broadcast %16 : vector<1x256xf32> to vector<2x256xf32>
      %18 = arith.addf %15, %17 : vector<2x256xf32>
      %cst_13 = arith.constant 0.000000e+00 : f32
      %19 = vector.broadcast %cst_13 : f32 to vector<2x256xf32>
      %20 = arith.maximumf %18, %19 : vector<2x256xf32>
      %c0_14 = arith.constant 0 : index
      %c0_15 = arith.constant 0 : index
      %21 = vector.load %arg4[%c0_14, %c0_15] : memref<256x128xf32, #tpu.memory_space<vmem>>, vector<256x128xf32>
      %cst_16 = arith.constant dense<0.000000e+00> : vector<2x128xf32>
      %22 = tpu.matmul %20, %21, %cst_16 {dimension_numbers = #tpu.dot_dimension_numbers<[1], [0], [0], [1], [0, 0, 1, 1], [], []>} : vector<2x256xf32>, vector<256x128xf32>, vector<2x128xf32> -> vector<2x128xf32>
      %c0_17 = arith.constant 0 : index
      %c0_18 = arith.constant 0 : index
      %23 = vector.load %arg5[%c0_17, %c0_18] : memref<1x128xf32, #tpu.memory_space<vmem>>, vector<1x128xf32>
      %24 = vector.broadcast %23 : vector<1x128xf32> to vector<2x128xf32>
      %25 = arith.addf %22, %24 : vector<2x128xf32>
      %26 = tpu.iota {dimensions = array<i32: 1>} : vector<2x128xi32>
      %c2_i32 = arith.constant 2 : i32
      %27 = vector.broadcast %c2_i32 : i32 to vector<2x128xi32>
      %28 = arith.cmpi slt, %26, %27 : vector<2x128xi32>
      %cst_19 = arith.constant 0xFF800000 : f32
      %29 = vector.broadcast %cst_19 : f32 to vector<2x128xf32>
      %30 = arith.select %28, %25, %29 : vector<2x128xi1>, vector<2x128xf32>
      %cst_20 = arith.constant dense<0xFF800000> : vector<2xf32>
      %31 = vector.multi_reduction <maximumf>, %30, %cst_20 [1] : vector<2x128xf32> to vector<2xf32>
      %32 = vector.shape_cast %31 : vector<2xf32> to vector<2x1xf32>
      %33 = vector.broadcast %32 : vector<2x1xf32> to vector<2x128xf32>
      %34 = arith.subf %30, %33 : vector<2x128xf32>
      %35 = math.exp %34 : vector<2x128xf32>
      %cst_21 = arith.constant dense<0.000000e+00> : vector<2xf32>
      %36 = vector.multi_reduction <add>, %35, %cst_21 [1] : vector<2x128xf32> to vector<2xf32>
      %37 = vector.shape_cast %36 : vector<2xf32> to vector<2x1xf32>
      %38 = vector.broadcast %37 : vector<2x1xf32> to vector<2x128xf32>
      %39 = arith.divf %35, %38 : vector<2x128xf32>
      %c2_i32_22 = arith.constant 2 : i32
      %40 = vector.broadcast %c2_i32_22 : i32 to vector<2x128xi32>
      %41 = arith.cmpi eq, %26, %40 : vector<2x128xi32>
      %42 = arith.select %41, %25, %39 : vector<2x128xi1>, vector<2x128xf32>
      %c0_23 = arith.constant 0 : index
      %c0_24 = arith.constant 0 : index
      %43 = vector.load %arg6[%c0_23, %c0_24] : memref<2x128xf32, #tpu.memory_space<vmem>>, vector<2x128xf32>
      tpu.vector_store %arg6[%c0_23, %c0_24], %42 {strides = array<i32>} : memref<2x128xf32, #tpu.memory_space<vmem>>, vector<2x128xf32>,
    } else {
    }
    return
  }
  func.func @transform_0(%arg0: i32) -> (i32, i32) {
    %c0_i32 = arith.constant 0 : i32
    %c0_i32_0 = arith.constant 0 : i32
    %c0_i32_1 = arith.constant 0 : i32
    return %c0_i32, %c0_i32_0 : i32, i32
  }
  func.func @transform_1(%arg0: i32) -> (i32, i32) {
    %c0_i32 = arith.constant 0 : i32
    %c0_i32_0 = arith.constant 0 : i32
    return %arg0, %c0_i32 : i32, i32
  }
  func.func @transform_2(%arg0: i32) -> (i32, i32) {
    %c0_i32 = arith.constant 0 : i32
    %c0_i32_0 = arith.constant 0 : i32
    %c0_i32_1 = arith.constant 0 : i32
    return %c0_i32, %c0_i32_0 : i32, i32
  }
  func.func @transform_3(%arg0: i32) -> (i32, i32) {
    %c0_i32 = arith.constant 0 : i32
    %c0_i32_0 = arith.constant 0 : i32
    %c0_i32_1 = arith.constant 0 : i32
    return %c0_i32, %c0_i32_0 : i32, i32
  }
  func.func @transform_4(%arg0: i32) -> (i32, i32) {
    %c0_i32 = arith.constant 0 : i32
    %c0_i32_0 = arith.constant 0 : i32
    %c0_i32_1 = arith.constant 0 : i32
    return %c0_i32, %c0_i32_0 : i32, i32
  }
  func.func @transform_5(%arg0: i32) -> (i32, i32) {
    %c0_i32 = arith.constant 0 : i32
    %c0_i32_0 = arith.constant 0 : i32
    %c0_i32_1 = arith.constant 0 : i32
    return %c0_i32, %c0_i32_0 : i32, i32
  }
}

</mosaic_0001>

<bundles_post_ra>
// kernel: tpu_custom_call.1
= control target key start
LH: loop header
LB: loop body
LE: loop exit
PB: predicated region body
PF: predicated region fallthrough
CT: control target
= control target key end

     0   :  { %10 = vsyncpa [#allocation4], 0  ;;  %s9165_s0 = inlined_call_operand.hbm [shape: bf16[2,6400], index: 0, kind: input, shape index: {}]   ;;  %s9166_s1 = inlined_call_operand.hbm [shape: bf16[6400,256], index: 1, kind: input, shape index: {}]   ;;  %s9167_s2 = inlined_call_operand.hbm [shape: f32[1,256], index: 2, kind: input, shape index: {}]   ;;  %s9168_s3 = inlined_call_operand.hbm [shape: f32[256,128], index: 3, kind: input, shape index: {}]   ;;  %s9169_s4 = inlined_call_operand.hbm [shape: f32[1,128], index: 4, kind: input, shape index: {}]   ;;  %s9170_s5 = inlined_call_operand.hbm [shape: f32[2,128], index: 5, kind: output, shape index: {}]  }
   0x1   :  { %11 = vsyncpa [#allocation7], 0 }
   0x2   :  { %12 = vsyncpa [#allocation10], 0 }
   0x3   :  { %13 = vsyncpa [#allocation5], 0  ;;  %s8821_s18 = smov [#allocation6]   ;;  %s8681_s22 = scalar_lea.hbm %s9166_s1, 102400 }
   0x4   :  { %s29_s19 = sshll.u32 %s8821_s18, 4  ;;  %p8682_p0 = scmp.ne.s32.totalorder %s9166_s1, %s8681_s22  ;;  %s30_s19 = int_to_ptr.vmem [resolvable:$true] %s29_s19 }
   0x5   :  { %p8685_p1 = scmp.lt.u32.totalorder %s8681_s22, %s9166_s1 }
   0x7   :  { %p8687_p2 = pnand %p8685_p1, %p8682_p0 }
   0x9   :  { %8690 = shalt.err (!%p8687_p2)
}
   0xa   :  { %s8691_s27 = scalar_lea.vmem %s30_s19, 102400  ;;  %p8696_p4 = scmp.lt.s32.totalorder %s30_s19, %s30_s19 }
   0xb   :  { %p8692_p3 = scmp.ne.s32.totalorder %s30_s19, %s8691_s27  ;;  %p8697_p5 = scmp.lt.s32.totalorder %s8691_s27, %s8691_s27 }
   0xd   :  { %p8698_p6 = por %p8697_p5, %p8696_p4 }
   0xf   :  { %p8699_p7 = pnand %p8698_p6, %p8692_p3 }
  0x11   :  { %8702 = shalt.err (!%p8699_p7)
}
  0x12   :  { %s8822_s28 = smov 128   ;;  %s8823_s29 = smov 8  }
  0x13   :  { %35 = dma.hbm_to_vmem [thread:$0]  %s9166_s1, 102400, %s30_s19, [#allocation7], %s8822_s28, %s8822_s28, %s8823_s29  }
  0x14   :  { %s8824_s7 = smov [#allocation9]   ;;  %s8825_s9 = smov [#allocation3]  }
  0x15   :  { %s51_s8 = sshll.u32 %s8824_s7, 4  ;;  %s20_s10 = sshll.u32 %s8825_s9, 4  ;;  %s52_s8 = int_to_ptr.vmem [resolvable:$true] %s51_s8  ;;  %s21_s10 = int_to_ptr.vmem [resolvable:$true] %s20_s10 }
  0x16   :  { %s8703_s13 = scalar_lea.hbm %s9168_s3, 4096 }
  0x17   :  { %p8704_p8 = scmp.ne.s32.totalorder %s9168_s3, %s8703_s13  ;;  %p8707_p9 = scmp.lt.u32.totalorder %s8703_s13, %s9168_s3 }
  0x19   :  { %p8709_p10 = pnand %p8707_p9, %p8704_p8 }
  0x1b   :  { %8712 = shalt.err (!%p8709_p10)
}
  0x1c   :  { %s8713_s1 = scalar_lea.vmem %s52_s8, 4096  ;;  %p8718_p12 = scmp.lt.s32.totalorder %s52_s8, %s52_s8 }
  0x1d   :  { %p8714_p11 = scmp.ne.s32.totalorder %s52_s8, %s8713_s1  ;;  %p8719_p13 = scmp.lt.s32.totalorder %s8713_s1, %s8713_s1 }
  0x1f   :  { %p8720_p0 = por %p8719_p13, %p8718_p12 }
  0x21   :  { %p8721_p1 = pnand %p8720_p0, %p8714_p11 }
  0x23   :  { %8724 = shalt.err (!%p8721_p1)
}
  0x24   :  { %57 = dma.hbm_to_vmem [thread:$0]  %s9168_s3, 4096, %s52_s8, [#allocation10], %s8822_s28, %s8822_s28, %s8823_s29  }
  0x25   :  { %s8725_s22 = scalar_lea.hbm %s9165_s0, 800 }
  0x26   :  { %p8726_p2 = scmp.ne.s32.totalorder %s9165_s0, %s8725_s22  ;;  %p8729_p3 = scmp.lt.u32.totalorder %s8725_s22, %s9165_s0 }
  0x28   :  { %p8731_p4 = pnand %p8729_p3, %p8726_p2 }
  0x2a   :  { %8734 = shalt.err (!%p8731_p4)
}
  0x2b   :  { %s8735_s27 = scalar_lea.vmem %s21_s10, 800  ;;  %p8740_p6 = scmp.lt.s32.totalorder %s21_s10, %s21_s10 }
  0x2c   :  { %p8736_p5 = scmp.ne.s32.totalorder %s21_s10, %s8735_s27  ;;  %p8741_p7 = scmp.lt.s32.totalorder %s8735_s27, %s8735_s27 }
  0x2e   :  { %p8742_p8 = por %p8741_p7, %p8740_p6 }
  0x30   :  { %p8743_p9 = pnand %p8742_p8, %p8736_p5 }
  0x32   :  { %8746 = shalt.err (!%p8743_p9)
}
  0x33   :  { %23 = dma.hbm_to_vmem [thread:$0]  %s9165_s0, 800, %s21_s10, [#allocation4]  }
  0x34   :  { %s8826_s29 = smov [#allocation8]   ;;  %s8827_s6 = smov [#allocation11]  }
  0x35   :  { %s42_s30 = sshll.u32 %s8826_s29, 4  ;;  %s64_s7 = sshll.u32 %s8827_s6, 4  ;;  %s43_s30 = int_to_ptr.vmem [resolvable:$true] %s42_s30  ;;  %s65_s7 = int_to_ptr.vmem [resolvable:$true] %s64_s7 }
  0x36   :  { %s8747_s11 = scalar_lea.hbm %s9167_s2, 32 }
  0x37   :  { %p8748_p10 = scmp.ne.s32.totalorder %s9167_s2, %s8747_s11  ;;  %p8751_p11 = scmp.lt.u32.totalorder %s8747_s11, %s9167_s2 }
  0x39   :  { %p8753_p12 = pnand %p8751_p11, %p8748_p10 }
  0x3b   :  { %8756 = shalt.err (!%p8753_p12)
}
  0x3c   :  { %s8757_s0 = scalar_lea.vmem %s43_s30, 32  ;;  %p8762_p0 = scmp.lt.s32.totalorder %s43_s30, %s43_s30 }
  0x3d   :  { %p8758_p13 = scmp.ne.s32.totalorder %s43_s30, %s8757_s0  ;;  %p8763_p1 = scmp.lt.s32.totalorder %s8757_s0, %s8757_s0 }
  0x3f   :  { %p8764_p2 = por %p8763_p1, %p8762_p0 }
  0x41   :  { %p8765_p3 = pnand %p8764_p2, %p8758_p13 }
  0x43   :  { %8768 = shalt.err (!%p8765_p3)
}
  0x44   :  { %45 = dma.hbm_to_vmem [thread:$0]  %s9167_s2, 32, %s43_s30, [#allocation7]  }
  0x45   :  { %s8769_s18 = scalar_lea.hbm %s9169_s4, 16 }
  0x46   :  { %p8770_p4 = scmp.ne.s32.totalorder %s9169_s4, %s8769_s18  ;;  %p8773_p5 = scmp.lt.u32.totalorder %s8769_s18, %s9169_s4 }
  0x48   :  { %p8775_p6 = pnand %p8773_p5, %p8770_p4 }
  0x4a   :  { %8778 = shalt.err (!%p8775_p6)
}
  0x4b   :  { %s8779_s23 = scalar_lea.vmem %s65_s7, 16  ;;  %s8783_s24 = scalar_lea.vmem %s65_s7, 32 }
  0x4c   :  { %p8780_p7 = scmp.ne.s32.totalorder %s65_s7, %s8779_s23  ;;  %p8784_p8 = scmp.lt.s32.totalorder %s65_s7, %s65_s7 }
  0x4d   :  { %p8785_p9 = scmp.lt.s32.totalorder %s8783_s24, %s8779_s23 }
  0x4f   :  { %p8786_p10 = por %p8785_p9, %p8784_p8 }
  0x51   :  { %p8787_p11 = pnand %p8786_p10, %p8780_p7 }
  0x53   :  { %8790 = shalt.err (!%p8787_p11)
}
  0x54   :  { %67 = dma.hbm_to_vmem [thread:$0]  %s9169_s4, 16, %s65_s7, [#allocation10]  }
  0x55   :  { %8813 = dma.done.wait [#allocation4], 800  }
  0x56   :  { %8814 = vsyncadd [#allocation4], 4294966496 }
  0x57   :  { %8815 = dma.done.wait [#allocation7], 102432  }
  0x58   :  { %8816 = vsyncadd [#allocation7], 4294864864 }
  0x59   :  { %8817 = dma.done.wait [#allocation10], 4112  }
  0x5a   :  { %8818 = vsyncadd [#allocation10], 4294963184  ;;  %v7467_v0 = vld [vmem:[#allocation6 + $0x4] ss:$8 sps:$4 sm:$0xff]   ;;  %v7471_v2 = vld [vmem:[#allocation6] ss:$8 sps:$4 sm:$0xff]   ;;  %v911_v38 = vlaneseq }
  0x5b   :  { %v7469_v1 = vld [vmem:[#allocation6 + $0xc04] ss:$8 sps:$4 sm:$0xff]   ;;  %5273 = vmatprep.subr.bf16.mxu1 %v7467_v0  ;;  %v7472_v3 = vld [vmem:[#allocation6 + $0xc00] ss:$8 sps:$4 sm:$0xff]   ;;  %v7473_v4 = vld [vmem:[#allocation6 + $0x14] ss:$8 sps:$4 sm:$0xff]  }
  0x5c   :  { %5765 = vmatprep.subr.bf16.mxu0 %v7469_v1  ;;  %5274 = vmatpush1.bf16.msra.mxu1 %v7471_v2  ;;  %v7475_v5 = vld [vmem:[#allocation6 + $0xc14] ss:$8 sps:$4 sm:$0xff]   ;;  %v7477_v6 = vld [vmem:[#allocation6 + $0x10] ss:$8 sps:$4 sm:$0xff]   ;;  %v7479_v8 = vld [vmem:[#allocation6 + $0x24] ss:$8 sps:$4 sm:$0xff]  }
  0x5d   :  { %5766 = vmatpush1.bf16.msra.mxu0 %v7472_v3  ;;  %5275 = vmatprep.subr.bf16.mxu1 %v7473_v4  ;;  %v7478_v7 = vld [vmem:[#allocation6 + $0xc10] ss:$8 sps:$4 sm:$0xff]   ;;  %v7481_v9 = vld [vmem:[#allocation6 + $0xc24] ss:$8 sps:$4 sm:$0xff]   ;;  %v7483_v10 = vld [vmem:[#allocation6 + $0x20] ss:$8 sps:$4 sm:$0xff]  }
  0x5e   :  { %5767 = vmatprep.subr.bf16.mxu0 %v7475_v5  ;;  %v7484_v11 = vld [vmem:[#allocation6 + $0xc20] ss:$8 sps:$4 sm:$0xff]   ;;  %v7485_v12 = vld [vmem:[#allocation6 + $0x34] ss:$8 sps:$4 sm:$0xff]   ;;  %v7489_v14 = vld [vmem:[#allocation6 + $0x30] ss:$8 sps:$4 sm:$0xff]  }
  0x5f   :  { %v7487_v13 = vld [vmem:[#allocation6 + $0xc34] ss:$8 sps:$4 sm:$0xff]   ;;  %v7490_v15 = vld [vmem:[#allocation6 + $0xc30] ss:$8 sps:$4 sm:$0xff]   ;;  %v7491_v16 = vld [vmem:[#allocation6 + $0x44] ss:$8 sps:$4 sm:$0xff]  }
  0x60   :  { %5276 = vmatpush1.bf16.msra.mxu1 %v7477_v6  ;;  %v7493_v17 = vld [vmem:[#allocation6 + $0xc44] ss:$8 sps:$4 sm:$0xff]   ;;  %v7495_v18 = vld [vmem:[#allocation6 + $0x40] ss:$8 sps:$4 sm:$0xff]   ;;  %v7497_v20 = vld [vmem:[#allocation6 + $0x54] ss:$8 sps:$4 sm:$0xff]  }
  0x61   :  { %5768 = vmatpush1.bf16.msra.mxu0 %v7478_v7  ;;  %5277 = vmatprep.subr.bf16.mxu1 %v7479_v8  ;;  %v7496_v19 = vld [vmem:[#allocation6 + $0xc40] ss:$8 sps:$4 sm:$0xff]   ;;  %v7499_v21 = vld [vmem:[#allocation6 + $0xc54] ss:$8 sps:$4 sm:$0xff]   ;;  %v7501_v22 = vld [vmem:[#allocation6 + $0x50] ss:$8 sps:$4 sm:$0xff]  }
  0x62   :  { %5769 = vmatprep.subr.bf16.mxu0 %v7481_v9  ;;  %v7502_v23 = vld [vmem:[#allocation6 + $0xc50] ss:$8 sps:$4 sm:$0xff]   ;;  %v7503_v24 = vld [vmem:[#allocation6 + $0x64] ss:$8 sps:$4 sm:$0xff]   ;;  %v7507_v26 = vld [vmem:[#allocation6 + $0x60] ss:$8 sps:$4 sm:$0xff]  }
  0x63   :  { %v7505_v25 = vld [vmem:[#allocation6 + $0xc64] ss:$8 sps:$4 sm:$0xff]   ;;  %v7508_v27 = vld [vmem:[#allocation6 + $0xc60] ss:$8 sps:$4 sm:$0xff]   ;;  %v7509_v28 = vld [vmem:[#allocation6 + $0x74] ss:$8 sps:$4 sm:$0xff]  }
  0x64   :  { %5278 = vmatpush1.bf16.msra.mxu1 %v7483_v10  ;;  %v7511_v29 = vld [vmem:[#allocation6 + $0xc74] ss:$8 sps:$4 sm:$0xff]   ;;  %v7513_v30 = vld [vmem:[#allocation6 + $0x70] ss:$8 sps:$4 sm:$0xff]   ;;  %v7515_v32 = vld [vmem:[#allocation6 + $0x84] ss:$8 sps:$4 sm:$0xff]  }
  0x65   :  { %5770 = vmatpush1.bf16.msra.mxu0 %v7484_v11  ;;  %5279 = vmatprep.subr.bf16.mxu1 %v7485_v12  ;;  %v7514_v31 = vld [vmem:[#allocation6 + $0xc70] ss:$8 sps:$4 sm:$0xff]   ;;  %v7517_v33 = vld [vmem:[#allocation6 + $0xc84] ss:$8 sps:$4 sm:$0xff]   ;;  %v7519_v34 = vld [vmem:[#allocation6 + $0x80] ss:$8 sps:$4 sm:$0xff]  }
  0x66   :  { %5771 = vmatprep.subr.bf16.mxu0 %v7487_v13  ;;  %v7520_v35 = vld [vmem:[#allocation6 + $0xc80] ss:$8 sps:$4 sm:$0xff]   ;;  %v8828_v36 = vmov 1966171168   ;;  %v7521_v39 = vld [vmem:[#allocation6 + $0x94] ss:$8 sps:$4 sm:$0xff]  }
  0x67   :  { %v909_v37 = vunpack.c.l.s4 %v8828_v36  ;;  %v7523_v40 = vld [vmem:[#allocation6 + $0xc94] ss:$8 sps:$4 sm:$0xff]   ;;  %v7525_v41 = vld [vmem:[#allocation6 + $0x90] ss:$8 sps:$4 sm:$0xff]   ;;  %v8923_v43 = vshrl.u32 %v911_v38, 7  ;;  %v8932_v56 = vld [vmem:[#allocation3 + $0x18] sm:$0xff] }
  0x68   :  { %5280 = vmatpush1.bf16.msra.mxu1 %v7489_v14  ;;  %v7526_v44 = vld [vmem:[#allocation6 + $0xc90] ss:$8 sps:$4 sm:$0xff]   ;;  %v7527_v45 = vld [vmem:[#allocation6 + $0xa4] ss:$8 sps:$4 sm:$0xff]   ;;  %v7531_v47 = vld [vmem:[#allocation6 + $0xa0] ss:$8 sps:$4 sm:$0xff]  }
  0x69   :  { %5772 = vmatpush1.bf16.msra.mxu0 %v7490_v15  ;;  %5281 = vmatprep.subr.bf16.mxu1 %v7491_v16  ;;  %v910_v42 = vunpack.c.0.s8 %v909_v37  ;;  %v7529_v46 = vld [vmem:[#allocation6 + $0xca4] ss:$8 sps:$4 sm:$0xff]   ;;  %v7532_v48 = vld [vmem:[#allocation6 + $0xca0] ss:$8 sps:$4 sm:$0xff]   ;;  %v7533_v50 = vld [vmem:[#allocation6 + $0xb4] ss:$8 sps:$4 sm:$0xff]  }
  0x6a   :  { %5773 = vmatprep.subr.bf16.mxu0 %v7493_v17  ;;  %v7535_v51 = vld [vmem:[#allocation6 + $0xcb4] ss:$8 sps:$4 sm:$0xff]   ;;  %v7537_v53 = vld [vmem:[#allocation6 + $0xb0] ss:$8 sps:$4 sm:$0xff]   ;;  %v7539_v57 = vld [vmem:[#allocation6 + $0xc4] ss:$8 sps:$4 sm:$0xff]  }
  0x6b   :  { %v8926_v49 = vsub.s32 %v910_v42, %v8923_v43  ;;  %v8928_v52 = vld [vmem:[#allocation3] sm:$0xff]  ;;  %v7543_v63 = vld [vmem:[#allocation6 + $0xc0] ss:$8 sps:$4 sm:$0xff]   ;;  %vm6460_vm1 = vcmask 1041408   ;;  %s8831_s4 = smov [#allocation12]  }
  0x6c   :  { %5282 = vmatpush1.bf16.msra.mxu1 %v7495_v18  ;;  %v7538_v55 = vld [vmem:[#allocation6 + $0xcb0] ss:$8 sps:$4 sm:$0xff]   ;;  %v7541_v58 = vld [vmem:[#allocation6 + $0xcc4] ss:$8 sps:$4 sm:$0xff]   ;;  %v7544_v0 = vld [vmem:[#allocation6 + $0xcc0] ss:$8 sps:$4 sm:$0xff]  }
  0x6d   :  { %5774 = vmatpush1.bf16.msra.mxu0 %v7496_v19  ;;  %5283 = vmatprep.subr.bf16.mxu1 %v7497_v20  ;;  %v914_v54 = vrot.slane %v8928_v52, %v8926_v49  ;;  %v1061_v60 = vrot.slane %v8932_v56, %v8926_v49  ;;  %v7545_v1 = vld [vmem:[#allocation6 + $0xd4] ss:$8 sps:$4 sm:$0xff]   ;;  %v7549_v4 = vld [vmem:[#allocation6 + $0xd0] ss:$8 sps:$4 sm:$0xff]   ;;  %v7551_v6 = vld [vmem:[#allocation6 + $0xe4] ss:$8 sps:$4 sm:$0xff]  }
  0x6e   :  { %5775 = vmatprep.subr.bf16.mxu0 %v7499_v21  ;;  %v7547_v2 = vld [vmem:[#allocation6 + $0xcd4] ss:$8 sps:$4 sm:$0xff]   ;;  %v7550_v5 = vld [vmem:[#allocation6 + $0xcd0] ss:$8 sps:$4 sm:$0xff]   ;;  %v7553_v7 = vld [vmem:[#allocation6 + $0xce4] ss:$8 sps:$4 sm:$0xff]  }
  0x6f   :  { %v922_v59 = vcombine.high %v914_v54, %v914_v54  ;;  %v1069_v62 = vcombine.high %v1061_v60, %v1061_v60  ;;  %v7555_v8 = vld [vmem:[#allocation6 + $0xe0] ss:$8 sps:$4 sm:$0xff]   ;;  %v7557_v10 = vld [vmem:[#allocation6 + $0xf4] ss:$8 sps:$4 sm:$0xff]   ;;  %v7561_v12 = vld [vmem:[#allocation6 + $0xf0] ss:$8 sps:$4 sm:$0xff]   ;;  %v8939_v16 = vrot.slane %v914_v54, %v8926_v49  ;;  %v8942_v17 = vrot.slane %v1061_v60, %v8926_v49 }
  0x70   :  { %5284 = vmatpush1.bf16.msra.mxu1 %v7501_v22  ;;  %v7556_v9 = vld [vmem:[#allocation6 + $0xce0] ss:$8 sps:$4 sm:$0xff]   ;;  %v7559_v11 = vld [vmem:[#allocation6 + $0xcf4] ss:$8 sps:$4 sm:$0xff]   ;;  %v7562_v13 = vld [vmem:[#allocation6 + $0xcf0] ss:$8 sps:$4 sm:$0xff]  }
  0x71   :  { %5776 = vmatpush1.bf16.msra.mxu0 %v7502_v23  ;;  %5285 = vmatprep.subr.bf16.mxu1 %v7503_v24  ;;  %v944_v61 = vrot.slane %v922_v59, %v8926_v49  ;;  %v1091_v3 = vrot.slane %v1069_v62, %v8926_v49  ;;  %v7566_v14 = vld [vmem:[#allocation6 + $0x104] ss:$8 sps:$4 sm:$0xff]   ;;  %v7564_v18 = vld [vmem:[#allocation6 + $0x100] ss:$8 sps:$4 sm:$0xff]   ;;  %v7573_v20 = vld [vmem:[#allocation6 + $0x114] ss:$8 sps:$4 sm:$0xff]  }
  0x72   :  { %5777 = vmatprep.subr.bf16.mxu0 %v7505_v25  ;;  %v7570_v15 = vld [vmem:[#allocation6 + $0xd04] ss:$8 sps:$4 sm:$0xff]   ;;  %v7568_v19 = vld [vmem:[#allocation6 + $0xd00] ss:$8 sps:$4 sm:$0xff]   ;;  %v7576_v21 = vld [vmem:[#allocation6 + $0xd14] ss:$8 sps:$4 sm:$0xff]  }
  0x73   :  { %5305 = vmatprep.mubr.bf16.mxu1 %v944_v61  ;;  %5797 = vmatprep.mubr.bf16.mxu0 %v1091_v3  ;;  %v954_v22 = vcombine.high %v944_v61, %v944_v61  ;;  %v1101_v23 = vcombine.high %v1091_v3, %v1091_v3  ;;  %v7571_v24 = vld [vmem:[#allocation6 + $0x110] ss:$8 sps:$4 sm:$0xff]   ;;  %v7589_v36 = vld [vmem:[#allocation6 + $0x140] ss:$8 sps:$4 sm:$0xff]   ;;  %v7615_v54 = vld [vmem:[#allocation6 + $0x184] ss:$8 sps:$4 sm:$0xff]  }
  0x74   :  { %5286 = vmatpush1.bf16.msra.mxu1 %v7507_v26  ;;  %v7574_v25 = vld [vmem:[#allocation6 + $0xd10] ss:$8 sps:$4 sm:$0xff]   ;;  %v7579_v26 = vld [vmem:[#allocation6 + $0x124] ss:$8 sps:$4 sm:$0xff]   ;;  %v7592_v37 = vld [vmem:[#allocation6 + $0xd40] ss:$8 sps:$4 sm:$0xff]  }
  0x75   :  { %5778 = vmatpush1.bf16.msra.mxu0 %v7508_v27  ;;  %5287 = vmatprep.subr.bf16.mxu1 %v7509_v28  ;;  %v7582_v27 = vld [vmem:[#allocation6 + $0xd24] ss:$8 sps:$4 sm:$0xff]   ;;  %v7577_v28 = vld [vmem:[#allocation6 + $0x120] ss:$8 sps:$4 sm:$0xff]   ;;  %v7598_v42 = vld [vmem:[#allocation6 + $0xd50] ss:$8 sps:$4 sm:$0xff]  }
  0x76   :  { %5779 = vmatprep.subr.bf16.mxu0 %v7511_v29  ;;  %v7580_v29 = vld [vmem:[#allocation6 + $0xd20] ss:$8 sps:$4 sm:$0xff]   ;;  %v7621_v59 = vld [vmem:[#allocation6 + $0x194] ss:$8 sps:$4 sm:$0xff]   ;;  %v7619_v61 = vld [vmem:[#allocation6 + $0x190] ss:$8 sps:$4 sm:$0xff]  }
  0x77   :  { %v7624_v60 = vld [vmem:[#allocation6 + $0xd94] ss:$8 sps:$4 sm:$0xff]   ;;  %v7622_v62 = vld [vmem:[#allocation6 + $0xd90] ss:$8 sps:$4 sm:$0xff]   ;;  %s6481_s26 = sshll.u32 %s8831_s4, 4  ;;  %s6482_s26 = int_to_ptr.vmem [resolvable:$true] %s6481_s26 }
  0x78   :  { %5288 = vmatpush1.bf16.msra.mxu1 %v7513_v30  ;;  %v7585_v30 = vld [vmem:[#allocation6 + $0x134] ss:$8 sps:$4 sm:$0xff]   ;;  %s8791_s27 = scalar_lea.vmem %s6482_s26, 32  ;;  %p8796_p13 = scmp.lt.s32.totalorder %s6482_s26, %s6482_s26 }
  0x79   :  { %5780 = vmatpush1.bf16.msra.mxu0 %v7514_v31  ;;  %5289 = vmatprep.subr.bf16.mxu1 %v7515_v32  ;;  %v7588_v31 = vld [vmem:[#allocation6 + $0xd34] ss:$8 sps:$4 sm:$0xff]   ;;  %v7583_v32 = vld [vmem:[#allocation6 + $0x130] ss:$8 sps:$4 sm:$0xff]   ;;  %p8792_p12 = scmp.ne.s32.totalorder %s6482_s26, %s8791_s27  ;;  %p8797_p0 = scmp.lt.s32.totalorder %s8791_s27, %s8791_s27 }
  0x7a   :  { %5781 = vmatprep.subr.bf16.mxu0 %v7517_v33  ;;  %v7586_v33 = vld [vmem:[#allocation6 + $0xd30] ss:$8 sps:$4 sm:$0xff]   ;;  %v7633_v3 = vld [vmem:[#allocation6 + $0x1b4] ss:$8 sps:$4 sm:$0xff]  }
  0x7b   :  { %p8798_p1 = por %p8797_p0, %p8796_p13 }
  0x7c   :  { %5290 = vmatpush1.bf16.msra.mxu1 %v7519_v34  ;;  %v7591_v34 = vld [vmem:[#allocation6 + $0x144] ss:$8 sps:$4 sm:$0xff]  }
  0x7d   :  { %5782 = vmatpush1.bf16.msra.mxu0 %v7520_v35  ;;  %5291 = vmatprep.subr.bf16.mxu1 %v7521_v39  ;;  %v7594_v35 = vld [vmem:[#allocation6 + $0xd44] ss:$8 sps:$4 sm:$0xff]   ;;  %v7597_v39 = vld [vmem:[#allocation6 + $0x154] ss:$8 sps:$4 sm:$0xff]   ;;  %p8799_p2 = pnand %p8798_p1, %p8792_p12 }
  0x7e   :  { %5783 = vmatprep.subr.bf16.mxu0 %v7523_v40  ;;  %v7600_v40 = vld [vmem:[#allocation6 + $0xd54] ss:$8 sps:$4 sm:$0xff]  }
  0x80   :  { %5292 = vmatpush1.bf16.msra.mxu1 %v7525_v41  ;;  %v7595_v41 = vld [vmem:[#allocation6 + $0x150] ss:$8 sps:$4 sm:$0xff]  }
  0x81   :  { %5784 = vmatpush1.bf16.msra.mxu0 %v7526_v44  ;;  %5293 = vmatprep.subr.bf16.mxu1 %v7527_v45  ;;  %v7603_v44 = vld [vmem:[#allocation6 + $0x164] ss:$8 sps:$4 sm:$0xff]  }
  0x82   :  { %5785 = vmatprep.subr.bf16.mxu0 %v7529_v46  ;;  %v7606_v45 = vld [vmem:[#allocation6 + $0xd64] ss:$8 sps:$4 sm:$0xff]   ;;  %v7601_v46 = vld [vmem:[#allocation6 + $0x160] ss:$8 sps:$4 sm:$0xff]  }
  0x84   :  { %5294 = vmatpush1.bf16.msra.mxu1 %v7531_v47  ;;  %v7604_v47 = vld [vmem:[#allocation6 + $0xd60] ss:$8 sps:$4 sm:$0xff]  }
  0x85   :  { %5786 = vmatpush1.bf16.msra.mxu0 %v7532_v48  ;;  %5295 = vmatprep.subr.bf16.mxu1 %v7533_v50  ;;  %v7609_v48 = vld [vmem:[#allocation6 + $0x174] ss:$8 sps:$4 sm:$0xff]  }
  0x86   :  { %5787 = vmatprep.subr.bf16.mxu0 %v7535_v51  ;;  %v7612_v50 = vld [vmem:[#allocation6 + $0xd74] ss:$8 sps:$4 sm:$0xff]   ;;  %v7607_v51 = vld [vmem:[#allocation6 + $0x170] ss:$8 sps:$4 sm:$0xff]  }
  0x88   :  { %5296 = vmatpush1.bf16.msra.mxu1 %v7537_v53  ;;  %v7610_v53 = vld [vmem:[#allocation6 + $0xd70] ss:$8 sps:$4 sm:$0xff]  }
  0x89   :  { %5788 = vmatpush1.bf16.msra.mxu0 %v7538_v55  ;;  %5297 = vmatprep.subr.bf16.mxu1 %v7539_v57  ;;  %v7618_v55 = vld [vmem:[#allocation6 + $0xd84] ss:$8 sps:$4 sm:$0xff]   ;;  %v7613_v57 = vld [vmem:[#allocation6 + $0x180] ss:$8 sps:$4 sm:$0xff]  }
  0x8a   :  { %5789 = vmatprep.subr.bf16.mxu0 %v7541_v58  ;;  %v7616_v58 = vld [vmem:[#allocation6 + $0xd80] ss:$8 sps:$4 sm:$0xff]  }
  0x8c   :  { %5298 = vmatpush1.bf16.msra.mxu1 %v7543_v63  ;;  %v7627_v63 = vld [vmem:[#allocation6 + $0x1a4] ss:$8 sps:$4 sm:$0xff]  }
  0x8d   :  { %5790 = vmatpush1.bf16.msra.mxu0 %v7544_v0  ;;  %5299 = vmatprep.subr.bf16.mxu1 %v7545_v1  ;;  %v7630_v0 = vld [vmem:[#allocation6 + $0xda4] ss:$8 sps:$4 sm:$0xff]   ;;  %v7625_v1 = vld [vmem:[#allocation6 + $0x1a0] ss:$8 sps:$4 sm:$0xff]  }
  0x8e   :  { %5791 = vmatprep.subr.bf16.mxu0 %v7547_v2  ;;  %v7628_v2 = vld [vmem:[#allocation6 + $0xda0] ss:$8 sps:$4 sm:$0xff]  }
  0x90   :  { %5300 = vmatpush1.bf16.msra.mxu1 %v7549_v4  ;;  %v7636_v4 = vld [vmem:[#allocation6 + $0xdb4] ss:$8 sps:$4 sm:$0xff]  }
  0x91   :  { %5792 = vmatpush1.bf16.msra.mxu0 %v7550_v5  ;;  %5301 = vmatprep.subr.bf16.mxu1 %v7551_v6  ;;  %v7631_v5 = vld [vmem:[#allocation6 + $0x1b0] ss:$8 sps:$4 sm:$0xff]  }
  0x92   :  { %5793 = vmatprep.subr.bf16.mxu0 %v7553_v7  ;;  %v7634_v6 = vld [vmem:[#allocation6 + $0xdb0] ss:$8 sps:$4 sm:$0xff]   ;;  %v7639_v7 = vld [vmem:[#allocation6 + $0x1c4] ss:$8 sps:$4 sm:$0xff]  }
  0x94   :  { %5302 = vmatpush1.bf16.msra.mxu1 %v7555_v8  ;;  %v7642_v8 = vld [vmem:[#allocation6 + $0xdc4] ss:$8 sps:$4 sm:$0xff]  }
  0x95   :  { %5794 = vmatpush1.bf16.msra.mxu0 %v7556_v9  ;;  %5303 = vmatprep.subr.bf16.mxu1 %v7557_v10  ;;  %v7637_v9 = vld [vmem:[#allocation6 + $0x1c0] ss:$8 sps:$4 sm:$0xff]  }
  0x96   :  { %5795 = vmatprep.subr.bf16.mxu0 %v7559_v11  ;;  %v7640_v10 = vld [vmem:[#allocation6 + $0xdc0] ss:$8 sps:$4 sm:$0xff]   ;;  %v7645_v11 = vld [vmem:[#allocation6 + $0x1d4] ss:$8 sps:$4 sm:$0xff]  }
  0x98   :  { %5304 = vmatpush1.bf16.msra.mxu1 %v7561_v12  ;;  %v7648_v12 = vld [vmem:[#allocation6 + $0xdd4] ss:$8 sps:$4 sm:$0xff]  }
  0x99   :  { %5796 = vmatpush1.bf16.msra.mxu0 %v7562_v13  ;;  %5314 = vmatprep.subr.bf16.mxu1 %v7566_v14  ;;  %v7643_v13 = vld [vmem:[#allocation6 + $0x1d0] ss:$8 sps:$4 sm:$0xff]  }
  0x9a   :  { %5806 = vmatprep.subr.bf16.mxu0 %v7570_v15  ;;  %v7646_v14 = vld [vmem:[#allocation6 + $0xdd0] ss:$8 sps:$4 sm:$0xff]   ;;  %v7651_v15 = vld [vmem:[#allocation6 + $0x1e4] ss:$8 sps:$4 sm:$0xff]  }
  0x9b   :  { %5306 = vmatmul.mubr.bf16.vlgmr.msra.gmra.mrb[0].mxu1 %v8939_v16 }
  0x9c   :  { %5798 = vmatmul.mubr.bf16.vlgmr.msra.gmra.mrb[0].mxu0 %v8942_v17  ;;  %5315 = vmatpush1.bf16.msra.mxu1 %v7564_v18  ;;  %v7654_v18 = vld [vmem:[#allocation6 + $0xde4] ss:$8 sps:$4 sm:$0xff]  }
  0x9d   :  { %5807 = vmatpush1.bf16.msra.mxu0 %v7568_v19  ;;  %5316 = vmatprep.subr.bf16.mxu1 %v7573_v20  ;;  %v907_v19 = vcombine.high %v8928_v52, %v8928_v52  ;;  %v1054_v20 = vcombine.high %v8932_v56, %v8932_v56  ;;  %v7655_v52 = vld [vmem:[#allocation6 + $0x1f0] ss:$8 sps:$4 sm:$0xff]   ;;  %v7663_v56 = vld [vmem:[#allocation6 + $0x204] ss:$8 sps:$4 sm:$0xff]  }
  0x9e   :  { %5808 = vmatprep.subr.bf16.mxu0 %v7576_v21  ;;  %5346 = vmatprep.mubr.bf16.mxu1 %v954_v22  ;;  %v7649_v21 = vld [vmem:[#allocation6 + $0x1e0] ss:$8 sps:$4 sm:$0xff]  }
  0x9f   :  { %5838 = vmatprep.mubr.bf16.mxu0 %v1101_v23  ;;  %v7652_v22 = vld [vmem:[#allocation6 + $0xde0] ss:$8 sps:$4 sm:$0xff]   ;;  %v7657_v23 = vld [vmem:[#allocation6 + $0x1f4] ss:$8 sps:$4 sm:$0xff]  }
  0xa0   :  { %5317 = vmatpush1.bf16.msra.mxu1 %v7571_v24  ;;  %v7660_v24 = vld [vmem:[#allocation6 + $0xdf4] ss:$8 sps:$4 sm:$0xff]  }
  0xa1   :  { %5809 = vmatpush1.bf16.msra.mxu0 %v7574_v25  ;;  %5318 = vmatprep.subr.bf16.mxu1 %v7579_v26  ;;  %v8951_v25 = vrot.slane %v907_v19, %v8926_v49  ;;  %v8954_v26 = vrot.slane %v1054_v20, %v8926_v49  ;;  %v7732_v19 = vld [vmem:[#allocation6 + $0xeb4] ss:$8 sps:$4 sm:$0xff]   ;;  %v7727_v20 = vld [vmem:[#allocation6 + $0x2b0] ss:$8 sps:$4 sm:$0xff]  }
  0xa2   :  { %5810 = vmatprep.subr.bf16.mxu0 %v7582_v27  ;;  %v7658_v27 = vld [vmem:[#allocation6 + $0xdf0] ss:$8 sps:$4 sm:$0xff]  }
  0xa4   :  { %5319 = vmatpush1.bf16.msra.mxu1 %v7577_v28  ;;  %v7666_v28 = vld [vmem:[#allocation6 + $0xe04] ss:$8 sps:$4 sm:$0xff]  }
  0xa5   :  { %5811 = vmatpush1.bf16.msra.mxu0 %v7580_v29  ;;  %5320 = vmatprep.subr.bf16.mxu1 %v7585_v30  ;;  %v923_v29 = vcombine.high %v8951_v25, %v8951_v25  ;;  %v1070_v30 = vcombine.high %v8954_v26, %v8954_v26 }
  0xa6   :  { %5812 = vmatprep.subr.bf16.mxu0 %v7588_v31  ;;  %v952_v31 = vcombine.high %v8939_v16, %v8939_v16  ;;  %v7667_v16 = vld [vmem:[#allocation6 + $0x210] ss:$8 sps:$4 sm:$0xff]  }
  0xa8   :  { %5321 = vmatpush1.bf16.msra.mxu1 %v7583_v32  ;;  %v1099_v32 = vcombine.high %v8942_v17, %v8942_v17  ;;  %v7670_v17 = vld [vmem:[#allocation6 + $0xe10] ss:$8 sps:$4 sm:$0xff]  }
  0xa9   :  { %5813 = vmatpush1.bf16.msra.mxu0 %v7586_v33  ;;  %5322 = vmatprep.subr.bf16.mxu1 %v7591_v34  ;;  %v7661_v33 = vld [vmem:[#allocation6 + $0x200] ss:$8 sps:$4 sm:$0xff]  }
  0xaa   :  { %5814 = vmatprep.subr.bf16.mxu0 %v7594_v35  ;;  %v7664_v34 = vld [vmem:[#allocation6 + $0xe00] ss:$8 sps:$4 sm:$0xff]   ;;  %v7669_v35 = vld [vmem:[#allocation6 + $0x214] ss:$8 sps:$4 sm:$0xff]  }
  0xac   :  { %5323 = vmatpush1.bf16.msra.mxu1 %v7589_v36  ;;  %v7672_v36 = vld [vmem:[#allocation6 + $0xe14] ss:$8 sps:$4 sm:$0xff]  }
  0xad   :  { %5815 = vmatpush1.bf16.msra.mxu0 %v7592_v37  ;;  %5324 = vmatprep.subr.bf16.mxu1 %v7597_v39  ;;  %v8965_v37 = vrot.slane %v923_v29, %v8926_v49  ;;  %v8968_v39 = vrot.slane %v1070_v30, %v8926_v49  ;;  %v7742_v29 = vld [vmem:[#allocation6 + $0xed0] ss:$8 sps:$4 sm:$0xff]   ;;  %v7747_v30 = vld [vmem:[#allocation6 + $0x2e4] ss:$8 sps:$4 sm:$0xff]  }
  0xae   :  { %5816 = vmatprep.subr.bf16.mxu0 %v7600_v40  ;;  %v7675_v40 = vld [vmem:[#allocation6 + $0x224] ss:$8 sps:$4 sm:$0xff]  }
  0xb0   :  { %5325 = vmatpush1.bf16.msra.mxu1 %v7595_v41  ;;  %v7678_v41 = vld [vmem:[#allocation6 + $0xe24] ss:$8 sps:$4 sm:$0xff]  }
  0xb1   :  { %5817 = vmatpush1.bf16.msra.mxu0 %v7598_v42  ;;  %5326 = vmatprep.subr.bf16.mxu1 %v7603_v44  ;;  %v7673_v42 = vld [vmem:[#allocation6 + $0x220] ss:$8 sps:$4 sm:$0xff]  }
  0xb2   :  { %5818 = vmatprep.subr.bf16.mxu0 %v7606_v45  ;;  %v7676_v44 = vld [vmem:[#allocation6 + $0xe20] ss:$8 sps:$4 sm:$0xff]   ;;  %v7681_v45 = vld [vmem:[#allocation6 + $0x234] ss:$8 sps:$4 sm:$0xff]  }
  0xb4   :  { %5327 = vmatpush1.bf16.msra.mxu1 %v7601_v46  ;;  %v7684_v46 = vld [vmem:[#allocation6 + $0xe34] ss:$8 sps:$4 sm:$0xff]  }
  0xb5   :  { %5819 = vmatpush1.bf16.msra.mxu0 %v7604_v47  ;;  %5328 = vmatprep.subr.bf16.mxu1 %v7609_v48  ;;  %v7679_v47 = vld [vmem:[#allocation6 + $0x230] ss:$8 sps:$4 sm:$0xff]  }
  0xb6   :  { %5820 = vmatprep.subr.bf16.mxu0 %v7612_v50  ;;  %v7682_v48 = vld [vmem:[#allocation6 + $0xe30] ss:$8 sps:$4 sm:$0xff]   ;;  %v7687_v50 = vld [vmem:[#allocation6 + $0x244] ss:$8 sps:$4 sm:$0xff]  }
  0xb8   :  { %5329 = vmatpush1.bf16.msra.mxu1 %v7607_v51  ;;  %v7690_v51 = vld [vmem:[#allocation6 + $0xe44] ss:$8 sps:$4 sm:$0xff]  }
  0xb9   :  { %5821 = vmatpush1.bf16.msra.mxu0 %v7610_v53  ;;  %5330 = vmatprep.subr.bf16.mxu1 %v7615_v54  ;;  %v7685_v53 = vld [vmem:[#allocation6 + $0x240] ss:$8 sps:$4 sm:$0xff]  }
  0xba   :  { %5822 = vmatprep.subr.bf16.mxu0 %v7618_v55  ;;  %v7688_v54 = vld [vmem:[#allocation6 + $0xe40] ss:$8 sps:$4 sm:$0xff]   ;;  %v7693_v55 = vld [vmem:[#allocation6 + $0x254] ss:$8 sps:$4 sm:$0xff]  }
  0xbc   :  { %5331 = vmatpush1.bf16.msra.mxu1 %v7613_v57  ;;  %v7696_v57 = vld [vmem:[#allocation6 + $0xe54] ss:$8 sps:$4 sm:$0xff]  }
  0xbd   :  { %5823 = vmatpush1.bf16.msra.mxu0 %v7616_v58  ;;  %5332 = vmatprep.subr.bf16.mxu1 %v7621_v59  ;;  %v7691_v58 = vld [vmem:[#allocation6 + $0x250] ss:$8 sps:$4 sm:$0xff]  }
  0xbe   :  { %5824 = vmatprep.subr.bf16.mxu0 %v7624_v60  ;;  %v7694_v59 = vld [vmem:[#allocation6 + $0xe50] ss:$8 sps:$4 sm:$0xff]   ;;  %v7699_v60 = vld [vmem:[#allocation6 + $0x264] ss:$8 sps:$4 sm:$0xff]  }
  0xc0   :  { %5333 = vmatpush1.bf16.msra.mxu1 %v7619_v61  ;;  %v7702_v61 = vld [vmem:[#allocation6 + $0xe64] ss:$8 sps:$4 sm:$0xff]  }
  0xc1   :  { %5825 = vmatpush1.bf16.msra.mxu0 %v7622_v62  ;;  %5334 = vmatprep.subr.bf16.mxu1 %v7627_v63  ;;  %v7697_v62 = vld [vmem:[#allocation6 + $0x260] ss:$8 sps:$4 sm:$0xff]  }
  0xc2   :  { %5826 = vmatprep.subr.bf16.mxu0 %v7630_v0  ;;  %v7700_v63 = vld [vmem:[#allocation6 + $0xe60] ss:$8 sps:$4 sm:$0xff]   ;;  %v7705_v0 = vld [vmem:[#allocation6 + $0x274] ss:$8 sps:$4 sm:$0xff]  }
  0xc4   :  { %5335 = vmatpush1.bf16.msra.mxu1 %v7625_v1  ;;  %v7708_v1 = vld [vmem:[#allocation6 + $0xe74] ss:$8 sps:$4 sm:$0xff]  }
  0xc5   :  { %5827 = vmatpush1.bf16.msra.mxu0 %v7628_v2  ;;  %5336 = vmatprep.subr.bf16.mxu1 %v7633_v3  ;;  %v7703_v2 = vld [vmem:[#allocation6 + $0x270] ss:$8 sps:$4 sm:$0xff]  }
  0xc6   :  { %5828 = vmatprep.subr.bf16.mxu0 %v7636_v4  ;;  %v7706_v3 = vld [vmem:[#allocation6 + $0xe70] ss:$8 sps:$4 sm:$0xff]   ;;  %v7711_v4 = vld [vmem:[#allocation6 + $0x284] ss:$8 sps:$4 sm:$0xff]  }
  0xc8   :  { %5337 = vmatpush1.bf16.msra.mxu1 %v7631_v5  ;;  %v7714_v5 = vld [vmem:[#allocation6 + $0xe84] ss:$8 sps:$4 sm:$0xff]  }
  0xc9   :  { %5829 = vmatpush1.bf16.msra.mxu0 %v7634_v6  ;;  %5338 = vmatprep.subr.bf16.mxu1 %v7639_v7  ;;  %v7709_v6 = vld [vmem:[#allocation6 + $0x280] ss:$8 sps:$4 sm:$0xff]  }
  0xca   :  { %5830 = vmatprep.subr.bf16.mxu0 %v7642_v8  ;;  %v7712_v7 = vld [vmem:[#allocation6 + $0xe80] ss:$8 sps:$4 sm:$0xff]   ;;  %v7717_v8 = vld [vmem:[#allocation6 + $0x294] ss:$8 sps:$4 sm:$0xff]  }
  0xcc   :  { %5339 = vmatpush1.bf16.msra.mxu1 %v7637_v9  ;;  %v7720_v9 = vld [vmem:[#allocation6 + $0xe94] ss:$8 sps:$4 sm:$0xff]  }
  0xcd   :  { %5831 = vmatpush1.bf16.msra.mxu0 %v7640_v10  ;;  %5340 = vmatprep.subr.bf16.mxu1 %v7645_v11  ;;  %v7715_v10 = vld [vmem:[#allocation6 + $0x290] ss:$8 sps:$4 sm:$0xff]  }
  0xce   :  { %5832 = vmatprep.subr.bf16.mxu0 %v7648_v12  ;;  %v7718_v11 = vld [vmem:[#allocation6 + $0xe90] ss:$8 sps:$4 sm:$0xff]   ;;  %v7723_v12 = vld [vmem:[#allocation6 + $0x2a4] ss:$8 sps:$4 sm:$0xff]  }
  0xd0   :  { %5341 = vmatpush1.bf16.msra.mxu1 %v7643_v13  ;;  %v7726_v13 = vld [vmem:[#allocation6 + $0xea4] ss:$8 sps:$4 sm:$0xff]  }
  0xd1   :  { %5833 = vmatpush1.bf16.msra.mxu0 %v7646_v14  ;;  %5342 = vmatprep.subr.bf16.mxu1 %v7651_v15  ;;  %v7721_v14 = vld [vmem:[#allocation6 + $0x2a0] ss:$8 sps:$4 sm:$0xff]  }
  0xd2   :  { %5834 = vmatprep.subr.bf16.mxu0 %v7654_v18  ;;  %v7724_v15 = vld [vmem:[#allocation6 + $0xea0] ss:$8 sps:$4 sm:$0xff]   ;;  %v7729_v18 = vld [vmem:[#allocation6 + $0x2b4] ss:$8 sps:$4 sm:$0xff]  }
  0xd4   :  { %5343 = vmatpush1.bf16.msra.mxu1 %v7649_v21  ;;  %v7730_v21 = vld [vmem:[#allocation6 + $0xeb0] ss:$8 sps:$4 sm:$0xff]  }
  0xd5   :  { %5835 = vmatpush1.bf16.msra.mxu0 %v7652_v22  ;;  %5344 = vmatprep.subr.bf16.mxu1 %v7657_v23  ;;  %v7735_v22 = vld [vmem:[#allocation6 + $0x2c4] ss:$8 sps:$4 sm:$0xff]  }
  0xd6   :  { %5836 = vmatprep.subr.bf16.mxu0 %v7660_v24  ;;  %v7738_v23 = vld [vmem:[#allocation6 + $0xec4] ss:$8 sps:$4 sm:$0xff]   ;;  %v7733_v24 = vld [vmem:[#allocation6 + $0x2c0] ss:$8 sps:$4 sm:$0xff]  }
  0xd8   :  { %5345 = vmatpush1.bf16.msra.mxu1 %v7655_v52  ;;  %v7736_v52 = vld [vmem:[#allocation6 + $0xec0] ss:$8 sps:$4 sm:$0xff]  }
  0xd9   :  { %5837 = vmatpush1.bf16.msra.mxu0 %v7658_v27  ;;  %5355 = vmatprep.subr.bf16.mxu1 %v7663_v56  ;;  %v7741_v27 = vld [vmem:[#allocation6 + $0x2d4] ss:$8 sps:$4 sm:$0xff]  }
  0xda   :  { %5847 = vmatprep.subr.bf16.mxu0 %v7666_v28  ;;  %v7744_v56 = vld [vmem:[#allocation6 + $0xed4] ss:$8 sps:$4 sm:$0xff]   ;;  %v7739_v28 = vld [vmem:[#allocation6 + $0x2d0] ss:$8 sps:$4 sm:$0xff]  }
  0xdb   :  { %5347 = vmatmul.mubr.bf16.vlgmr.msra.gmra.mrb[0].mxu1 %v952_v31  ;;  %v7750_v31 = vld [vmem:[#allocation6 + $0xee4] ss:$8 sps:$4 sm:$0xff]  }
  0xdc   :  { %5839 = vmatmul.mubr.bf16.vlgmr.msra.gmra.mrb[0].mxu0 %v1099_v32  ;;  %5356 = vmatpush1.bf16.msra.mxu1 %v7661_v33  ;;  %v7745_v32 = vld [vmem:[#allocation6 + $0x2e0] ss:$8 sps:$4 sm:$0xff]  }
  0xdd   :  { %5848 = vmatpush1.bf16.msra.mxu0 %v7664_v34  ;;  %5357 = vmatprep.subr.bf16.mxu1 %v7669_v35  ;;  %v7748_v33 = vld [vmem:[#allocation6 + $0xee0] ss:$8 sps:$4 sm:$0xff]   ;;  %v7753_v34 = vld [vmem:[#allocation6 + $0x2f4] ss:$8 sps:$4 sm:$0xff]  }
  0xde   :  { %5849 = vmatprep.subr.bf16.mxu0 %v7672_v36  ;;  %5387 = vmatprep.mubr.bf16.mxu1 %v8965_v37  ;;  %v7756_v35 = vld [vmem:[#allocation6 + $0xef4] ss:$8 sps:$4 sm:$0xff]   ;;  %v7751_v36 = vld [vmem:[#allocation6 + $0x2f0] ss:$8 sps:$4 sm:$0xff]  }
  0xdf   :  { %5879 = vmatprep.mubr.bf16.mxu0 %v8968_v39 }
  0xe0   :  { %5358 = vmatpush1.bf16.msra.mxu1 %v7667_v16  ;;  %v7754_v16 = vld [vmem:[#allocation6 + $0xef0] ss:$8 sps:$4 sm:$0xff]  }
  0xe1   :  { %5850 = vmatpush1.bf16.msra.mxu0 %v7670_v17  ;;  %5359 = vmatprep.subr.bf16.mxu1 %v7675_v40  ;;  %v7759_v17 = vld [vmem:[#allocation6 + $0x304] ss:$8 sps:$4 sm:$0xff]  }
  0xe2   :  { %5851 = vmatprep.subr.bf16.mxu0 %v7678_v41  ;;  %v7762_v40 = vld [vmem:[#allocation6 + $0xf04] ss:$8 sps:$4 sm:$0xff]   ;;  %v8974_v41 = vrot.slane %v8951_v25, %v8926_v49  ;;  %v7763_v25 = vld [vmem:[#allocation6 + $0x310] ss:$8 sps:$4 sm:$0xff]  }
  0xe4   :  { %5360 = vmatpush1.bf16.msra.mxu1 %v7673_v42  ;;  %v8978_v42 = vrot.slane %v8954_v26, %v8926_v49  ;;  %v7766_v26 = vld [vmem:[#allocation6 + $0xf10] ss:$8 sps:$4 sm:$0xff]  }
  0xe5   :  { %5852 = vmatpush1.bf16.msra.mxu0 %v7676_v44  ;;  %5361 = vmatprep.subr.bf16.mxu1 %v7681_v45  ;;  %v7757_v44 = vld [vmem:[#allocation6 + $0x300] ss:$8 sps:$4 sm:$0xff]  }
  0xe6   :  { %5853 = vmatprep.subr.bf16.mxu0 %v7684_v46  ;;  %v7760_v45 = vld [vmem:[#allocation6 + $0xf00] ss:$8 sps:$4 sm:$0xff]   ;;  %v7765_v46 = vld [vmem:[#allocation6 + $0x314] ss:$8 sps:$4 sm:$0xff]  }
  0xe8   :  { %5362 = vmatpush1.bf16.msra.mxu1 %v7679_v47  ;;  %v7768_v47 = vld [vmem:[#allocation6 + $0xf14] ss:$8 sps:$4 sm:$0xff]  }
  0xe9   :  { %5854 = vmatpush1.bf16.msra.mxu0 %v7682_v48  ;;  %5363 = vmatprep.subr.bf16.mxu1 %v7687_v50  ;;  %v955_v48 = vcombine.high %v8965_v37, %v8965_v37  ;;  %v1102_v50 = vcombine.high %v8968_v39, %v8968_v39  ;;  %v7769_v37 = vld [vmem:[#allocation6 + $0x320] ss:$8 sps:$4 sm:$0xff]   ;;  %v7777_v39 = vld [vmem:[#allocation6 + $0x334] ss:$8 sps:$4 sm:$0xff]  }
  0xea   :  { %5855 = vmatprep.subr.bf16.mxu0 %v7690_v51  ;;  %v7771_v51 = vld [vmem:[#allocation6 + $0x324] ss:$8 sps:$4 sm:$0xff]  }
  0xec   :  { %5364 = vmatpush1.bf16.msra.mxu1 %v7685_v53  ;;  %v7774_v53 = vld [vmem:[#allocation6 + $0xf24] ss:$8 sps:$4 sm:$0xff]  }
  0xed   :  { %5856 = vmatpush1.bf16.msra.mxu0 %v7688_v54  ;;  %5365 = vmatprep.subr.bf16.mxu1 %v7693_v55  ;;  %v7772_v54 = vld [vmem:[#allocation6 + $0xf20] ss:$8 sps:$4 sm:$0xff]   ;;  %v7780_v55 = vld [vmem:[#allocation6 + $0xf34] ss:$8 sps:$4 sm:$0xff]  }
  0xee   :  { %5857 = vmatprep.subr.bf16.mxu0 %v7696_v57  ;;  %v7775_v57 = vld [vmem:[#allocation6 + $0x330] ss:$8 sps:$4 sm:$0xff]  }
  0xf0   :  { %5366 = vmatpush1.bf16.msra.mxu1 %v7691_v58  ;;  %v7778_v58 = vld [vmem:[#allocation6 + $0xf30] ss:$8 sps:$4 sm:$0xff]  }
  0xf1   :  { %5858 = vmatpush1.bf16.msra.mxu0 %v7694_v59  ;;  %5367 = vmatprep.subr.bf16.mxu1 %v7699_v60  ;;  %v7783_v59 = vld [vmem:[#allocation6 + $0x344] ss:$8 sps:$4 sm:$0xff]  }
  0xf2   :  { %5859 = vmatprep.subr.bf16.mxu0 %v7702_v61  ;;  %v7786_v60 = vld [vmem:[#allocation6 + $0xf44] ss:$8 sps:$4 sm:$0xff]   ;;  %v7781_v61 = vld [vmem:[#allocation6 + $0x340] ss:$8 sps:$4 sm:$0xff]  }
  0xf4   :  { %5368 = vmatpush1.bf16.msra.mxu1 %v7697_v62  ;;  %v7784_v62 = vld [vmem:[#allocation6 + $0xf40] ss:$8 sps:$4 sm:$0xff]  }
  0xf5   :  { %5860 = vmatpush1.bf16.msra.mxu0 %v7700_v63  ;;  %5369 = vmatprep.subr.bf16.mxu1 %v7705_v0  ;;  %v7789_v63 = vld [vmem:[#allocation6 + $0x354] ss:$8 sps:$4 sm:$0xff]  }
  0xf6   :  { %5861 = vmatprep.subr.bf16.mxu0 %v7708_v1  ;;  %v7792_v0 = vld [vmem:[#allocation6 + $0xf54] ss:$8 sps:$4 sm:$0xff]   ;;  %v7787_v1 = vld [vmem:[#allocation6 + $0x350] ss:$8 sps:$4 sm:$0xff]  }
  0xf8   :  { %5370 = vmatpush1.bf16.msra.mxu1 %v7703_v2  ;;  %v7790_v2 = vld [vmem:[#allocation6 + $0xf50] ss:$8 sps:$4 sm:$0xff]  }
  0xf9   :  { %5862 = vmatpush1.bf16.msra.mxu0 %v7706_v3  ;;  %5371 = vmatprep.subr.bf16.mxu1 %v7711_v4  ;;  %v7795_v3 = vld [vmem:[#allocation6 + $0x364] ss:$8 sps:$4 sm:$0xff]  }
  0xfa   :  { %5863 = vmatprep.subr.bf16.mxu0 %v7714_v5  ;;  %v7798_v4 = vld [vmem:[#allocation6 + $0xf64] ss:$8 sps:$4 sm:$0xff]   ;;  %v7793_v5 = vld [vmem:[#allocation6 + $0x360] ss:$8 sps:$4 sm:$0xff]  }
  0xfc   :  { %5372 = vmatpush1.bf16.msra.mxu1 %v7709_v6  ;;  %v7796_v6 = vld [vmem:[#allocation6 + $0xf60] ss:$8 sps:$4 sm:$0xff]  }
  0xfd   :  { %5864 = vmatpush1.bf16.msra.mxu0 %v7712_v7  ;;  %5373 = vmatprep.subr.bf16.mxu1 %v7717_v8  ;;  %v7801_v7 = vld [vmem:[#allocation6 + $0x374] ss:$8 sps:$4 sm:$0xff]  }
  0xfe   :  { %5865 = vmatprep.subr.bf16.mxu0 %v7720_v9  ;;  %v7804_v8 = vld [vmem:[#allocation6 + $0xf74] ss:$8 sps:$4 sm:$0xff]   ;;  %v7799_v9 = vld [vmem:[#allocation6 + $0x370] ss:$8 sps:$4 sm:$0xff]  }
 0x100   :  { %5374 = vmatpush1.bf16.msra.mxu1 %v7715_v10  ;;  %v7802_v10 = vld [vmem:[#allocation6 + $0xf70] ss:$8 sps:$4 sm:$0xff]  }
 0x101   :  { %5866 = vmatpush1.bf16.msra.mxu0 %v7718_v11  ;;  %5375 = vmatprep.subr.bf16.mxu1 %v7723_v12  ;;  %v7807_v11 = vld [vmem:[#allocation6 + $0x384] ss:$8 sps:$4 sm:$0xff]  }
 0x102   :  { %5867 = vmatprep.subr.bf16.mxu0 %v7726_v13  ;;  %v7810_v12 = vld [vmem:[#allocation6 + $0xf84] ss:$8 sps:$4 sm:$0xff]   ;;  %v7805_v13 = vld [vmem:[#allocation6 + $0x380] ss:$8 sps:$4 sm:$0xff]  }
 0x104   :  { %5376 = vmatpush1.bf16.msra.mxu1 %v7721_v14  ;;  %v7808_v14 = vld [vmem:[#allocation6 + $0xf80] ss:$8 sps:$4 sm:$0xff]  }
 0x105   :  { %5868 = vmatpush1.bf16.msra.mxu0 %v7724_v15  ;;  %5377 = vmatprep.subr.bf16.mxu1 %v7729_v18  ;;  %v7813_v15 = vld [vmem:[#allocation6 + $0x394] ss:$8 sps:$4 sm:$0xff]  }
 0x106   :  { %5869 = vmatprep.subr.bf16.mxu0 %v7732_v19  ;;  %v7816_v18 = vld [vmem:[#allocation6 + $0xf94] ss:$8 sps:$4 sm:$0xff]   ;;  %v7811_v19 = vld [vmem:[#allocation6 + $0x390] ss:$8 sps:$4 sm:$0xff]  }
 0x108   :  { %5378 = vmatpush1.bf16.msra.mxu1 %v7727_v20  ;;  %v7814_v20 = vld [vmem:[#allocation6 + $0xf90] ss:$8 sps:$4 sm:$0xff]  }
 0x109   :  { %5870 = vmatpush1.bf16.msra.mxu0 %v7730_v21  ;;  %5379 = vmatprep.subr.bf16.mxu1 %v7735_v22  ;;  %v7819_v21 = vld [vmem:[#allocation6 + $0x3a4] ss:$8 sps:$4 sm:$0xff]  }
 0x10a   :  { %5871 = vmatprep.subr.bf16.mxu0 %v7738_v23  ;;  %v7822_v22 = vld [vmem:[#allocation6 + $0xfa4] ss:$8 sps:$4 sm:$0xff]   ;;  %v7817_v23 = vld [vmem:[#allocation6 + $0x3a0] ss:$8 sps:$4 sm:$0xff]  }
 0x10c   :  { %5380 = vmatpush1.bf16.msra.mxu1 %v7733_v24  ;;  %v7820_v24 = vld [vmem:[#allocation6 + $0xfa0] ss:$8 sps:$4 sm:$0xff]  }
 0x10d   :  { %5872 = vmatpush1.bf16.msra.mxu0 %v7736_v52  ;;  %5381 = vmatprep.subr.bf16.mxu1 %v7741_v27  ;;  %v7825_v52 = vld [vmem:[#allocation6 + $0x3b4] ss:$8 sps:$4 sm:$0xff]  }
 0x10e   :  { %5873 = vmatprep.subr.bf16.mxu0 %v7744_v56  ;;  %v7828_v27 = vld [vmem:[#allocation6 + $0xfb4] ss:$8 sps:$4 sm:$0xff]   ;;  %v7823_v56 = vld [vmem:[#allocation6 + $0x3b0] ss:$8 sps:$4 sm:$0xff]  }
 0x110   :  { %5382 = vmatpush1.bf16.msra.mxu1 %v7739_v28  ;;  %v7826_v28 = vld [vmem:[#allocation6 + $0xfb0] ss:$8 sps:$4 sm:$0xff]  }
 0x111   :  { %5874 = vmatpush1.bf16.msra.mxu0 %v7742_v29  ;;  %5383 = vmatprep.subr.bf16.mxu1 %v7747_v30  ;;  %v7831_v29 = vld [vmem:[#allocation6 + $0x3c4] ss:$8 sps:$4 sm:$0xff]  }
 0x112   :  { %5875 = vmatprep.subr.bf16.mxu0 %v7750_v31  ;;  %v7834_v30 = vld [vmem:[#allocation6 + $0xfc4] ss:$8 sps:$4 sm:$0xff]   ;;  %v7829_v31 = vld [vmem:[#allocation6 + $0x3c0] ss:$8 sps:$4 sm:$0xff]  }
 0x114   :  { %5384 = vmatpush1.bf16.msra.mxu1 %v7745_v32  ;;  %v7832_v32 = vld [vmem:[#allocation6 + $0xfc0] ss:$8 sps:$4 sm:$0xff]  }
 0x115   :  { %5876 = vmatpush1.bf16.msra.mxu0 %v7748_v33  ;;  %5385 = vmatprep.subr.bf16.mxu1 %v7753_v34  ;;  %v7837_v33 = vld [vmem:[#allocation6 + $0x3d4] ss:$8 sps:$4 sm:$0xff]  }
 0x116   :  { %5877 = vmatprep.subr.bf16.mxu0 %v7756_v35  ;;  %v7840_v34 = vld [vmem:[#allocation6 + $0xfd4] ss:$8 sps:$4 sm:$0xff]   ;;  %v7835_v35 = vld [vmem:[#allocation6 + $0x3d0] ss:$8 sps:$4 sm:$0xff]  }
 0x118   :  { %5386 = vmatpush1.bf16.msra.mxu1 %v7751_v36  ;;  %v7838_v36 = vld [vmem:[#allocation6 + $0xfd0] ss:$8 sps:$4 sm:$0xff]  }
 0x119   :  { %5878 = vmatpush1.bf16.msra.mxu0 %v7754_v16  ;;  %5396 = vmatprep.subr.bf16.mxu1 %v7759_v17  ;;  %v7843_v16 = vld [vmem:[#allocation6 + $0x3e4] ss:$8 sps:$4 sm:$0xff]  }
 0x11a   :  { %5888 = vmatprep.subr.bf16.mxu0 %v7762_v40  ;;  %v7846_v17 = vld [vmem:[#allocation6 + $0xfe4] ss:$8 sps:$4 sm:$0xff]   ;;  %v7841_v40 = vld [vmem:[#allocation6 + $0x3e0] ss:$8 sps:$4 sm:$0xff]  }
 0x11b   :  { %5388 = vmatmul.mubr.bf16.vlgmr.msra.gmra.mrb[0].mxu1 %v8974_v41 }
 0x11c   :  { %5880 = vmatmul.mubr.bf16.vlgmr.msra.gmra.mrb[0].mxu0 %v8978_v42  ;;  %5397 = vmatpush1.bf16.msra.mxu1 %v7757_v44  ;;  %v7844_v44 = vld [vmem:[#allocation6 + $0xfe0] ss:$8 sps:$4 sm:$0xff]  }
 0x11d   :  { %5889 = vmatpush1.bf16.msra.mxu0 %v7760_v45  ;;  %5398 = vmatprep.subr.bf16.mxu1 %v7765_v46  ;;  %v8986_v45 = vld.sshfl [vmem:[#allocation3 + $0x8] sm:$0xff pattern:$0x75316420]  ;;  %v8988_v46 = vld.sshfl [vmem:[#allocation3 + $0x20] sm:$0xff pattern:$0x75316420] }
 0x11e   :  { %5890 = vmatprep.subr.bf16.mxu0 %v7768_v47  ;;  %5428 = vmatprep.mubr.bf16.mxu1 %v955_v48  ;;  %v7849_v47 = vld [vmem:[#allocation6 + $0x3f4] ss:$8 sps:$4 sm:$0xff]  }
 0x11f   :  { %5920 = vmatprep.mubr.bf16.mxu0 %v1102_v50  ;;  %v7852_v48 = vld [vmem:[#allocation6 + $0xff4] ss:$8 sps:$4 sm:$0xff]   ;;  %v7847_v50 = vld [vmem:[#allocation6 + $0x3f0] ss:$8 sps:$4 sm:$0xff]  }
 0x120   :  { %5399 = vmatpush1.bf16.msra.mxu1 %v7763_v25  ;;  %v7850_v25 = vld [vmem:[#allocation6 + $0xff0] ss:$8 sps:$4 sm:$0xff]  }
 0x121   :  { %5891 = vmatpush1.bf16.msra.mxu0 %v7766_v26  ;;  %5400 = vmatprep.subr.bf16.mxu1 %v7771_v51  ;;  %v7855_v26 = vld [vmem:[#allocation6 + $0x404] ss:$8 sps:$4 sm:$0xff]  }
 0x122   :  { %5892 = vmatprep.subr.bf16.mxu0 %v7774_v53  ;;  %v7858_v51 = vld [vmem:[#allocation6 + $0x1004] ss:$8 sps:$4 sm:$0xff]   ;;  %v971_v53 = vcombine.high %v8986_v45, %v8986_v45 }
 0x124   :  { %5401 = vmatpush1.bf16.msra.mxu1 %v7769_v37  ;;  %v1118_v37 = vcombine.high %v8988_v46, %v8988_v46 }
 0x125   :  { %5893 = vmatpush1.bf16.msra.mxu0 %v7772_v54  ;;  %5402 = vmatprep.subr.bf16.mxu1 %v7777_v39  ;;  %v7853_v54 = vld [vmem:[#allocation6 + $0x400] ss:$8 sps:$4 sm:$0xff]  }
 0x126   :  { %5894 = vmatprep.subr.bf16.mxu0 %v7780_v55  ;;  %v7856_v39 = vld [vmem:[#allocation6 + $0x1000] ss:$8 sps:$4 sm:$0xff]   ;;  %v953_v55 = vcombine.high %v8974_v41, %v8974_v41  ;;  %v7867_v41 = vld [vmem:[#allocation6 + $0x424] ss:$8 sps:$4 sm:$0xff]  }
 0x128   :  { %5403 = vmatpush1.bf16.msra.mxu1 %v7775_v57  ;;  %v1100_v57 = vcombine.high %v8978_v42, %v8978_v42  ;;  %v7870_v42 = vld [vmem:[#allocation6 + $0x1024] ss:$8 sps:$4 sm:$0xff]  }
 0x129   :  { %5895 = vmatpush1.bf16.msra.mxu0 %v7778_v58  ;;  %5404 = vmatprep.subr.bf16.mxu1 %v7783_v59  ;;  %v7861_v58 = vld [vmem:[#allocation6 + $0x414] ss:$8 sps:$4 sm:$0xff]  }
 0x12a   :  { %5896 = vmatprep.subr.bf16.mxu0 %v7786_v60  ;;  %v7864_v59 = vld [vmem:[#allocation6 + $0x1014] ss:$8 sps:$4 sm:$0xff]   ;;  %v8999_v60 = vrot.slane %v971_v53, %v8926_v49  ;;  %v7934_v53 = vld [vmem:[#allocation6 + $0x10d0] ss:$8 sps:$4 sm:$0xff]  }
 0x12c   :  { %5405 = vmatpush1.bf16.msra.mxu1 %v7781_v61  ;;  %v9002_v61 = vrot.slane %v1118_v37, %v8926_v49  ;;  %v7939_v37 = vld [vmem:[#allocation6 + $0x4e4] ss:$8 sps:$4 sm:$0xff]  }
 0x12d   :  { %5897 = vmatpush1.bf16.msra.mxu0 %v7784_v62  ;;  %5406 = vmatprep.subr.bf16.mxu1 %v7789_v63  ;;  %v7859_v62 = vld [vmem:[#allocation6 + $0x410] ss:$8 sps:$4 sm:$0xff]  }
 0x12e   :  { %5898 = vmatprep.subr.bf16.mxu0 %v7792_v0  ;;  %v7862_v63 = vld [vmem:[#allocation6 + $0x1010] ss:$8 sps:$4 sm:$0xff]   ;;  %v7865_v0 = vld [vmem:[#allocation6 + $0x420] ss:$8 sps:$4 sm:$0xff]  }
 0x130   :  { %5407 = vmatpush1.bf16.msra.mxu1 %v7787_v1  ;;  %v7868_v1 = vld [vmem:[#allocation6 + $0x1020] ss:$8 sps:$4 sm:$0xff]  }
 0x131   :  { %5899 = vmatpush1.bf16.msra.mxu0 %v7790_v2  ;;  %5408 = vmatprep.subr.bf16.mxu1 %v7795_v3  ;;  %v7873_v2 = vld [vmem:[#allocation6 + $0x434] ss:$8 sps:$4 sm:$0xff]  }
 0x132   :  { %5900 = vmatprep.subr.bf16.mxu0 %v7798_v4  ;;  %v7876_v3 = vld [vmem:[#allocation6 + $0x1034] ss:$8 sps:$4 sm:$0xff]   ;;  %v7871_v4 = vld [vmem:[#allocation6 + $0x430] ss:$8 sps:$4 sm:$0xff]  }
 0x134   :  { %5409 = vmatpush1.bf16.msra.mxu1 %v7793_v5  ;;  %v7874_v5 = vld [vmem:[#allocation6 + $0x1030] ss:$8 sps:$4 sm:$0xff]  }
 0x135   :  { %5901 = vmatpush1.bf16.msra.mxu0 %v7796_v6  ;;  %5410 = vmatprep.subr.bf16.mxu1 %v7801_v7  ;;  %v7879_v6 = vld [vmem:[#allocation6 + $0x444] ss:$8 sps:$4 sm:$0xff]  }
 0x136   :  { %5902 = vmatprep.subr.bf16.mxu0 %v7804_v8  ;;  %v7882_v7 = vld [vmem:[#allocation6 + $0x1044] ss:$8 sps:$4 sm:$0xff]   ;;  %v7877_v8 = vld [vmem:[#allocation6 + $0x440] ss:$8 sps:$4 sm:$0xff]  }
 0x138   :  { %5411 = vmatpush1.bf16.msra.mxu1 %v7799_v9  ;;  %v7880_v9 = vld [vmem:[#allocation6 + $0x1040] ss:$8 sps:$4 sm:$0xff]  }
 0x139   :  { %5903 = vmatpush1.bf16.msra.mxu0 %v7802_v10  ;;  %5412 = vmatprep.subr.bf16.mxu1 %v7807_v11  ;;  %v7885_v10 = vld [vmem:[#allocation6 + $0x454] ss:$8 sps:$4 sm:$0xff]  }
 0x13a   :  { %5904 = vmatprep.subr.bf16.mxu0 %v7810_v12  ;;  %v7888_v11 = vld [vmem:[#allocation6 + $0x1054] ss:$8 sps:$4 sm:$0xff]   ;;  %v7883_v12 = vld [vmem:[#allocation6 + $0x450] ss:$8 sps:$4 sm:$0xff]  }
 0x13c   :  { %5413 = vmatpush1.bf16.msra.mxu1 %v7805_v13  ;;  %v7886_v13 = vld [vmem:[#allocation6 + $0x1050] ss:$8 sps:$4 sm:$0xff]  }
 0x13d   :  { %5905 = vmatpush1.bf16.msra.mxu0 %v7808_v14  ;;  %5414 = vmatprep.subr.bf16.mxu1 %v7813_v15  ;;  %v7891_v14 = vld [vmem:[#allocation6 + $0x464] ss:$8 sps:$4 sm:$0xff]  }
 0x13e   :  { %5906 = vmatprep.subr.bf16.mxu0 %v7816_v18  ;;  %v7894_v15 = vld [vmem:[#allocation6 + $0x1064] ss:$8 sps:$4 sm:$0xff]   ;;  %v7889_v18 = vld [vmem:[#allocation6 + $0x460] ss:$8 sps:$4 sm:$0xff]  }
 0x140   :  { %5415 = vmatpush1.bf16.msra.mxu1 %v7811_v19  ;;  %v7892_v19 = vld [vmem:[#allocation6 + $0x1060] ss:$8 sps:$4 sm:$0xff]  }
 0x141   :  { %5907 = vmatpush1.bf16.msra.mxu0 %v7814_v20  ;;  %5416 = vmatprep.subr.bf16.mxu1 %v7819_v21  ;;  %v7897_v20 = vld [vmem:[#allocation6 + $0x474] ss:$8 sps:$4 sm:$0xff]  }
 0x142   :  { %5908 = vmatprep.subr.bf16.mxu0 %v7822_v22  ;;  %v7900_v21 = vld [vmem:[#allocation6 + $0x1074] ss:$8 sps:$4 sm:$0xff]   ;;  %v7895_v22 = vld [vmem:[#allocation6 + $0x470] ss:$8 sps:$4 sm:$0xff]  }
 0x144   :  { %5417 = vmatpush1.bf16.msra.mxu1 %v7817_v23  ;;  %v7898_v23 = vld [vmem:[#allocation6 + $0x1070] ss:$8 sps:$4 sm:$0xff]  }
 0x145   :  { %5909 = vmatpush1.bf16.msra.mxu0 %v7820_v24  ;;  %5418 = vmatprep.subr.bf16.mxu1 %v7825_v52  ;;  %v7903_v24 = vld [vmem:[#allocation6 + $0x484] ss:$8 sps:$4 sm:$0xff]  }
 0x146   :  { %5910 = vmatprep.subr.bf16.mxu0 %v7828_v27  ;;  %v7906_v52 = vld [vmem:[#allocation6 + $0x1084] ss:$8 sps:$4 sm:$0xff]   ;;  %v7901_v27 = vld [vmem:[#allocation6 + $0x480] ss:$8 sps:$4 sm:$0xff]  }
 0x148   :  { %5419 = vmatpush1.bf16.msra.mxu1 %v7823_v56  ;;  %v7904_v56 = vld [vmem:[#allocation6 + $0x1080] ss:$8 sps:$4 sm:$0xff]  }
 0x149   :  { %5911 = vmatpush1.bf16.msra.mxu0 %v7826_v28  ;;  %5420 = vmatprep.subr.bf16.mxu1 %v7831_v29  ;;  %v7909_v28 = vld [vmem:[#allocation6 + $0x494] ss:$8 sps:$4 sm:$0xff]  }
 0x14a   :  { %5912 = vmatprep.subr.bf16.mxu0 %v7834_v30  ;;  %v7912_v29 = vld [vmem:[#allocation6 + $0x1094] ss:$8 sps:$4 sm:$0xff]   ;;  %v7907_v30 = vld [vmem:[#allocation6 + $0x490] ss:$8 sps:$4 sm:$0xff]  }
 0x14c   :  { %5421 = vmatpush1.bf16.msra.mxu1 %v7829_v31  ;;  %v7910_v31 = vld [vmem:[#allocation6 + $0x1090] ss:$8 sps:$4 sm:$0xff]  }
 0x14d   :  { %5913 = vmatpush1.bf16.msra.mxu0 %v7832_v32  ;;  %5422 = vmatprep.subr.bf16.mxu1 %v7837_v33  ;;  %v7915_v32 = vld [vmem:[#allocation6 + $0x4a4] ss:$8 sps:$4 sm:$0xff]  }
 0x14e   :  { %5914 = vmatprep.subr.bf16.mxu0 %v7840_v34  ;;  %v7918_v33 = vld [vmem:[#allocation6 + $0x10a4] ss:$8 sps:$4 sm:$0xff]   ;;  %v7913_v34 = vld [vmem:[#allocation6 + $0x4a0] ss:$8 sps:$4 sm:$0xff]  }
 0x150   :  { %5423 = vmatpush1.bf16.msra.mxu1 %v7835_v35  ;;  %v7916_v35 = vld [vmem:[#allocation6 + $0x10a0] ss:$8 sps:$4 sm:$0xff]  }
 0x151   :  { %5915 = vmatpush1.bf16.msra.mxu0 %v7838_v36  ;;  %5424 = vmatprep.subr.bf16.mxu1 %v7843_v16  ;;  %v7921_v36 = vld [vmem:[#allocation6 + $0x4b4] ss:$8 sps:$4 sm:$0xff]  }
 0x152   :  { %5916 = vmatprep.subr.bf16.mxu0 %v7846_v17  ;;  %v7924_v16 = vld [vmem:[#allocation6 + $0x10b4] ss:$8 sps:$4 sm:$0xff]   ;;  %v7919_v17 = vld [vmem:[#allocation6 + $0x4b0] ss:$8 sps:$4 sm:$0xff]  }
 0x154   :  { %5425 = vmatpush1.bf16.msra.mxu1 %v7841_v40  ;;  %v7922_v40 = vld [vmem:[#allocation6 + $0x10b0] ss:$8 sps:$4 sm:$0xff]  }
 0x155   :  { %5917 = vmatpush1.bf16.msra.mxu0 %v7844_v44  ;;  %5426 = vmatprep.subr.bf16.mxu1 %v7849_v47  ;;  %v7927_v44 = vld [vmem:[#allocation6 + $0x4c4] ss:$8 sps:$4 sm:$0xff]  }
 0x156   :  { %5918 = vmatprep.subr.bf16.mxu0 %v7852_v48  ;;  %v7930_v47 = vld [vmem:[#allocation6 + $0x10c4] ss:$8 sps:$4 sm:$0xff]   ;;  %v7925_v48 = vld [vmem:[#allocation6 + $0x4c0] ss:$8 sps:$4 sm:$0xff]  }
 0x158   :  { %5427 = vmatpush1.bf16.msra.mxu1 %v7847_v50  ;;  %v7928_v50 = vld [vmem:[#allocation6 + $0x10c0] ss:$8 sps:$4 sm:$0xff]  }
 0x159   :  { %5919 = vmatpush1.bf16.msra.mxu0 %v7850_v25  ;;  %5437 = vmatprep.subr.bf16.mxu1 %v7855_v26  ;;  %v7933_v25 = vld [vmem:[#allocation6 + $0x4d4] ss:$8 sps:$4 sm:$0xff]  }
 0x15a   :  { %5929 = vmatprep.subr.bf16.mxu0 %v7858_v51  ;;  %v7936_v26 = vld [vmem:[#allocation6 + $0x10d4] ss:$8 sps:$4 sm:$0xff]   ;;  %v7931_v51 = vld [vmem:[#allocation6 + $0x4d0] ss:$8 sps:$4 sm:$0xff]  }
 0x15b   :  { %5429 = vmatmul.mubr.bf16.vlgmr.msra.gmra.mrb[0].mxu1 %v953_v55  ;;  %v7940_v55 = vld [vmem:[#allocation6 + $0x10e0] ss:$8 sps:$4 sm:$0xff]  }
 0x15c   :  { %5921 = vmatmul.mubr.bf16.vlgmr.msra.gmra.mrb[0].mxu0 %v1100_v57  ;;  %5438 = vmatpush1.bf16.msra.mxu1 %v7853_v54  ;;  %v7942_v54 = vld [vmem:[#allocation6 + $0x10e4] ss:$8 sps:$4 sm:$0xff]   ;;  %v7945_v57 = vld [vmem:[#allocation6 + $0x4f4] ss:$8 sps:$4 sm:$0xff]  }
 0x15d   :  { %5930 = vmatpush1.bf16.msra.mxu0 %v7856_v39  ;;  %5439 = vmatprep.subr.bf16.mxu1 %v7861_v58  ;;  %v7937_v39 = vld [vmem:[#allocation6 + $0x4e0] ss:$8 sps:$4 sm:$0xff]   ;;  %v7948_v58 = vld [vmem:[#allocation6 + $0x10f4] ss:$8 sps:$4 sm:$0xff]  }
 0x15e   :  { %5931 = vmatprep.subr.bf16.mxu0 %v7864_v59  ;;  %5469 = vmatprep.mubr.bf16.mxu1 %v8999_v60  ;;  %v7943_v59 = vld [vmem:[#allocation6 + $0x4f0] ss:$8 sps:$4 sm:$0xff]  }
 0x15f   :  { %5961 = vmatprep.mubr.bf16.mxu0 %v9002_v61 }
 0x160   :  { %5440 = vmatpush1.bf16.msra.mxu1 %v7859_v62  ;;  %v7946_v62 = vld [vmem:[#allocation6 + $0x10f0] ss:$8 sps:$4 sm:$0xff]  }
 0x161   :  { %5932 = vmatpush1.bf16.msra.mxu0 %v7862_v63  ;;  %5441 = vmatprep.subr.bf16.mxu1 %v7867_v41  ;;  %v7951_v63 = vld [vmem:[#allocation6 + $0x504] ss:$8 sps:$4 sm:$0xff]  }
 0x162   :  { %5933 = vmatprep.subr.bf16.mxu0 %v7870_v42  ;;  %v7954_v41 = vld [vmem:[#allocation6 + $0x1104] ss:$8 sps:$4 sm:$0xff]   ;;  %v9008_v42 = vrot.slane %v8986_v45, %v8926_v49  ;;  %v7955_v45 = vld [vmem:[#allocation6 + $0x510] ss:$8 sps:$4 sm:$0xff]  }
 0x164   :  { %5442 = vmatpush1.bf16.msra.mxu1 %v7865_v0  ;;  %v9012_v0 = vrot.slane %v8988_v46, %v8926_v49  ;;  %v7958_v46 = vld [vmem:[#allocation6 + $0x1110] ss:$8 sps:$4 sm:$0xff]  }
 0x165   :  { %5934 = vmatpush1.bf16.msra.mxu0 %v7868_v1  ;;  %5443 = vmatprep.subr.bf16.mxu1 %v7873_v2  ;;  %v7949_v1 = vld [vmem:[#allocation6 + $0x500] ss:$8 sps:$4 sm:$0xff]  }
 0x166   :  { %5935 = vmatprep.subr.bf16.mxu0 %v7876_v3  ;;  %v7952_v2 = vld [vmem:[#allocation6 + $0x1100] ss:$8 sps:$4 sm:$0xff]   ;;  %v7957_v3 = vld [vmem:[#allocation6 + $0x514] ss:$8 sps:$4 sm:$0xff]  }
 0x168   :  { %5444 = vmatpush1.bf16.msra.mxu1 %v7871_v4  ;;  %v7960_v4 = vld [vmem:[#allocation6 + $0x1114] ss:$8 sps:$4 sm:$0xff]  }
 0x169   :  { %5936 = vmatpush1.bf16.msra.mxu0 %v7874_v5  ;;  %5445 = vmatprep.subr.bf16.mxu1 %v7879_v6  ;;  %v1003_v5 = vcombine.high %v8999_v60, %v8999_v60  ;;  %v1150_v6 = vcombine.high %v9002_v61, %v9002_v61  ;;  %v7961_v60 = vld [vmem:[#allocation6 + $0x520] ss:$8 sps:$4 sm:$0xff]   ;;  %v7969_v61 = vld [vmem:[#allocation6 + $0x534] ss:$8 sps:$4 sm:$0xff]  }
 0x16a   :  { %5937 = vmatprep.subr.bf16.mxu0 %v7882_v7  ;;  %v7963_v7 = vld [vmem:[#allocation6 + $0x524] ss:$8 sps:$4 sm:$0xff]  }
 0x16c   :  { %5446 = vmatpush1.bf16.msra.mxu1 %v7877_v8  ;;  %v7966_v8 = vld [vmem:[#allocation6 + $0x1124] ss:$8 sps:$4 sm:$0xff]  }
 0x16d   :  { %5938 = vmatpush1.bf16.msra.mxu0 %v7880_v9  ;;  %5447 = vmatprep.subr.bf16.mxu1 %v7885_v10  ;;  %v7964_v9 = vld [vmem:[#allocation6 + $0x1120] ss:$8 sps:$4 sm:$0xff]   ;;  %v7972_v10 = vld [vmem:[#allocation6 + $0x1134] ss:$8 sps:$4 sm:$0xff]  }
 0x16e   :  { %5939 = vmatprep.subr.bf16.mxu0 %v7888_v11  ;;  %v7967_v11 = vld [vmem:[#allocation6 + $0x530] ss:$8 sps:$4 sm:$0xff]  }
 0x170   :  { %5448 = vmatpush1.bf16.msra.mxu1 %v7883_v12  ;;  %v7970_v12 = vld [vmem:[#allocation6 + $0x1130] ss:$8 sps:$4 sm:$0xff]  }
 0x171   :  { %5940 = vmatpush1.bf16.msra.mxu0 %v7886_v13  ;;  %5449 = vmatprep.subr.bf16.mxu1 %v7891_v14  ;;  %v7975_v13 = vld [vmem:[#allocation6 + $0x544] ss:$8 sps:$4 sm:$0xff]  }
 0x172   :  { %5941 = vmatprep.subr.bf16.mxu0 %v7894_v15  ;;  %v7978_v14 = vld [vmem:[#allocation6 + $0x1144] ss:$8 sps:$4 sm:$0xff]   ;;  %v7973_v15 = vld [vmem:[#allocation6 + $0x540] ss:$8 sps:$4 sm:$0xff]  }
 0x174   :  { %5450 = vmatpush1.bf16.msra.mxu1 %v7889_v18  ;;  %v7976_v18 = vld [vmem:[#allocation6 + $0x1140] ss:$8 sps:$4 sm:$0xff]  }
 0x175   :  { %5942 = vmatpush1.bf16.msra.mxu0 %v7892_v19  ;;  %5451 = vmatprep.subr.bf16.mxu1 %v7897_v20  ;;  %v7981_v19 = vld [vmem:[#allocation6 + $0x554] ss:$8 sps:$4 sm:$0xff]  }
 0x176   :  { %5943 = vmatprep.subr.bf16.mxu0 %v7900_v21  ;;  %v7984_v20 = vld [vmem:[#allocation6 + $0x1154] ss:$8 sps:$4 sm:$0xff]   ;;  %v7979_v21 = vld [vmem:[#allocation6 + $0x550] ss:$8 sps:$4 sm:$0xff]  }
 0x178   :  { %5452 = vmatpush1.bf16.msra.mxu1 %v7895_v22  ;;  %v7982_v22 = vld [vmem:[#allocation6 + $0x1150] ss:$8 sps:$4 sm:$0xff]  }
 0x179   :  { %5944 = vmatpush1.bf16.msra.mxu0 %v7898_v23  ;;  %5453 = vmatprep.subr.bf16.mxu1 %v7903_v24  ;;  %v7987_v23 = vld [vmem:[#allocation6 + $0x564] ss:$8 sps:$4 sm:$0xff]  }
 0x17a   :  { %5945 = vmatprep.subr.bf16.mxu0 %v7906_v52  ;;  %v7990_v24 = vld [vmem:[#allocation6 + $0x1164] ss:$8 sps:$4 sm:$0xff]   ;;  %v7985_v52 = vld [vmem:[#allocation6 + $0x560] ss:$8 sps:$4 sm:$0xff]  }
 0x17c   :  { %5454 = vmatpush1.bf16.msra.mxu1 %v7901_v27  ;;  %v7988_v27 = vld [vmem:[#allocation6 + $0x1160] ss:$8 sps:$4 sm:$0xff]  }
 0x17d   :  { %5946 = vmatpush1.bf16.msra.mxu0 %v7904_v56  ;;  %5455 = vmatprep.subr.bf16.mxu1 %v7909_v28  ;;  %v7993_v56 = vld [vmem:[#allocation6 + $0x574] ss:$8 sps:$4 sm:$0xff]  }
 0x17e   :  { %5947 = vmatprep.subr.bf16.mxu0 %v7912_v29  ;;  %v7996_v28 = vld [vmem:[#allocation6 + $0x1174] ss:$8 sps:$4 sm:$0xff]   ;;  %v7991_v29 = vld [vmem:[#allocation6 + $0x570] ss:$8 sps:$4 sm:$0xff]  }
 0x180   :  { %5456 = vmatpush1.bf16.msra.mxu1 %v7907_v30  ;;  %v7994_v30 = vld [vmem:[#allocation6 + $0x1170] ss:$8 sps:$4 sm:$0xff]  }
 0x181   :  { %5948 = vmatpush1.bf16.msra.mxu0 %v7910_v31  ;;  %5457 = vmatprep.subr.bf16.mxu1 %v7915_v32  ;;  %v7999_v31 = vld [vmem:[#allocation6 + $0x584] ss:$8 sps:$4 sm:$0xff]  }
 0x182   :  { %5949 = vmatprep.subr.bf16.mxu0 %v7918_v33  ;;  %v8002_v32 = vld [vmem:[#allocation6 + $0x1184] ss:$8 sps:$4 sm:$0xff]   ;;  %v7997_v33 = vld [vmem:[#allocation6 + $0x580] ss:$8 sps:$4 sm:$0xff]  }
 0x184   :  { %5458 = vmatpush1.bf16.msra.mxu1 %v7913_v34  ;;  %v8000_v34 = vld [vmem:[#allocation6 + $0x1180] ss:$8 sps:$4 sm:$0xff]  }
 0x185   :  { %5950 = vmatpush1.bf16.msra.mxu0 %v7916_v35  ;;  %5459 = vmatprep.subr.bf16.mxu1 %v7921_v36  ;;  %v8005_v35 = vld [vmem:[#allocation6 + $0x594] ss:$8 sps:$4 sm:$0xff]  }
 0x186   :  { %5951 = vmatprep.subr.bf16.mxu0 %v7924_v16  ;;  %v8008_v36 = vld [vmem:[#allocation6 + $0x1194] ss:$8 sps:$4 sm:$0xff]   ;;  %v8003_v16 = vld [vmem:[#allocation6 + $0x590] ss:$8 sps:$4 sm:$0xff]  }
 0x188   :  { %5460 = vmatpush1.bf16.msra.mxu1 %v7919_v17  ;;  %v8006_v17 = vld [vmem:[#allocation6 + $0x1190] ss:$8 sps:$4 sm:$0xff]  }
 0x189   :  { %5952 = vmatpush1.bf16.msra.mxu0 %v7922_v40  ;;  %5461 = vmatprep.subr.bf16.mxu1 %v7927_v44  ;;  %v8011_v40 = vld [vmem:[#allocation6 + $0x5a4] ss:$8 sps:$4 sm:$0xff]  }
 0x18a   :  { %5953 = vmatprep.subr.bf16.mxu0 %v7930_v47  ;;  %v8014_v44 = vld [vmem:[#allocation6 + $0x11a4] ss:$8 sps:$4 sm:$0xff]   ;;  %v8009_v47 = vld [vmem:[#allocation6 + $0x5a0] ss:$8 sps:$4 sm:$0xff]  }
 0x18c   :  { %5462 = vmatpush1.bf16.msra.mxu1 %v7925_v48  ;;  %v8012_v48 = vld [vmem:[#allocation6 + $0x11a0] ss:$8 sps:$4 sm:$0xff]  }
 0x18d   :  { %5954 = vmatpush1.bf16.msra.mxu0 %v7928_v50  ;;  %5463 = vmatprep.subr.bf16.mxu1 %v7933_v25  ;;  %v8017_v50 = vld [vmem:[#allocation6 + $0x5b4] ss:$8 sps:$4 sm:$0xff]  }
 0x18e   :  { %5955 = vmatprep.subr.bf16.mxu0 %v7936_v26  ;;  %v8020_v25 = vld [vmem:[#allocation6 + $0x11b4] ss:$8 sps:$4 sm:$0xff]   ;;  %v8015_v26 = vld [vmem:[#allocation6 + $0x5b0] ss:$8 sps:$4 sm:$0xff]  }
 0x190   :  { %5464 = vmatpush1.bf16.msra.mxu1 %v7931_v51  ;;  %v8018_v51 = vld [vmem:[#allocation6 + $0x11b0] ss:$8 sps:$4 sm:$0xff]  }
 0x191   :  { %5956 = vmatpush1.bf16.msra.mxu0 %v7934_v53  ;;  %5465 = vmatprep.subr.bf16.mxu1 %v7939_v37  ;;  %v8023_v53 = vld [vmem:[#allocation6 + $0x5c4] ss:$8 sps:$4 sm:$0xff]  }
 0x192   :  { %5957 = vmatprep.subr.bf16.mxu0 %v7942_v54  ;;  %v8026_v37 = vld [vmem:[#allocation6 + $0x11c4] ss:$8 sps:$4 sm:$0xff]   ;;  %v8021_v54 = vld [vmem:[#allocation6 + $0x5c0] ss:$8 sps:$4 sm:$0xff]  }
 0x194   :  { %5466 = vmatpush1.bf16.msra.mxu1 %v7937_v39  ;;  %v8024_v39 = vld [vmem:[#allocation6 + $0x11c0] ss:$8 sps:$4 sm:$0xff]  }
 0x195   :  { %5958 = vmatpush1.bf16.msra.mxu0 %v7940_v55  ;;  %5467 = vmatprep.subr.bf16.mxu1 %v7945_v57  ;;  %v8029_v55 = vld [vmem:[#allocation6 + $0x5d4] ss:$8 sps:$4 sm:$0xff]  }
 0x196   :  { %5959 = vmatprep.subr.bf16.mxu0 %v7948_v58  ;;  %v8032_v57 = vld [vmem:[#allocation6 + $0x11d4] ss:$8 sps:$4 sm:$0xff]   ;;  %v8027_v58 = vld [vmem:[#allocation6 + $0x5d0] ss:$8 sps:$4 sm:$0xff]  }
 0x198   :  { %5468 = vmatpush1.bf16.msra.mxu1 %v7943_v59  ;;  %v8030_v59 = vld [vmem:[#allocation6 + $0x11d0] ss:$8 sps:$4 sm:$0xff]  }
 0x199   :  { %5960 = vmatpush1.bf16.msra.mxu0 %v7946_v62  ;;  %5478 = vmatprep.subr.bf16.mxu1 %v7951_v63  ;;  %v8035_v62 = vld [vmem:[#allocation6 + $0x5e4] ss:$8 sps:$4 sm:$0xff]  }
 0x19a   :  { %5970 = vmatprep.subr.bf16.mxu0 %v7954_v41  ;;  %v8038_v63 = vld [vmem:[#allocation6 + $0x11e4] ss:$8 sps:$4 sm:$0xff]   ;;  %v8677_v41 = vld [vmem:[#allocation3 + $0x8] sm:$0xff] }
 0x19b   :  { %5470 = vmatmul.mubr.bf16.vlgmr.msra.gmra.mrb[0].mxu1 %v9008_v42 }
 0x19c   :  { %5962 = vmatmul.mubr.bf16.vlgmr.msra.gmra.mrb[0].mxu0 %v9012_v0  ;;  %5479 = vmatpush1.bf16.msra.mxu1 %v7949_v1  ;;  %v956_v1 = vcombine.high %v8677_v41, %v8677_v41  ;;  %v8108_v41 = vld [vmem:[#allocation6 + $0x12a0] ss:$8 sps:$4 sm:$0xff]  }
 0x19d   :  { %5971 = vmatpush1.bf16.msra.mxu0 %v7952_v2  ;;  %5480 = vmatprep.subr.bf16.mxu1 %v7957_v3  ;;  %v8678_v2 = vld [vmem:[#allocation3 + $0x20] sm:$0xff] }
 0x19e   :  { %5972 = vmatprep.subr.bf16.mxu0 %v7960_v4  ;;  %5510 = vmatprep.mubr.bf16.mxu1 %v1003_v5  ;;  %v1103_v3 = vcombine.high %v8678_v2, %v8678_v2  ;;  %v8033_v4 = vld [vmem:[#allocation6 + $0x5e0] ss:$8 sps:$4 sm:$0xff]   ;;  %v8116_v2 = vld [vmem:[#allocation6 + $0x12b4] ss:$8 sps:$4 sm:$0xff]  }
 0x19f   :  { %6002 = vmatprep.mubr.bf16.mxu0 %v1150_v6  ;;  %v8036_v5 = vld [vmem:[#allocation6 + $0x11e0] ss:$8 sps:$4 sm:$0xff]   ;;  %v8041_v6 = vld [vmem:[#allocation6 + $0x5f4] ss:$8 sps:$4 sm:$0xff]  }
 0x1a0   :  { %5481 = vmatpush1.bf16.msra.mxu1 %v7955_v45  ;;  %v8044_v45 = vld [vmem:[#allocation6 + $0x11f4] ss:$8 sps:$4 sm:$0xff]  }
 0x1a1   :  { %5973 = vmatpush1.bf16.msra.mxu0 %v7958_v46  ;;  %5482 = vmatprep.subr.bf16.mxu1 %v7963_v7  ;;  %v9021_v46 = vrot.slane %v956_v1, %v8926_v49  ;;  %v9024_v7 = vrot.slane %v1103_v3, %v8926_v49  ;;  %v8113_v1 = vld [vmem:[#allocation6 + $0x6b4] ss:$8 sps:$4 sm:$0xff]   ;;  %v8111_v3 = vld [vmem:[#allocation6 + $0x6b0] ss:$8 sps:$4 sm:$0xff]  }
 0x1a2   :  { %5974 = vmatprep.subr.bf16.mxu0 %v7966_v8  ;;  %v8039_v8 = vld [vmem:[#allocation6 + $0x5f0] ss:$8 sps:$4 sm:$0xff]  }
 0x1a4   :  { %5483 = vmatpush1.bf16.msra.mxu1 %v7961_v60  ;;  %v8042_v60 = vld [vmem:[#allocation6 + $0x11f0] ss:$8 sps:$4 sm:$0xff]  }
 0x1a5   :  { %5975 = vmatpush1.bf16.msra.mxu0 %v7964_v9  ;;  %5484 = vmatprep.subr.bf16.mxu1 %v7969_v61  ;;  %v8047_v9 = vld [vmem:[#allocation6 + $0x604] ss:$8 sps:$4 sm:$0xff]  }
 0x1a6   :  { %5976 = vmatprep.subr.bf16.mxu0 %v7972_v10  ;;  %v8050_v61 = vld [vmem:[#allocation6 + $0x1204] ss:$8 sps:$4 sm:$0xff]   ;;  %v972_v10 = vcombine.high %v9021_v46, %v9021_v46 }
 0x1a8   :  { %5485 = vmatpush1.bf16.msra.mxu1 %v7967_v11  ;;  %v1119_v11 = vcombine.high %v9024_v7, %v9024_v7 }
 0x1a9   :  { %5977 = vmatpush1.bf16.msra.mxu0 %v7970_v12  ;;  %5486 = vmatprep.subr.bf16.mxu1 %v7975_v13  ;;  %v1001_v12 = vcombine.high %v9008_v42, %v9008_v42  ;;  %v1148_v13 = vcombine.high %v9012_v0, %v9012_v0  ;;  %v8051_v42 = vld [vmem:[#allocation6 + $0x610] ss:$8 sps:$4 sm:$0xff]  }
 0x1aa   :  { %5978 = vmatprep.subr.bf16.mxu0 %v7978_v14  ;;  %v8045_v14 = vld [vmem:[#allocation6 + $0x600] ss:$8 sps:$4 sm:$0xff]   ;;  %v8054_v0 = vld [vmem:[#allocation6 + $0x1210] ss:$8 sps:$4 sm:$0xff]  }
 0x1ac   :  { %5487 = vmatpush1.bf16.msra.mxu1 %v7973_v15  ;;  %v8048_v15 = vld [vmem:[#allocation6 + $0x1200] ss:$8 sps:$4 sm:$0xff]  }
 0x1ad   :  { %5979 = vmatpush1.bf16.msra.mxu0 %v7976_v18  ;;  %5488 = vmatprep.subr.bf16.mxu1 %v7981_v19  ;;  %v8053_v18 = vld [vmem:[#allocation6 + $0x614] ss:$8 sps:$4 sm:$0xff]  }
 0x1ae   :  { %5980 = vmatprep.subr.bf16.mxu0 %v7984_v20  ;;  %v8056_v19 = vld [vmem:[#allocation6 + $0x1214] ss:$8 sps:$4 sm:$0xff]   ;;  %v9035_v20 = vrot.slane %v972_v10, %v8926_v49  ;;  %v8126_v10 = vld [vmem:[#allocation6 + $0x12d0] ss:$8 sps:$4 sm:$0xff]  }
 0x1b0   :  { %5489 = vmatpush1.bf16.msra.mxu1 %v7979_v21  ;;  %v9038_v21 = vrot.slane %v1119_v11, %v8926_v49  ;;  %v8131_v11 = vld [vmem:[#allocation6 + $0x6e4] ss:$8 sps:$4 sm:$0xff]  }
 0x1b1   :  { %5981 = vmatpush1.bf16.msra.mxu0 %v7982_v22  ;;  %5490 = vmatprep.subr.bf16.mxu1 %v7987_v23  ;;  %v8059_v22 = vld [vmem:[#allocation6 + $0x624] ss:$8 sps:$4 sm:$0xff]  }
 0x1b2   :  { %5982 = vmatprep.subr.bf16.mxu0 %v7990_v24  ;;  %v8062_v23 = vld [vmem:[#allocation6 + $0x1224] ss:$8 sps:$4 sm:$0xff]   ;;  %v8057_v24 = vld [vmem:[#allocation6 + $0x620] ss:$8 sps:$4 sm:$0xff]  }
 0x1b4   :  { %5491 = vmatpush1.bf16.msra.mxu1 %v7985_v52  ;;  %v8060_v52 = vld [vmem:[#allocation6 + $0x1220] ss:$8 sps:$4 sm:$0xff]  }
 0x1b5   :  { %5983 = vmatpush1.bf16.msra.mxu0 %v7988_v27  ;;  %5492 = vmatprep.subr.bf16.mxu1 %v7993_v56  ;;  %v8065_v27 = vld [vmem:[#allocation6 + $0x634] ss:$8 sps:$4 sm:$0xff]  }
 0x1b6   :  { %5984 = vmatprep.subr.bf16.mxu0 %v7996_v28  ;;  %v8068_v56 = vld [vmem:[#allocation6 + $0x1234] ss:$8 sps:$4 sm:$0xff]   ;;  %v8063_v28 = vld [vmem:[#allocation6 + $0x630] ss:$8 sps:$4 sm:$0xff]  }
 0x1b8   :  { %5493 = vmatpush1.bf16.msra.mxu1 %v7991_v29  ;;  %v8066_v29 = vld [vmem:[#allocation6 + $0x1230] ss:$8 sps:$4 sm:$0xff]  }
 0x1b9   :  { %5985 = vmatpush1.bf16.msra.mxu0 %v7994_v30  ;;  %5494 = vmatprep.subr.bf16.mxu1 %v7999_v31  ;;  %v8071_v30 = vld [vmem:[#allocation6 + $0x644] ss:$8 sps:$4 sm:$0xff]  }
 0x1ba   :  { %5986 = vmatprep.subr.bf16.mxu0 %v8002_v32  ;;  %v8074_v31 = vld [vmem:[#allocation6 + $0x1244] ss:$8 sps:$4 sm:$0xff]   ;;  %v8069_v32 = vld [vmem:[#allocation6 + $0x640] ss:$8 sps:$4 sm:$0xff]  }
 0x1bc   :  { %5495 = vmatpush1.bf16.msra.mxu1 %v7997_v33  ;;  %v8072_v33 = vld [vmem:[#allocation6 + $0x1240] ss:$8 sps:$4 sm:$0xff]  }
 0x1bd   :  { %5987 = vmatpush1.bf16.msra.mxu0 %v8000_v34  ;;  %5496 = vmatprep.subr.bf16.mxu1 %v8005_v35  ;;  %v8077_v34 = vld [vmem:[#allocation6 + $0x654] ss:$8 sps:$4 sm:$0xff]  }
 0x1be   :  { %5988 = vmatprep.subr.bf16.mxu0 %v8008_v36  ;;  %v8080_v35 = vld [vmem:[#allocation6 + $0x1254] ss:$8 sps:$4 sm:$0xff]   ;;  %v8075_v36 = vld [vmem:[#allocation6 + $0x650] ss:$8 sps:$4 sm:$0xff]  }
 0x1c0   :  { %5497 = vmatpush1.bf16.msra.mxu1 %v8003_v16  ;;  %v8078_v16 = vld [vmem:[#allocation6 + $0x1250] ss:$8 sps:$4 sm:$0xff]  }
 0x1c1   :  { %5989 = vmatpush1.bf16.msra.mxu0 %v8006_v17  ;;  %5498 = vmatprep.subr.bf16.mxu1 %v8011_v40  ;;  %v8083_v17 = vld [vmem:[#allocation6 + $0x664] ss:$8 sps:$4 sm:$0xff]  }
 0x1c2   :  { %5990 = vmatprep.subr.bf16.mxu0 %v8014_v44  ;;  %v8086_v40 = vld [vmem:[#allocation6 + $0x1264] ss:$8 sps:$4 sm:$0xff]   ;;  %v8081_v44 = vld [vmem:[#allocation6 + $0x660] ss:$8 sps:$4 sm:$0xff]  }
 0x1c4   :  { %5499 = vmatpush1.bf16.msra.mxu1 %v8009_v47  ;;  %v8084_v47 = vld [vmem:[#allocation6 + $0x1260] ss:$8 sps:$4 sm:$0xff]  }
 0x1c5   :  { %5991 = vmatpush1.bf16.msra.mxu0 %v8012_v48  ;;  %5500 = vmatprep.subr.bf16.mxu1 %v8017_v50  ;;  %v8089_v48 = vld [vmem:[#allocation6 + $0x674] ss:$8 sps:$4 sm:$0xff]  }
 0x1c6   :  { %5992 = vmatprep.subr.bf16.mxu0 %v8020_v25  ;;  %v8092_v50 = vld [vmem:[#allocation6 + $0x1274] ss:$8 sps:$4 sm:$0xff]   ;;  %v8087_v25 = vld [vmem:[#allocation6 + $0x670] ss:$8 sps:$4 sm:$0xff]  }
 0x1c8   :  { %5501 = vmatpush1.bf16.msra.mxu1 %v8015_v26  ;;  %v8090_v26 = vld [vmem:[#allocation6 + $0x1270] ss:$8 sps:$4 sm:$0xff]  }
 0x1c9   :  { %5993 = vmatpush1.bf16.msra.mxu0 %v8018_v51  ;;  %5502 = vmatprep.subr.bf16.mxu1 %v8023_v53  ;;  %v8095_v51 = vld [vmem:[#allocation6 + $0x684] ss:$8 sps:$4 sm:$0xff]  }
 0x1ca   :  { %5994 = vmatprep.subr.bf16.mxu0 %v8026_v37  ;;  %v8098_v53 = vld [vmem:[#allocation6 + $0x1284] ss:$8 sps:$4 sm:$0xff]   ;;  %v8093_v37 = vld [vmem:[#allocation6 + $0x680] ss:$8 sps:$4 sm:$0xff]  }
 0x1cc   :  { %5503 = vmatpush1.bf16.msra.mxu1 %v8021_v54  ;;  %v8096_v54 = vld [vmem:[#allocation6 + $0x1280] ss:$8 sps:$4 sm:$0xff]  }
 0x1cd   :  { %5995 = vmatpush1.bf16.msra.mxu0 %v8024_v39  ;;  %5504 = vmatprep.subr.bf16.mxu1 %v8029_v55  ;;  %v8101_v39 = vld [vmem:[#allocation6 + $0x694] ss:$8 sps:$4 sm:$0xff]  }
 0x1ce   :  { %5996 = vmatprep.subr.bf16.mxu0 %v8032_v57  ;;  %v8104_v55 = vld [vmem:[#allocation6 + $0x1294] ss:$8 sps:$4 sm:$0xff]   ;;  %v8099_v57 = vld [vmem:[#allocation6 + $0x690] ss:$8 sps:$4 sm:$0xff]  }
 0x1d0   :  { %5505 = vmatpush1.bf16.msra.mxu1 %v8027_v58  ;;  %v8102_v58 = vld [vmem:[#allocation6 + $0x1290] ss:$8 sps:$4 sm:$0xff]  }
 0x1d1   :  { %5997 = vmatpush1.bf16.msra.mxu0 %v8030_v59  ;;  %5506 = vmatprep.subr.bf16.mxu1 %v8035_v62  ;;  %v8107_v59 = vld [vmem:[#allocation6 + $0x6a4] ss:$8 sps:$4 sm:$0xff]  }
 0x1d2   :  { %5998 = vmatprep.subr.bf16.mxu0 %v8038_v63  ;;  %v8110_v62 = vld [vmem:[#allocation6 + $0x12a4] ss:$8 sps:$4 sm:$0xff]   ;;  %v8105_v63 = vld [vmem:[#allocation6 + $0x6a0] ss:$8 sps:$4 sm:$0xff]  }
 0x1d4   :  { %5507 = vmatpush1.bf16.msra.mxu1 %v8033_v4  ;;  %v8114_v4 = vld [vmem:[#allocation6 + $0x12b0] ss:$8 sps:$4 sm:$0xff]  }
 0x1d5   :  { %5999 = vmatpush1.bf16.msra.mxu0 %v8036_v5  ;;  %5508 = vmatprep.subr.bf16.mxu1 %v8041_v6  ;;  %v8119_v5 = vld [vmem:[#allocation6 + $0x6c4] ss:$8 sps:$4 sm:$0xff]  }
 0x1d6   :  { %6000 = vmatprep.subr.bf16.mxu0 %v8044_v45  ;;  %v8122_v6 = vld [vmem:[#allocation6 + $0x12c4] ss:$8 sps:$4 sm:$0xff]   ;;  %v8117_v45 = vld [vmem:[#allocation6 + $0x6c0] ss:$8 sps:$4 sm:$0xff]  }
 0x1d8   :  { %5509 = vmatpush1.bf16.msra.mxu1 %v8039_v8  ;;  %v8120_v8 = vld [vmem:[#allocation6 + $0x12c0] ss:$8 sps:$4 sm:$0xff]  }
 0x1d9   :  { %6001 = vmatpush1.bf16.msra.mxu0 %v8042_v60  ;;  %5519 = vmatprep.subr.bf16.mxu1 %v8047_v9  ;;  %v8125_v60 = vld [vmem:[#allocation6 + $0x6d4] ss:$8 sps:$4 sm:$0xff]  }
 0x1da   :  { %6011 = vmatprep.subr.bf16.mxu0 %v8050_v61  ;;  %v8128_v9 = vld [vmem:[#allocation6 + $0x12d4] ss:$8 sps:$4 sm:$0xff]   ;;  %v8123_v61 = vld [vmem:[#allocation6 + $0x6d0] ss:$8 sps:$4 sm:$0xff]  }
 0x1db   :  { %5511 = vmatmul.mubr.bf16.vlgmr.msra.gmra.mrb[0].mxu1 %v1001_v12  ;;  %v8134_v12 = vld [vmem:[#allocation6 + $0x12e4] ss:$8 sps:$4 sm:$0xff]  }
 0x1dc   :  { %6003 = vmatmul.mubr.bf16.vlgmr.msra.gmra.mrb[0].mxu0 %v1148_v13  ;;  %5520 = vmatpush1.bf16.msra.mxu1 %v8045_v14  ;;  %v8129_v13 = vld [vmem:[#allocation6 + $0x6e0] ss:$8 sps:$4 sm:$0xff]  }
 0x1dd   :  { %6012 = vmatpush1.bf16.msra.mxu0 %v8048_v15  ;;  %5521 = vmatprep.subr.bf16.mxu1 %v8053_v18  ;;  %v8132_v14 = vld [vmem:[#allocation6 + $0x12e0] ss:$8 sps:$4 sm:$0xff]   ;;  %v8137_v15 = vld [vmem:[#allocation6 + $0x6f4] ss:$8 sps:$4 sm:$0xff]  }
 0x1de   :  { %6013 = vmatprep.subr.bf16.mxu0 %v8056_v19  ;;  %5551 = vmatprep.mubr.bf16.mxu1 %v9035_v20  ;;  %v8140_v18 = vld [vmem:[#allocation6 + $0x12f4] ss:$8 sps:$4 sm:$0xff]   ;;  %v8135_v19 = vld [vmem:[#allocation6 + $0x6f0] ss:$8 sps:$4 sm:$0xff]  }
 0x1df   :  { %6043 = vmatprep.mubr.bf16.mxu0 %v9038_v21 }
 0x1e0   :  { %5522 = vmatpush1.bf16.msra.mxu1 %v8051_v42  ;;  %v8138_v42 = vld [vmem:[#allocation6 + $0x12f0] ss:$8 sps:$4 sm:$0xff]  }
 0x1e1   :  { %6014 = vmatpush1.bf16.msra.mxu0 %v8054_v0  ;;  %5523 = vmatprep.subr.bf16.mxu1 %v8059_v22  ;;  %v8144_v0 = vld [vmem:[#allocation6 + $0x704] ss:$8 sps:$4 sm:$0xff]  }
 0x1e2   :  { %6015 = vmatprep.subr.bf16.mxu0 %v8062_v23  ;;  %v8148_v22 = vld [vmem:[#allocation6 + $0x1304] ss:$8 sps:$4 sm:$0xff]   ;;  %v9044_v23 = vrot.slane %v9021_v46, %v8926_v49  ;;  %v8149_v46 = vld [vmem:[#allocation6 + $0x710] ss:$8 sps:$4 sm:$0xff]  }
 0x1e4   :  { %5524 = vmatpush1.bf16.msra.mxu1 %v8057_v24  ;;  %v9048_v24 = vrot.slane %v9024_v7, %v8926_v49  ;;  %v8152_v7 = vld [vmem:[#allocation6 + $0x1310] ss:$8 sps:$4 sm:$0xff]  }
 0x1e5   :  { %6016 = vmatpush1.bf16.msra.mxu0 %v8060_v52  ;;  %5525 = vmatprep.subr.bf16.mxu1 %v8065_v27  ;;  %v8142_v52 = vld [vmem:[#allocation6 + $0x700] ss:$8 sps:$4 sm:$0xff]  }
 0x1e6   :  { %6017 = vmatprep.subr.bf16.mxu0 %v8068_v56  ;;  %v8146_v27 = vld [vmem:[#allocation6 + $0x1300] ss:$8 sps:$4 sm:$0xff]   ;;  %v8151_v56 = vld [vmem:[#allocation6 + $0x714] ss:$8 sps:$4 sm:$0xff]  }
 0x1e8   :  { %5526 = vmatpush1.bf16.msra.mxu1 %v8063_v28  ;;  %v8154_v28 = vld [vmem:[#allocation6 + $0x1314] ss:$8 sps:$4 sm:$0xff]  }
 0x1e9   :  { %6018 = vmatpush1.bf16.msra.mxu0 %v8066_v29  ;;  %5527 = vmatprep.subr.bf16.mxu1 %v8071_v30  ;;  %v1004_v29 = vcombine.high %v9035_v20, %v9035_v20  ;;  %v1151_v30 = vcombine.high %v9038_v21, %v9038_v21  ;;  %v8155_v20 = vld [vmem:[#allocation6 + $0x720] ss:$8 sps:$4 sm:$0xff]   ;;  %v8163_v21 = vld [vmem:[#allocation6 + $0x734] ss:$8 sps:$4 sm:$0xff]  }
 0x1ea   :  { %6019 = vmatprep.subr.bf16.mxu0 %v8074_v31  ;;  %v8157_v31 = vld [vmem:[#allocation6 + $0x724] ss:$8 sps:$4 sm:$0xff]  }
 0x1ec   :  { %5528 = vmatpush1.bf16.msra.mxu1 %v8069_v32  ;;  %v8160_v32 = vld [vmem:[#allocation6 + $0x1324] ss:$8 sps:$4 sm:$0xff]  }
 0x1ed   :  { %6020 = vmatpush1.bf16.msra.mxu0 %v8072_v33  ;;  %5529 = vmatprep.subr.bf16.mxu1 %v8077_v34  ;;  %v8158_v33 = vld [vmem:[#allocation6 + $0x1320] ss:$8 sps:$4 sm:$0xff]   ;;  %v8166_v34 = vld [vmem:[#allocation6 + $0x1334] ss:$8 sps:$4 sm:$0xff]  }
 0x1ee   :  { %6021 = vmatprep.subr.bf16.mxu0 %v8080_v35  ;;  %v8161_v35 = vld [vmem:[#allocation6 + $0x730] ss:$8 sps:$4 sm:$0xff]  }
 0x1f0   :  { %5530 = vmatpush1.bf16.msra.mxu1 %v8075_v36  ;;  %v8164_v36 = vld [vmem:[#allocation6 + $0x1330] ss:$8 sps:$4 sm:$0xff]  }
 0x1f1   :  { %6022 = vmatpush1.bf16.msra.mxu0 %v8078_v16  ;;  %5531 = vmatprep.subr.bf16.mxu1 %v8083_v17  ;;  %v8169_v16 = vld [vmem:[#allocation6 + $0x744] ss:$8 sps:$4 sm:$0xff]  }
 0x1f2   :  { %6023 = vmatprep.subr.bf16.mxu0 %v8086_v40  ;;  %v8172_v17 = vld [vmem:[#allocation6 + $0x1344] ss:$8 sps:$4 sm:$0xff]   ;;  %v8167_v40 = vld [vmem:[#allocation6 + $0x740] ss:$8 sps:$4 sm:$0xff]  }
 0x1f4   :  { %5532 = vmatpush1.bf16.msra.mxu1 %v8081_v44  ;;  %v8170_v44 = vld [vmem:[#allocation6 + $0x1340] ss:$8 sps:$4 sm:$0xff]  }
 0x1f5   :  { %6024 = vmatpush1.bf16.msra.mxu0 %v8084_v47  ;;  %5533 = vmatprep.subr.bf16.mxu1 %v8089_v48  ;;  %v8175_v47 = vld [vmem:[#allocation6 + $0x754] ss:$8 sps:$4 sm:$0xff]  }
 0x1f6   :  { %6025 = vmatprep.subr.bf16.mxu0 %v8092_v50  ;;  %v8178_v48 = vld [vmem:[#allocation6 + $0x1354] ss:$8 sps:$4 sm:$0xff]   ;;  %v8173_v50 = vld [vmem:[#allocation6 + $0x750] ss:$8 sps:$4 sm:$0xff]  }
 0x1f8   :  { %5534 = vmatpush1.bf16.msra.mxu1 %v8087_v25  ;;  %v8176_v25 = vld [vmem:[#allocation6 + $0x1350] ss:$8 sps:$4 sm:$0xff]  }
 0x1f9   :  { %6026 = vmatpush1.bf16.msra.mxu0 %v8090_v26  ;;  %5535 = vmatprep.subr.bf16.mxu1 %v8095_v51  ;;  %v8181_v26 = vld [vmem:[#allocation6 + $0x764] ss:$8 sps:$4 sm:$0xff]  }
 0x1fa   :  { %6027 = vmatprep.subr.bf16.mxu0 %v8098_v53  ;;  %v8184_v51 = vld [vmem:[#allocation6 + $0x1364] ss:$8 sps:$4 sm:$0xff]   ;;  %v8179_v53 = vld [vmem:[#allocation6 + $0x760] ss:$8 sps:$4 sm:$0xff]  }
 0x1fc   :  { %5536 = vmatpush1.bf16.msra.mxu1 %v8093_v37  ;;  %v8182_v37 = vld [vmem:[#allocation6 + $0x1360] ss:$8 sps:$4 sm:$0xff]  }
 0x1fd   :  { %6028 = vmatpush1.bf16.msra.mxu0 %v8096_v54  ;;  %5537 = vmatprep.subr.bf16.mxu1 %v8101_v39  ;;  %v8187_v54 = vld [vmem:[#allocation6 + $0x774] ss:$8 sps:$4 sm:$0xff]  }
 0x1fe   :  { %6029 = vmatprep.subr.bf16.mxu0 %v8104_v55  ;;  %v8190_v39 = vld [vmem:[#allocation6 + $0x1374] ss:$8 sps:$4 sm:$0xff]   ;;  %v8185_v55 = vld [vmem:[#allocation6 + $0x770] ss:$8 sps:$4 sm:$0xff]  }
 0x200   :  { %5538 = vmatpush1.bf16.msra.mxu1 %v8099_v57  ;;  %v8188_v57 = vld [vmem:[#allocation6 + $0x1370] ss:$8 sps:$4 sm:$0xff]  }
 0x201   :  { %6030 = vmatpush1.bf16.msra.mxu0 %v8102_v58  ;;  %5539 = vmatprep.subr.bf16.mxu1 %v8107_v59  ;;  %v8193_v58 = vld [vmem:[#allocation6 + $0x784] ss:$8 sps:$4 sm:$0xff]  }
 0x202   :  { %6031 = vmatprep.subr.bf16.mxu0 %v8110_v62  ;;  %v8196_v59 = vld [vmem:[#allocation6 + $0x1384] ss:$8 sps:$4 sm:$0xff]   ;;  %v8191_v62 = vld [vmem:[#allocation6 + $0x780] ss:$8 sps:$4 sm:$0xff]  }
 0x204   :  { %5540 = vmatpush1.bf16.msra.mxu1 %v8105_v63  ;;  %v8194_v63 = vld [vmem:[#allocation6 + $0x1380] ss:$8 sps:$4 sm:$0xff]  }
 0x205   :  { %6032 = vmatpush1.bf16.msra.mxu0 %v8108_v41  ;;  %5541 = vmatprep.subr.bf16.mxu1 %v8113_v1  ;;  %v8199_v41 = vld [vmem:[#allocation6 + $0x794] ss:$8 sps:$4 sm:$0xff]  }
 0x206   :  { %6033 = vmatprep.subr.bf16.mxu0 %v8116_v2  ;;  %v8202_v1 = vld [vmem:[#allocation6 + $0x1394] ss:$8 sps:$4 sm:$0xff]   ;;  %v8197_v2 = vld [vmem:[#allocation6 + $0x790] ss:$8 sps:$4 sm:$0xff]  }
 0x208   :  { %5542 = vmatpush1.bf16.msra.mxu1 %v8111_v3  ;;  %v8200_v3 = vld [vmem:[#allocation6 + $0x1390] ss:$8 sps:$4 sm:$0xff]  }
 0x209   :  { %6034 = vmatpush1.bf16.msra.mxu0 %v8114_v4  ;;  %5543 = vmatprep.subr.bf16.mxu1 %v8119_v5  ;;  %v8205_v4 = vld [vmem:[#allocation6 + $0x7a4] ss:$8 sps:$4 sm:$0xff]  }
 0x20a   :  { %6035 = vmatprep.subr.bf16.mxu0 %v8122_v6  ;;  %v8208_v5 = vld [vmem:[#allocation6 + $0x13a4] ss:$8 sps:$4 sm:$0xff]   ;;  %v8203_v6 = vld [vmem:[#allocation6 + $0x7a0] ss:$8 sps:$4 sm:$0xff]  }
 0x20c   :  { %5544 = vmatpush1.bf16.msra.mxu1 %v8117_v45  ;;  %v8206_v45 = vld [vmem:[#allocation6 + $0x13a0] ss:$8 sps:$4 sm:$0xff]  }
 0x20d   :  { %6036 = vmatpush1.bf16.msra.mxu0 %v8120_v8  ;;  %5545 = vmatprep.subr.bf16.mxu1 %v8125_v60  ;;  %v8211_v8 = vld [vmem:[#allocation6 + $0x7b4] ss:$8 sps:$4 sm:$0xff]  }
 0x20e   :  { %6037 = vmatprep.subr.bf16.mxu0 %v8128_v9  ;;  %v8214_v60 = vld [vmem:[#allocation6 + $0x13b4] ss:$8 sps:$4 sm:$0xff]   ;;  %v8209_v9 = vld [vmem:[#allocation6 + $0x7b0] ss:$8 sps:$4 sm:$0xff]  }
 0x210   :  { %5546 = vmatpush1.bf16.msra.mxu1 %v8123_v61  ;;  %v8212_v61 = vld [vmem:[#allocation6 + $0x13b0] ss:$8 sps:$4 sm:$0xff]  }
 0x211   :  { %6038 = vmatpush1.bf16.msra.mxu0 %v8126_v10  ;;  %5547 = vmatprep.subr.bf16.mxu1 %v8131_v11  ;;  %v8217_v10 = vld [vmem:[#allocation6 + $0x7c4] ss:$8 sps:$4 sm:$0xff]  }
 0x212   :  { %6039 = vmatprep.subr.bf16.mxu0 %v8134_v12  ;;  %v8220_v11 = vld [vmem:[#allocation6 + $0x13c4] ss:$8 sps:$4 sm:$0xff]   ;;  %v8215_v12 = vld [vmem:[#allocation6 + $0x7c0] ss:$8 sps:$4 sm:$0xff]  }
 0x214   :  { %5548 = vmatpush1.bf16.msra.mxu1 %v8129_v13  ;;  %v8218_v13 = vld [vmem:[#allocation6 + $0x13c0] ss:$8 sps:$4 sm:$0xff]  }
 0x215   :  { %6040 = vmatpush1.bf16.msra.mxu0 %v8132_v14  ;;  %5549 = vmatprep.subr.bf16.mxu1 %v8137_v15  ;;  %v8223_v14 = vld [vmem:[#allocation6 + $0x7d4] ss:$8 sps:$4 sm:$0xff]  }
 0x216   :  { %6041 = vmatprep.subr.bf16.mxu0 %v8140_v18  ;;  %v8226_v15 = vld [vmem:[#allocation6 + $0x13d4] ss:$8 sps:$4 sm:$0xff]   ;;  %v8221_v18 = vld [vmem:[#allocation6 + $0x7d0] ss:$8 sps:$4 sm:$0xff]  }
 0x218   :  { %5550 = vmatpush1.bf16.msra.mxu1 %v8135_v19  ;;  %v8224_v19 = vld [vmem:[#allocation6 + $0x13d0] ss:$8 sps:$4 sm:$0xff]  }
 0x219   :  { %6042 = vmatpush1.bf16.msra.mxu0 %v8138_v42  ;;  %5560 = vmatprep.subr.bf16.mxu1 %v8144_v0  ;;  %v8229_v42 = vld [vmem:[#allocation6 + $0x7e4] ss:$8 sps:$4 sm:$0xff]  }
 0x21a   :  { %6052 = vmatprep.subr.bf16.mxu0 %v8148_v22  ;;  %v8232_v0 = vld [vmem:[#allocation6 + $0x13e4] ss:$8 sps:$4 sm:$0xff]  }
 0x21b   :  { %5552 = vmatmul.mubr.bf16.vlgmr.msra.gmra.mrb[0].mxu1 %v9044_v23  ;;  %v9056_v22 = vld [vmem:[#allocation3 + $0x10] sm:$0xff] }
 0x21c   :  { %6044 = vmatmul.mubr.bf16.vlgmr.msra.gmra.mrb[0].mxu0 %v9048_v24  ;;  %5561 = vmatpush1.bf16.msra.mxu1 %v8142_v52  ;;  %v9058_v52 = vld [vmem:[#allocation3 + $0x28] sm:$0xff] }
 0x21d   :  { %6053 = vmatpush1.bf16.msra.mxu0 %v8146_v27  ;;  %5562 = vmatprep.subr.bf16.mxu1 %v8151_v56  ;;  %v8227_v27 = vld [vmem:[#allocation6 + $0x7e0] ss:$8 sps:$4 sm:$0xff]  }
 0x21e   :  { %6054 = vmatprep.subr.bf16.mxu0 %v8154_v28  ;;  %5592 = vmatprep.mubr.bf16.mxu1 %v1004_v29  ;;  %v8230_v56 = vld [vmem:[#allocation6 + $0x13e0] ss:$8 sps:$4 sm:$0xff]   ;;  %v8235_v28 = vld [vmem:[#allocation6 + $0x7f4] ss:$8 sps:$4 sm:$0xff]  }
 0x21f   :  { %6084 = vmatprep.mubr.bf16.mxu0 %v1151_v30  ;;  %v8238_v29 = vld [vmem:[#allocation6 + $0x13f4] ss:$8 sps:$4 sm:$0xff]   ;;  %v9062_v30 = vrot.slane %v9056_v22, %v8926_v49 }
 0x220   :  { %5563 = vmatpush1.bf16.msra.mxu1 %v8149_v46  ;;  %v9066_v46 = vrot.slane %v9058_v52, %v8926_v49 }
 0x221   :  { %6055 = vmatpush1.bf16.msra.mxu0 %v8152_v7  ;;  %5564 = vmatprep.subr.bf16.mxu1 %v8157_v31  ;;  %v8233_v7 = vld [vmem:[#allocation6 + $0x7f0] ss:$8 sps:$4 sm:$0xff]  }
 0x222   :  { %6056 = vmatprep.subr.bf16.mxu0 %v8160_v32  ;;  %v8236_v31 = vld [vmem:[#allocation6 + $0x13f0] ss:$8 sps:$4 sm:$0xff]   ;;  %v8241_v32 = vld [vmem:[#allocation6 + $0x804] ss:$8 sps:$4 sm:$0xff]  }
 0x224   :  { %5565 = vmatpush1.bf16.msra.mxu1 %v8155_v20  ;;  %v8244_v20 = vld [vmem:[#allocation6 + $0x1404] ss:$8 sps:$4 sm:$0xff]  }
 0x225   :  { %6057 = vmatpush1.bf16.msra.mxu0 %v8158_v33  ;;  %5566 = vmatprep.subr.bf16.mxu1 %v8163_v21  ;;  %v1020_v33 = vcombine.high %v9062_v30, %v9062_v30  ;;  %v1167_v21 = vcombine.high %v9066_v46, %v9066_v46 }
 0x226   :  { %6058 = vmatprep.subr.bf16.mxu0 %v8166_v34  ;;  %v1002_v34 = vcombine.high %v9044_v23, %v9044_v23  ;;  %v8245_v23 = vld [vmem:[#allocation6 + $0x810] ss:$8 sps:$4 sm:$0xff]  }
 0x228   :  { %5567 = vmatpush1.bf16.msra.mxu1 %v8161_v35  ;;  %v1149_v35 = vcombine.high %v9048_v24, %v9048_v24  ;;  %v8248_v24 = vld [vmem:[#allocation6 + $0x1410] ss:$8 sps:$4 sm:$0xff]  }
 0x229   :  { %6059 = vmatpush1.bf16.msra.mxu0 %v8164_v36  ;;  %5568 = vmatprep.subr.bf16.mxu1 %v8169_v16  ;;  %v8239_v36 = vld [vmem:[#allocation6 + $0x800] ss:$8 sps:$4 sm:$0xff]  }
 0x22a   :  { %6060 = vmatprep.subr.bf16.mxu0 %v8172_v17  ;;  %v8242_v16 = vld [vmem:[#allocation6 + $0x1400] ss:$8 sps:$4 sm:$0xff]   ;;  %v8247_v17 = vld [vmem:[#allocation6 + $0x814] ss:$8 sps:$4 sm:$0xff]  }
 0x22c   :  { %5569 = vmatpush1.bf16.msra.mxu1 %v8167_v40  ;;  %v8250_v40 = vld [vmem:[#allocation6 + $0x1414] ss:$8 sps:$4 sm:$0xff]  }
 0x22d   :  { %6061 = vmatpush1.bf16.msra.mxu0 %v8170_v44  ;;  %5570 = vmatprep.subr.bf16.mxu1 %v8175_v47  ;;  %v9077_v44 = vrot.slane %v1020_v33, %v8926_v49  ;;  %v9080_v47 = vrot.slane %v1167_v21, %v8926_v49  ;;  %v8322_v33 = vld [vmem:[#allocation6 + $0x14d4] ss:$8 sps:$4 sm:$0xff]   ;;  %v8317_v21 = vld [vmem:[#allocation6 + $0x8d0] ss:$8 sps:$4 sm:$0xff]  }
 0x22e   :  { %6062 = vmatprep.subr.bf16.mxu0 %v8178_v48  ;;  %v8253_v48 = vld [vmem:[#allocation6 + $0x824] ss:$8 sps:$4 sm:$0xff]  }
 0x230   :  { %5571 = vmatpush1.bf16.msra.mxu1 %v8173_v50  ;;  %v8256_v50 = vld [vmem:[#allocation6 + $0x1424] ss:$8 sps:$4 sm:$0xff]  }
 0x231   :  { %6063 = vmatpush1.bf16.msra.mxu0 %v8176_v25  ;;  %5572 = vmatprep.subr.bf16.mxu1 %v8181_v26  ;;  %v8251_v25 = vld [vmem:[#allocation6 + $0x820] ss:$8 sps:$4 sm:$0xff]  }
 0x232   :  { %6064 = vmatprep.subr.bf16.mxu0 %v8184_v51  ;;  %v8254_v26 = vld [vmem:[#allocation6 + $0x1420] ss:$8 sps:$4 sm:$0xff]   ;;  %v8259_v51 = vld [vmem:[#allocation6 + $0x834] ss:$8 sps:$4 sm:$0xff]  }
 0x234   :  { %5573 = vmatpush1.bf16.msra.mxu1 %v8179_v53  ;;  %v8262_v53 = vld [vmem:[#allocation6 + $0x1434] ss:$8 sps:$4 sm:$0xff]  }
 0x235   :  { %6065 = vmatpush1.bf16.msra.mxu0 %v8182_v37  ;;  %5574 = vmatprep.subr.bf16.mxu1 %v8187_v54  ;;  %v8257_v37 = vld [vmem:[#allocation6 + $0x830] ss:$8 sps:$4 sm:$0xff]  }
 0x236   :  { %6066 = vmatprep.subr.bf16.mxu0 %v8190_v39  ;;  %v8260_v54 = vld [vmem:[#allocation6 + $0x1430] ss:$8 sps:$4 sm:$0xff]   ;;  %v8265_v39 = vld [vmem:[#allocation6 + $0x844] ss:$8 sps:$4 sm:$0xff]  }
 0x238   :  { %5575 = vmatpush1.bf16.msra.mxu1 %v8185_v55  ;;  %v8268_v55 = vld [vmem:[#allocation6 + $0x1444] ss:$8 sps:$4 sm:$0xff]  }
 0x239   :  { %6067 = vmatpush1.bf16.msra.mxu0 %v8188_v57  ;;  %5576 = vmatprep.subr.bf16.mxu1 %v8193_v58  ;;  %v8263_v57 = vld [vmem:[#allocation6 + $0x840] ss:$8 sps:$4 sm:$0xff]  }
 0x23a   :  { %6068 = vmatprep.subr.bf16.mxu0 %v8196_v59  ;;  %v8266_v58 = vld [vmem:[#allocation6 + $0x1440] ss:$8 sps:$4 sm:$0xff]   ;;  %v8271_v59 = vld [vmem:[#allocation6 + $0x854] ss:$8 sps:$4 sm:$0xff]  }
 0x23c   :  { %5577 = vmatpush1.bf16.msra.mxu1 %v8191_v62  ;;  %v8274_v62 = vld [vmem:[#allocation6 + $0x1454] ss:$8 sps:$4 sm:$0xff]  }
 0x23d   :  { %6069 = vmatpush1.bf16.msra.mxu0 %v8194_v63  ;;  %5578 = vmatprep.subr.bf16.mxu1 %v8199_v41  ;;  %v8269_v63 = vld [vmem:[#allocation6 + $0x850] ss:$8 sps:$4 sm:$0xff]  }
 0x23e   :  { %6070 = vmatprep.subr.bf16.mxu0 %v8202_v1  ;;  %v8272_v41 = vld [vmem:[#allocation6 + $0x1450] ss:$8 sps:$4 sm:$0xff]   ;;  %v8277_v1 = vld [vmem:[#allocation6 + $0x864] ss:$8 sps:$4 sm:$0xff]  }
 0x240   :  { %5579 = vmatpush1.bf16.msra.mxu1 %v8197_v2  ;;  %v8280_v2 = vld [vmem:[#allocation6 + $0x1464] ss:$8 sps:$4 sm:$0xff]  }
 0x241   :  { %6071 = vmatpush1.bf16.msra.mxu0 %v8200_v3  ;;  %5580 = vmatprep.subr.bf16.mxu1 %v8205_v4  ;;  %v8275_v3 = vld [vmem:[#allocation6 + $0x860] ss:$8 sps:$4 sm:$0xff]  }
 0x242   :  { %6072 = vmatprep.subr.bf16.mxu0 %v8208_v5  ;;  %v8278_v4 = vld [vmem:[#allocation6 + $0x1460] ss:$8 sps:$4 sm:$0xff]   ;;  %v8283_v5 = vld [vmem:[#allocation6 + $0x874] ss:$8 sps:$4 sm:$0xff]  }
 0x244   :  { %5581 = vmatpush1.bf16.msra.mxu1 %v8203_v6  ;;  %v8286_v6 = vld [vmem:[#allocation6 + $0x1474] ss:$8 sps:$4 sm:$0xff]  }
 0x245   :  { %6073 = vmatpush1.bf16.msra.mxu0 %v8206_v45  ;;  %5582 = vmatprep.subr.bf16.mxu1 %v8211_v8  ;;  %v8281_v45 = vld [vmem:[#allocation6 + $0x870] ss:$8 sps:$4 sm:$0xff]  }
 0x246   :  { %6074 = vmatprep.subr.bf16.mxu0 %v8214_v60  ;;  %v8284_v8 = vld [vmem:[#allocation6 + $0x1470] ss:$8 sps:$4 sm:$0xff]   ;;  %v8289_v60 = vld [vmem:[#allocation6 + $0x884] ss:$8 sps:$4 sm:$0xff]  }
 0x248   :  { %5583 = vmatpush1.bf16.msra.mxu1 %v8209_v9  ;;  %v8292_v9 = vld [vmem:[#allocation6 + $0x1484] ss:$8 sps:$4 sm:$0xff]  }
 0x249   :  { %6075 = vmatpush1.bf16.msra.mxu0 %v8212_v61  ;;  %5584 = vmatprep.subr.bf16.mxu1 %v8217_v10  ;;  %v8287_v61 = vld [vmem:[#allocation6 + $0x880] ss:$8 sps:$4 sm:$0xff]  }
 0x24a   :  { %6076 = vmatprep.subr.bf16.mxu0 %v8220_v11  ;;  %v8290_v10 = vld [vmem:[#allocation6 + $0x1480] ss:$8 sps:$4 sm:$0xff]   ;;  %v8295_v11 = vld [vmem:[#allocation6 + $0x894] ss:$8 sps:$4 sm:$0xff]  }
 0x24c   :  { %5585 = vmatpush1.bf16.msra.mxu1 %v8215_v12  ;;  %v8298_v12 = vld [vmem:[#allocation6 + $0x1494] ss:$8 sps:$4 sm:$0xff]  }
 0x24d   :  { %6077 = vmatpush1.bf16.msra.mxu0 %v8218_v13  ;;  %5586 = vmatprep.subr.bf16.mxu1 %v8223_v14  ;;  %v8293_v13 = vld [vmem:[#allocation6 + $0x890] ss:$8 sps:$4 sm:$0xff]  }
 0x24e   :  { %6078 = vmatprep.subr.bf16.mxu0 %v8226_v15  ;;  %v8296_v14 = vld [vmem:[#allocation6 + $0x1490] ss:$8 sps:$4 sm:$0xff]   ;;  %v8301_v15 = vld [vmem:[#allocation6 + $0x8a4] ss:$8 sps:$4 sm:$0xff]  }
 0x250   :  { %5587 = vmatpush1.bf16.msra.mxu1 %v8221_v18  ;;  %v8304_v18 = vld [vmem:[#allocation6 + $0x14a4] ss:$8 sps:$4 sm:$0xff]  }
 0x251   :  { %6079 = vmatpush1.bf16.msra.mxu0 %v8224_v19  ;;  %5588 = vmatprep.subr.bf16.mxu1 %v8229_v42  ;;  %v8299_v19 = vld [vmem:[#allocation6 + $0x8a0] ss:$8 sps:$4 sm:$0xff]  }
 0x252   :  { %6080 = vmatprep.subr.bf16.mxu0 %v8232_v0  ;;  %v8302_v42 = vld [vmem:[#allocation6 + $0x14a0] ss:$8 sps:$4 sm:$0xff]   ;;  %v8307_v0 = vld [vmem:[#allocation6 + $0x8b4] ss:$8 sps:$4 sm:$0xff]  }
 0x254   :  { %5589 = vmatpush1.bf16.msra.mxu1 %v8227_v27  ;;  %v8310_v27 = vld [vmem:[#allocation6 + $0x14b4] ss:$8 sps:$4 sm:$0xff]  }
 0x255   :  { %6081 = vmatpush1.bf16.msra.mxu0 %v8230_v56  ;;  %5590 = vmatprep.subr.bf16.mxu1 %v8235_v28  ;;  %v8305_v56 = vld [vmem:[#allocation6 + $0x8b0] ss:$8 sps:$4 sm:$0xff]  }
 0x256   :  { %6082 = vmatprep.subr.bf16.mxu0 %v8238_v29  ;;  %v8308_v28 = vld [vmem:[#allocation6 + $0x14b0] ss:$8 sps:$4 sm:$0xff]   ;;  %v8313_v29 = vld [vmem:[#allocation6 + $0x8c4] ss:$8 sps:$4 sm:$0xff]  }
 0x258   :  { %5591 = vmatpush1.bf16.msra.mxu1 %v8233_v7  ;;  %v8316_v7 = vld [vmem:[#allocation6 + $0x14c4] ss:$8 sps:$4 sm:$0xff]  }
 0x259   :  { %6083 = vmatpush1.bf16.msra.mxu0 %v8236_v31  ;;  %5601 = vmatprep.subr.bf16.mxu1 %v8241_v32  ;;  %v8311_v31 = vld [vmem:[#allocation6 + $0x8c0] ss:$8 sps:$4 sm:$0xff]  }
 0x25a   :  { %6093 = vmatprep.subr.bf16.mxu0 %v8244_v20  ;;  %v8314_v32 = vld [vmem:[#allocation6 + $0x14c0] ss:$8 sps:$4 sm:$0xff]   ;;  %v8319_v20 = vld [vmem:[#allocation6 + $0x8d4] ss:$8 sps:$4 sm:$0xff]  }
 0x25b   :  { %5593 = vmatmul.mubr.bf16.vlgmr.msra.gmra.mrb[0].mxu1 %v1002_v34  ;;  %v8320_v34 = vld [vmem:[#allocation6 + $0x14d0] ss:$8 sps:$4 sm:$0xff]  }
 0x25c   :  { %6085 = vmatmul.mubr.bf16.vlgmr.msra.gmra.mrb[0].mxu0 %v1149_v35  ;;  %5602 = vmatpush1.bf16.msra.mxu1 %v8239_v36  ;;  %v8325_v35 = vld [vmem:[#allocation6 + $0x8e4] ss:$8 sps:$4 sm:$0xff]  }
 0x25d   :  { %6094 = vmatpush1.bf16.msra.mxu0 %v8242_v16  ;;  %5603 = vmatprep.subr.bf16.mxu1 %v8247_v17  ;;  %v8328_v36 = vld [vmem:[#allocation6 + $0x14e4] ss:$8 sps:$4 sm:$0xff]   ;;  %v8323_v16 = vld [vmem:[#allocation6 + $0x8e0] ss:$8 sps:$4 sm:$0xff]  }
 0x25e   :  { %6095 = vmatprep.subr.bf16.mxu0 %v8250_v40  ;;  %5633 = vmatprep.mubr.bf16.mxu1 %v9077_v44  ;;  %v8326_v17 = vld [vmem:[#allocation6 + $0x14e0] ss:$8 sps:$4 sm:$0xff]   ;;  %v8331_v40 = vld [vmem:[#allocation6 + $0x8f4] ss:$8 sps:$4 sm:$0xff]  }
 0x25f   :  { %6125 = vmatprep.mubr.bf16.mxu0 %v9080_v47 }
 0x260   :  { %5604 = vmatpush1.bf16.msra.mxu1 %v8245_v23  ;;  %v8334_v23 = vld [vmem:[#allocation6 + $0x14f4] ss:$8 sps:$4 sm:$0xff]  }
 0x261   :  { %6096 = vmatpush1.bf16.msra.mxu0 %v8248_v24  ;;  %5605 = vmatprep.subr.bf16.mxu1 %v8253_v48  ;;  %v8329_v24 = vld [vmem:[#allocation6 + $0x8f0] ss:$8 sps:$4 sm:$0xff]  }
 0x262   :  { %6097 = vmatprep.subr.bf16.mxu0 %v8256_v50  ;;  %v8332_v48 = vld [vmem:[#allocation6 + $0x14f0] ss:$8 sps:$4 sm:$0xff]   ;;  %v8337_v50 = vld [vmem:[#allocation6 + $0x904] ss:$8 sps:$4 sm:$0xff]  }
 0x264   :  { %5606 = vmatpush1.bf16.msra.mxu1 %v8251_v25  ;;  %v8340_v25 = vld [vmem:[#allocation6 + $0x1504] ss:$8 sps:$4 sm:$0xff]  }
 0x265   :  { %6098 = vmatpush1.bf16.msra.mxu0 %v8254_v26  ;;  %5607 = vmatprep.subr.bf16.mxu1 %v8259_v51  ;;  %v9086_v26 = vrot.slane %v9062_v30, %v8926_v49  ;;  %v9090_v51 = vrot.slane %v9066_v46, %v8926_v49  ;;  %v8341_v30 = vld [vmem:[#allocation6 + $0x910] ss:$8 sps:$4 sm:$0xff]  }
 0x266   :  { %6099 = vmatprep.subr.bf16.mxu0 %v8262_v53  ;;  %v8335_v53 = vld [vmem:[#allocation6 + $0x900] ss:$8 sps:$4 sm:$0xff]   ;;  %v8344_v46 = vld [vmem:[#allocation6 + $0x1510] ss:$8 sps:$4 sm:$0xff]  }
 0x268   :  { %5608 = vmatpush1.bf16.msra.mxu1 %v8257_v37  ;;  %v8338_v37 = vld [vmem:[#allocation6 + $0x1500] ss:$8 sps:$4 sm:$0xff]  }
 0x269   :  { %6100 = vmatpush1.bf16.msra.mxu0 %v8260_v54  ;;  %5609 = vmatprep.subr.bf16.mxu1 %v8265_v39  ;;  %v8343_v54 = vld [vmem:[#allocation6 + $0x914] ss:$8 sps:$4 sm:$0xff]  }
 0x26a   :  { %6101 = vmatprep.subr.bf16.mxu0 %v8268_v55  ;;  %v8346_v39 = vld [vmem:[#allocation6 + $0x1514] ss:$8 sps:$4 sm:$0xff]   ;;  %v1052_v55 = vcombine.high %v9077_v44, %v9077_v44  ;;  %v8347_v44 = vld [vmem:[#allocation6 + $0x920] ss:$8 sps:$4 sm:$0xff]  }
 0x26c   :  { %5610 = vmatpush1.bf16.msra.mxu1 %v8263_v57  ;;  %v1199_v57 = vcombine.high %v9080_v47, %v9080_v47  ;;  %v8355_v47 = vld [vmem:[#allocation6 + $0x934] ss:$8 sps:$4 sm:$0xff]  }
 0x26d   :  { %6102 = vmatpush1.bf16.msra.mxu0 %v8266_v58  ;;  %5611 = vmatprep.subr.bf16.mxu1 %v8271_v59  ;;  %v8349_v58 = vld [vmem:[#allocation6 + $0x924] ss:$8 sps:$4 sm:$0xff]  }
 0x26e   :  { %6103 = vmatprep.subr.bf16.mxu0 %v8274_v62  ;;  %v8352_v59 = vld [vmem:[#allocation6 + $0x1524] ss:$8 sps:$4 sm:$0xff]   ;;  %v8350_v62 = vld [vmem:[#allocation6 + $0x1520] ss:$8 sps:$4 sm:$0xff]  }
 0x270   :  { %5612 = vmatpush1.bf16.msra.mxu1 %v8269_v63  ;;  %v8358_v63 = vld [vmem:[#allocation6 + $0x1534] ss:$8 sps:$4 sm:$0xff]  }
 0x271   :  { %6104 = vmatpush1.bf16.msra.mxu0 %v8272_v41  ;;  %5613 = vmatprep.subr.bf16.mxu1 %v8277_v1  ;;  %v8353_v41 = vld [vmem:[#allocation6 + $0x930] ss:$8 sps:$4 sm:$0xff]  }
 0x272   :  { %6105 = vmatprep.subr.bf16.mxu0 %v8280_v2  ;;  %v8356_v1 = vld [vmem:[#allocation6 + $0x1530] ss:$8 sps:$4 sm:$0xff]   ;;  %v8361_v2 = vld [vmem:[#allocation6 + $0x944] ss:$8 sps:$4 sm:$0xff]  }
 0x274   :  { %5614 = vmatpush1.bf16.msra.mxu1 %v8275_v3  ;;  %v8364_v3 = vld [vmem:[#allocation6 + $0x1544] ss:$8 sps:$4 sm:$0xff]  }
 0x275   :  { %6106 = vmatpush1.bf16.msra.mxu0 %v8278_v4  ;;  %5615 = vmatprep.subr.bf16.mxu1 %v8283_v5  ;;  %v8359_v4 = vld [vmem:[#allocation6 + $0x940] ss:$8 sps:$4 sm:$0xff]  }
 0x276   :  { %6107 = vmatprep.subr.bf16.mxu0 %v8286_v6  ;;  %v8362_v5 = vld [vmem:[#allocation6 + $0x1540] ss:$8 sps:$4 sm:$0xff]   ;;  %v8367_v6 = vld [vmem:[#allocation6 + $0x954] ss:$8 sps:$4 sm:$0xff]  }
 0x278   :  { %5616 = vmatpush1.bf16.msra.mxu1 %v8281_v45  ;;  %v8370_v45 = vld [vmem:[#allocation6 + $0x1554] ss:$8 sps:$4 sm:$0xff]  }
 0x279   :  { %6108 = vmatpush1.bf16.msra.mxu0 %v8284_v8  ;;  %5617 = vmatprep.subr.bf16.mxu1 %v8289_v60  ;;  %v8365_v8 = vld [vmem:[#allocation6 + $0x950] ss:$8 sps:$4 sm:$0xff]  }
 0x27a   :  { %6109 = vmatprep.subr.bf16.mxu0 %v8292_v9  ;;  %v8368_v60 = vld [vmem:[#allocation6 + $0x1550] ss:$8 sps:$4 sm:$0xff]   ;;  %v8373_v9 = vld [vmem:[#allocation6 + $0x964] ss:$8 sps:$4 sm:$0xff]  }
 0x27c   :  { %5618 = vmatpush1.bf16.msra.mxu1 %v8287_v61  ;;  %v8376_v61 = vld [vmem:[#allocation6 + $0x1564] ss:$8 sps:$4 sm:$0xff]  }
 0x27d   :  { %6110 = vmatpush1.bf16.msra.mxu0 %v8290_v10  ;;  %5619 = vmatprep.subr.bf16.mxu1 %v8295_v11  ;;  %v8371_v10 = vld [vmem:[#allocation6 + $0x960] ss:$8 sps:$4 sm:$0xff]  }
 0x27e   :  { %6111 = vmatprep.subr.bf16.mxu0 %v8298_v12  ;;  %v8374_v11 = vld [vmem:[#allocation6 + $0x1560] ss:$8 sps:$4 sm:$0xff]   ;;  %v8379_v12 = vld [vmem:[#allocation6 + $0x974] ss:$8 sps:$4 sm:$0xff]  }
 0x280   :  { %5620 = vmatpush1.bf16.msra.mxu1 %v8293_v13  ;;  %v8382_v13 = vld [vmem:[#allocation6 + $0x1574] ss:$8 sps:$4 sm:$0xff]  }
 0x281   :  { %6112 = vmatpush1.bf16.msra.mxu0 %v8296_v14  ;;  %5621 = vmatprep.subr.bf16.mxu1 %v8301_v15  ;;  %v8377_v14 = vld [vmem:[#allocation6 + $0x970] ss:$8 sps:$4 sm:$0xff]  }
 0x282   :  { %6113 = vmatprep.subr.bf16.mxu0 %v8304_v18  ;;  %v8380_v15 = vld [vmem:[#allocation6 + $0x1570] ss:$8 sps:$4 sm:$0xff]   ;;  %v8385_v18 = vld [vmem:[#allocation6 + $0x984] ss:$8 sps:$4 sm:$0xff]  }
 0x284   :  { %5622 = vmatpush1.bf16.msra.mxu1 %v8299_v19  ;;  %v8388_v19 = vld [vmem:[#allocation6 + $0x1584] ss:$8 sps:$4 sm:$0xff]  }
 0x285   :  { %6114 = vmatpush1.bf16.msra.mxu0 %v8302_v42  ;;  %5623 = vmatprep.subr.bf16.mxu1 %v8307_v0  ;;  %v8383_v42 = vld [vmem:[#allocation6 + $0x980] ss:$8 sps:$4 sm:$0xff]  }
 0x286   :  { %6115 = vmatprep.subr.bf16.mxu0 %v8310_v27  ;;  %v8386_v0 = vld [vmem:[#allocation6 + $0x1580] ss:$8 sps:$4 sm:$0xff]   ;;  %v8391_v27 = vld [vmem:[#allocation6 + $0x994] ss:$8 sps:$4 sm:$0xff]  }
 0x288   :  { %5624 = vmatpush1.bf16.msra.mxu1 %v8305_v56  ;;  %v8394_v56 = vld [vmem:[#allocation6 + $0x1594] ss:$8 sps:$4 sm:$0xff]  }
 0x289   :  { %6116 = vmatpush1.bf16.msra.mxu0 %v8308_v28  ;;  %5625 = vmatprep.subr.bf16.mxu1 %v8313_v29  ;;  %v8389_v28 = vld [vmem:[#allocation6 + $0x990] ss:$8 sps:$4 sm:$0xff]  }
 0x28a   :  { %6117 = vmatprep.subr.bf16.mxu0 %v8316_v7  ;;  %v8392_v29 = vld [vmem:[#allocation6 + $0x1590] ss:$8 sps:$4 sm:$0xff]   ;;  %v8397_v7 = vld [vmem:[#allocation6 + $0x9a4] ss:$8 sps:$4 sm:$0xff]  }
 0x28c   :  { %5626 = vmatpush1.bf16.msra.mxu1 %v8311_v31  ;;  %v8400_v31 = vld [vmem:[#allocation6 + $0x15a4] ss:$8 sps:$4 sm:$0xff]  }
 0x28d   :  { %6118 = vmatpush1.bf16.msra.mxu0 %v8314_v32  ;;  %5627 = vmatprep.subr.bf16.mxu1 %v8319_v20  ;;  %v8395_v32 = vld [vmem:[#allocation6 + $0x9a0] ss:$8 sps:$4 sm:$0xff]  }
 0x28e   :  { %6119 = vmatprep.subr.bf16.mxu0 %v8322_v33  ;;  %v8398_v20 = vld [vmem:[#allocation6 + $0x15a0] ss:$8 sps:$4 sm:$0xff]   ;;  %v8403_v33 = vld [vmem:[#allocation6 + $0x9b4] ss:$8 sps:$4 sm:$0xff]  }
 0x290   :  { %5628 = vmatpush1.bf16.msra.mxu1 %v8317_v21  ;;  %v8406_v21 = vld [vmem:[#allocation6 + $0x15b4] ss:$8 sps:$4 sm:$0xff]  }
 0x291   :  { %6120 = vmatpush1.bf16.msra.mxu0 %v8320_v34  ;;  %5629 = vmatprep.subr.bf16.mxu1 %v8325_v35  ;;  %v8401_v34 = vld [vmem:[#allocation6 + $0x9b0] ss:$8 sps:$4 sm:$0xff]  }
 0x292   :  { %6121 = vmatprep.subr.bf16.mxu0 %v8328_v36  ;;  %v8404_v35 = vld [vmem:[#allocation6 + $0x15b0] ss:$8 sps:$4 sm:$0xff]   ;;  %v8409_v36 = vld [vmem:[#allocation6 + $0x9c4] ss:$8 sps:$4 sm:$0xff]  }
 0x294   :  { %5630 = vmatpush1.bf16.msra.mxu1 %v8323_v16  ;;  %v8412_v16 = vld [vmem:[#allocation6 + $0x15c4] ss:$8 sps:$4 sm:$0xff]  }
 0x295   :  { %6122 = vmatpush1.bf16.msra.mxu0 %v8326_v17  ;;  %5631 = vmatprep.subr.bf16.mxu1 %v8331_v40  ;;  %v8407_v17 = vld [vmem:[#allocation6 + $0x9c0] ss:$8 sps:$4 sm:$0xff]  }
 0x296   :  { %6123 = vmatprep.subr.bf16.mxu0 %v8334_v23  ;;  %v8410_v40 = vld [vmem:[#allocation6 + $0x15c0] ss:$8 sps:$4 sm:$0xff]   ;;  %v8415_v23 = vld [vmem:[#allocation6 + $0x9d4] ss:$8 sps:$4 sm:$0xff]  }
 0x298   :  { %5632 = vmatpush1.bf16.msra.mxu1 %v8329_v24  ;;  %v8418_v24 = vld [vmem:[#allocation6 + $0x15d4] ss:$8 sps:$4 sm:$0xff]  }
 0x299   :  { %6124 = vmatpush1.bf16.msra.mxu0 %v8332_v48  ;;  %5642 = vmatprep.subr.bf16.mxu1 %v8337_v50  ;;  %v8413_v48 = vld [vmem:[#allocation6 + $0x9d0] ss:$8 sps:$4 sm:$0xff]  }
 0x29a   :  { %6134 = vmatprep.subr.bf16.mxu0 %v8340_v25  ;;  %v8416_v50 = vld [vmem:[#allocation6 + $0x15d0] ss:$8 sps:$4 sm:$0xff]   ;;  %v8421_v25 = vld [vmem:[#allocation6 + $0x9e4] ss:$8 sps:$4 sm:$0xff]  }
 0x29b   :  { %5634 = vmatmul.mubr.bf16.vlgmr.msra.gmra.mrb[0].mxu1 %v9086_v26 }
 0x29c   :  { %6126 = vmatmul.mubr.bf16.vlgmr.msra.gmra.mrb[0].mxu0 %v9090_v51  ;;  %5643 = vmatpush1.bf16.msra.mxu1 %v8335_v53  ;;  %v8424_v53 = vld [vmem:[#allocation6 + $0x15e4] ss:$8 sps:$4 sm:$0xff]  }
 0x29d   :  { %6135 = vmatpush1.bf16.msra.mxu0 %v8338_v37  ;;  %5644 = vmatprep.subr.bf16.mxu1 %v8343_v54  ;;  %v1005_v37 = vcombine.high %v9056_v22, %v9056_v22  ;;  %v1152_v54 = vcombine.high %v9058_v52, %v9058_v52  ;;  %v8425_v22 = vld [vmem:[#allocation6 + $0x9f0] ss:$8 sps:$4 sm:$0xff]   ;;  %v8433_v52 = vld [vmem:[#allocation6 + $0xa04] ss:$8 sps:$4 sm:$0xff]  }
 0x29e   :  { %6136 = vmatprep.subr.bf16.mxu0 %v8346_v39  ;;  %5674 = vmatprep.mubr.bf16.mxu1 %v1052_v55  ;;  %v8419_v39 = vld [vmem:[#allocation6 + $0x9e0] ss:$8 sps:$4 sm:$0xff]  }
 0x29f   :  { %6166 = vmatprep.mubr.bf16.mxu0 %v1199_v57  ;;  %v8422_v55 = vld [vmem:[#allocation6 + $0x15e0] ss:$8 sps:$4 sm:$0xff]   ;;  %v8427_v57 = vld [vmem:[#allocation6 + $0x9f4] ss:$8 sps:$4 sm:$0xff]  }
 0x2a0   :  { %5645 = vmatpush1.bf16.msra.mxu1 %v8341_v30  ;;  %v8430_v30 = vld [vmem:[#allocation6 + $0x15f4] ss:$8 sps:$4 sm:$0xff]  }
 0x2a1   :  { %6137 = vmatpush1.bf16.msra.mxu0 %v8344_v46  ;;  %5646 = vmatprep.subr.bf16.mxu1 %v8349_v58  ;;  %v9103_v46 = vrot.slane %v1005_v37, %v8926_v49  ;;  %v9106_v58 = vrot.slane %v1152_v54, %v8926_v49  ;;  %v8502_v37 = vld [vmem:[#allocation6 + $0x16b4] ss:$8 sps:$4 sm:$0xff]   ;;  %v8497_v54 = vld [vmem:[#allocation6 + $0xab0] ss:$8 sps:$4 sm:$0xff]  }
 0x2a2   :  { %6138 = vmatprep.subr.bf16.mxu0 %v8352_v59  ;;  %v8428_v59 = vld [vmem:[#allocation6 + $0x15f0] ss:$8 sps:$4 sm:$0xff]  }
 0x2a4   :  { %5647 = vmatpush1.bf16.msra.mxu1 %v8347_v44  ;;  %v8436_v44 = vld [vmem:[#allocation6 + $0x1604] ss:$8 sps:$4 sm:$0xff]  }
 0x2a5   :  { %6139 = vmatpush1.bf16.msra.mxu0 %v8350_v62  ;;  %5648 = vmatprep.subr.bf16.mxu1 %v8355_v47  ;;  %v1021_v62 = vcombine.high %v9103_v46, %v9103_v46  ;;  %v1168_v47 = vcombine.high %v9106_v58, %v9106_v58 }
 0x2a6   :  { %6140 = vmatprep.subr.bf16.mxu0 %v8358_v63  ;;  %v1050_v63 = vcombine.high %v9086_v26, %v9086_v26  ;;  %v8437_v26 = vld [vmem:[#allocation6 + $0xa10] ss:$8 sps:$4 sm:$0xff]  }
 0x2a8   :  { %5649 = vmatpush1.bf16.msra.mxu1 %v8353_v41  ;;  %v1197_v41 = vcombine.high %v9090_v51, %v9090_v51  ;;  %v8440_v51 = vld [vmem:[#allocation6 + $0x1610] ss:$8 sps:$4 sm:$0xff]  }
 0x2a9   :  { %6141 = vmatpush1.bf16.msra.mxu0 %v8356_v1  ;;  %5650 = vmatprep.subr.bf16.mxu1 %v8361_v2  ;;  %v8431_v1 = vld [vmem:[#allocation6 + $0xa00] ss:$8 sps:$4 sm:$0xff]  }
 0x2aa   :  { %6142 = vmatprep.subr.bf16.mxu0 %v8364_v3  ;;  %v8434_v2 = vld [vmem:[#allocation6 + $0x1600] ss:$8 sps:$4 sm:$0xff]   ;;  %v8439_v3 = vld [vmem:[#allocation6 + $0xa14] ss:$8 sps:$4 sm:$0xff]  }
 0x2ac   :  { %5651 = vmatpush1.bf16.msra.mxu1 %v8359_v4  ;;  %v8442_v4 = vld [vmem:[#allocation6 + $0x1614] ss:$8 sps:$4 sm:$0xff]  }
 0x2ad   :  { %6143 = vmatpush1.bf16.msra.mxu0 %v8362_v5  ;;  %5652 = vmatprep.subr.bf16.mxu1 %v8367_v6  ;;  %v9117_v5 = vrot.slane %v1021_v62, %v8926_v49  ;;  %v9120_v6 = vrot.slane %v1168_v47, %v8926_v49  ;;  %v8512_v62 = vld [vmem:[#allocation6 + $0x16d0] ss:$8 sps:$4 sm:$0xff]   ;;  %v8517_v47 = vld [vmem:[#allocation6 + $0xae4] ss:$8 sps:$4 sm:$0xff]  }
 0x2ae   :  { %6144 = vmatprep.subr.bf16.mxu0 %v8370_v45  ;;  %v8445_v45 = vld [vmem:[#allocation6 + $0xa24] ss:$8 sps:$4 sm:$0xff]  }
 0x2b0   :  { %5653 = vmatpush1.bf16.msra.mxu1 %v8365_v8  ;;  %v8448_v8 = vld [vmem:[#allocation6 + $0x1624] ss:$8 sps:$4 sm:$0xff]  }
 0x2b1   :  { %6145 = vmatpush1.bf16.msra.mxu0 %v8368_v60  ;;  %5654 = vmatprep.subr.bf16.mxu1 %v8373_v9  ;;  %v8443_v60 = vld [vmem:[#allocation6 + $0xa20] ss:$8 sps:$4 sm:$0xff]  }
 0x2b2   :  { %6146 = vmatprep.subr.bf16.mxu0 %v8376_v61  ;;  %v8446_v9 = vld [vmem:[#allocation6 + $0x1620] ss:$8 sps:$4 sm:$0xff]   ;;  %v8451_v61 = vld [vmem:[#allocation6 + $0xa34] ss:$8 sps:$4 sm:$0xff]  }
 0x2b4   :  { %5655 = vmatpush1.bf16.msra.mxu1 %v8371_v10  ;;  %v8454_v10 = vld [vmem:[#allocation6 + $0x1634] ss:$8 sps:$4 sm:$0xff]  }
 0x2b5   :  { %6147 = vmatpush1.bf16.msra.mxu0 %v8374_v11  ;;  %5656 = vmatprep.subr.bf16.mxu1 %v8379_v12  ;;  %v8449_v11 = vld [vmem:[#allocation6 + $0xa30] ss:$8 sps:$4 sm:$0xff]  }
 0x2b6   :  { %6148 = vmatprep.subr.bf16.mxu0 %v8382_v13  ;;  %v8452_v12 = vld [vmem:[#allocation6 + $0x1630] ss:$8 sps:$4 sm:$0xff]   ;;  %v8457_v13 = vld [vmem:[#allocation6 + $0xa44] ss:$8 sps:$4 sm:$0xff]  }
 0x2b8   :  { %5657 = vmatpush1.bf16.msra.mxu1 %v8377_v14  ;;  %v8460_v14 = vld [vmem:[#allocation6 + $0x1644] ss:$8 sps:$4 sm:$0xff]  }
 0x2b9   :  { %6149 = vmatpush1.bf16.msra.mxu0 %v8380_v15  ;;  %5658 = vmatprep.subr.bf16.mxu1 %v8385_v18  ;;  %v8455_v15 = vld [vmem:[#allocation6 + $0xa40] ss:$8 sps:$4 sm:$0xff]  }
 0x2ba   :  { %6150 = vmatprep.subr.bf16.mxu0 %v8388_v19  ;;  %v8458_v18 = vld [vmem:[#allocation6 + $0x1640] ss:$8 sps:$4 sm:$0xff]   ;;  %v8463_v19 = vld [vmem:[#allocation6 + $0xa54] ss:$8 sps:$4 sm:$0xff]  }
 0x2bc   :  { %5659 = vmatpush1.bf16.msra.mxu1 %v8383_v42  ;;  %v8466_v42 = vld [vmem:[#allocation6 + $0x1654] ss:$8 sps:$4 sm:$0xff]  }
 0x2bd   :  { %6151 = vmatpush1.bf16.msra.mxu0 %v8386_v0  ;;  %5660 = vmatprep.subr.bf16.mxu1 %v8391_v27  ;;  %v8461_v0 = vld [vmem:[#allocation6 + $0xa50] ss:$8 sps:$4 sm:$0xff]  }
 0x2be   :  { %6152 = vmatprep.subr.bf16.mxu0 %v8394_v56  ;;  %v8464_v27 = vld [vmem:[#allocation6 + $0x1650] ss:$8 sps:$4 sm:$0xff]   ;;  %v8469_v56 = vld [vmem:[#allocation6 + $0xa64] ss:$8 sps:$4 sm:$0xff]  }
 0x2c0   :  { %5661 = vmatpush1.bf16.msra.mxu1 %v8389_v28  ;;  %v8472_v28 = vld [vmem:[#allocation6 + $0x1664] ss:$8 sps:$4 sm:$0xff]  }
 0x2c1   :  { %6153 = vmatpush1.bf16.msra.mxu0 %v8392_v29  ;;  %5662 = vmatprep.subr.bf16.mxu1 %v8397_v7  ;;  %v8467_v29 = vld [vmem:[#allocation6 + $0xa60] ss:$8 sps:$4 sm:$0xff]  }
 0x2c2   :  { %6154 = vmatprep.subr.bf16.mxu0 %v8400_v31  ;;  %v8470_v7 = vld [vmem:[#allocation6 + $0x1660] ss:$8 sps:$4 sm:$0xff]   ;;  %v8475_v31 = vld [vmem:[#allocation6 + $0xa74] ss:$8 sps:$4 sm:$0xff]  }
 0x2c4   :  { %5663 = vmatpush1.bf16.msra.mxu1 %v8395_v32  ;;  %v8478_v32 = vld [vmem:[#allocation6 + $0x1674] ss:$8 sps:$4 sm:$0xff]  }
 0x2c5   :  { %6155 = vmatpush1.bf16.msra.mxu0 %v8398_v20  ;;  %5664 = vmatprep.subr.bf16.mxu1 %v8403_v33  ;;  %v8473_v20 = vld [vmem:[#allocation6 + $0xa70] ss:$8 sps:$4 sm:$0xff]  }
 0x2c6   :  { %6156 = vmatprep.subr.bf16.mxu0 %v8406_v21  ;;  %v8476_v33 = vld [vmem:[#allocation6 + $0x1670] ss:$8 sps:$4 sm:$0xff]   ;;  %v8481_v21 = vld [vmem:[#allocation6 + $0xa84] ss:$8 sps:$4 sm:$0xff]  }
 0x2c8   :  { %5665 = vmatpush1.bf16.msra.mxu1 %v8401_v34  ;;  %v8484_v34 = vld [vmem:[#allocation6 + $0x1684] ss:$8 sps:$4 sm:$0xff]  }
 0x2c9   :  { %6157 = vmatpush1.bf16.msra.mxu0 %v8404_v35  ;;  %5666 = vmatprep.subr.bf16.mxu1 %v8409_v36  ;;  %v8479_v35 = vld [vmem:[#allocation6 + $0xa80] ss:$8 sps:$4 sm:$0xff]  }
 0x2ca   :  { %6158 = vmatprep.subr.bf16.mxu0 %v8412_v16  ;;  %v8482_v36 = vld [vmem:[#allocation6 + $0x1680] ss:$8 sps:$4 sm:$0xff]   ;;  %v8487_v16 = vld [vmem:[#allocation6 + $0xa94] ss:$8 sps:$4 sm:$0xff]  }
 0x2cc   :  { %5667 = vmatpush1.bf16.msra.mxu1 %v8407_v17  ;;  %v8490_v17 = vld [vmem:[#allocation6 + $0x1694] ss:$8 sps:$4 sm:$0xff]  }
 0x2cd   :  { %6159 = vmatpush1.bf16.msra.mxu0 %v8410_v40  ;;  %5668 = vmatprep.subr.bf16.mxu1 %v8415_v23  ;;  %v8485_v40 = vld [vmem:[#allocation6 + $0xa90] ss:$8 sps:$4 sm:$0xff]  }
 0x2ce   :  { %6160 = vmatprep.subr.bf16.mxu0 %v8418_v24  ;;  %v8488_v23 = vld [vmem:[#allocation6 + $0x1690] ss:$8 sps:$4 sm:$0xff]   ;;  %v8493_v24 = vld [vmem:[#allocation6 + $0xaa4] ss:$8 sps:$4 sm:$0xff]  }
 0x2d0   :  { %5669 = vmatpush1.bf16.msra.mxu1 %v8413_v48  ;;  %v8496_v48 = vld [vmem:[#allocation6 + $0x16a4] ss:$8 sps:$4 sm:$0xff]  }
 0x2d1   :  { %6161 = vmatpush1.bf16.msra.mxu0 %v8416_v50  ;;  %5670 = vmatprep.subr.bf16.mxu1 %v8421_v25  ;;  %v8491_v50 = vld [vmem:[#allocation6 + $0xaa0] ss:$8 sps:$4 sm:$0xff]  }
 0x2d2   :  { %6162 = vmatprep.subr.bf16.mxu0 %v8424_v53  ;;  %v8494_v25 = vld [vmem:[#allocation6 + $0x16a0] ss:$8 sps:$4 sm:$0xff]   ;;  %v8499_v53 = vld [vmem:[#allocation6 + $0xab4] ss:$8 sps:$4 sm:$0xff]  }
 0x2d4   :  { %5671 = vmatpush1.bf16.msra.mxu1 %v8419_v39  ;;  %v8500_v39 = vld [vmem:[#allocation6 + $0x16b0] ss:$8 sps:$4 sm:$0xff]  }
 0x2d5   :  { %6163 = vmatpush1.bf16.msra.mxu0 %v8422_v55  ;;  %5672 = vmatprep.subr.bf16.mxu1 %v8427_v57  ;;  %v8505_v55 = vld [vmem:[#allocation6 + $0xac4] ss:$8 sps:$4 sm:$0xff]  }
 0x2d6   :  { %6164 = vmatprep.subr.bf16.mxu0 %v8430_v30  ;;  %v8508_v57 = vld [vmem:[#allocation6 + $0x16c4] ss:$8 sps:$4 sm:$0xff]   ;;  %v8503_v30 = vld [vmem:[#allocation6 + $0xac0] ss:$8 sps:$4 sm:$0xff]  }
 0x2d8   :  { %5673 = vmatpush1.bf16.msra.mxu1 %v8425_v22  ;;  %v8506_v22 = vld [vmem:[#allocation6 + $0x16c0] ss:$8 sps:$4 sm:$0xff]  }
 0x2d9   :  { %6165 = vmatpush1.bf16.msra.mxu0 %v8428_v59  ;;  %5683 = vmatprep.subr.bf16.mxu1 %v8433_v52  ;;  %v8511_v59 = vld [vmem:[#allocation6 + $0xad4] ss:$8 sps:$4 sm:$0xff]  }
 0x2da   :  { %6175 = vmatprep.subr.bf16.mxu0 %v8436_v44  ;;  %v8514_v52 = vld [vmem:[#allocation6 + $0x16d4] ss:$8 sps:$4 sm:$0xff]   ;;  %v8509_v44 = vld [vmem:[#allocation6 + $0xad0] ss:$8 sps:$4 sm:$0xff]  }
 0x2db   :  { %5675 = vmatmul.mubr.bf16.vlgmr.msra.gmra.mrb[0].mxu1 %v1050_v63  ;;  %v8520_v63 = vld [vmem:[#allocation6 + $0x16e4] ss:$8 sps:$4 sm:$0xff]  }
 0x2dc   :  { %6167 = vmatmul.mubr.bf16.vlgmr.msra.gmra.mrb[0].mxu0 %v1197_v41  ;;  %5684 = vmatpush1.bf16.msra.mxu1 %v8431_v1  ;;  %v8515_v41 = vld [vmem:[#allocation6 + $0xae0] ss:$8 sps:$4 sm:$0xff]  }
 0x2dd   :  { %6176 = vmatpush1.bf16.msra.mxu0 %v8434_v2  ;;  %5685 = vmatprep.subr.bf16.mxu1 %v8439_v3  ;;  %v8518_v1 = vld [vmem:[#allocation6 + $0x16e0] ss:$8 sps:$4 sm:$0xff]   ;;  %v8523_v2 = vld [vmem:[#allocation6 + $0xaf4] ss:$8 sps:$4 sm:$0xff]  }
 0x2de   :  { %6177 = vmatprep.subr.bf16.mxu0 %v8442_v4  ;;  %5715 = vmatprep.mubr.bf16.mxu1 %v9117_v5  ;;  %v8526_v3 = vld [vmem:[#allocation6 + $0x16f4] ss:$8 sps:$4 sm:$0xff]   ;;  %v8521_v4 = vld [vmem:[#allocation6 + $0xaf0] ss:$8 sps:$4 sm:$0xff]  }
 0x2df   :  { %6207 = vmatprep.mubr.bf16.mxu0 %v9120_v6 }
 0x2e0   :  { %5686 = vmatpush1.bf16.msra.mxu1 %v8437_v26  ;;  %v8524_v26 = vld [vmem:[#allocation6 + $0x16f0] ss:$8 sps:$4 sm:$0xff]  }
 0x2e1   :  { %6178 = vmatpush1.bf16.msra.mxu0 %v8440_v51  ;;  %5687 = vmatprep.subr.bf16.mxu1 %v8445_v45  ;;  %v8530_v51 = vld [vmem:[#allocation6 + $0xb04] ss:$8 sps:$4 sm:$0xff]  }
 0x2e2   :  { %6179 = vmatprep.subr.bf16.mxu0 %v8448_v8  ;;  %v8534_v45 = vld [vmem:[#allocation6 + $0x1704] ss:$8 sps:$4 sm:$0xff]   ;;  %v9126_v8 = vrot.slane %v9103_v46, %v8926_v49  ;;  %v8535_v46 = vld [vmem:[#allocation6 + $0xb10] ss:$8 sps:$4 sm:$0xff]  }
 0x2e4   :  { %5688 = vmatpush1.bf16.msra.mxu1 %v8443_v60  ;;  %v9130_v60 = vrot.slane %v9106_v58, %v8926_v49  ;;  %v8538_v58 = vld [vmem:[#allocation6 + $0x1710] ss:$8 sps:$4 sm:$0xff]  }
 0x2e5   :  { %6180 = vmatpush1.bf16.msra.mxu0 %v8446_v9  ;;  %5689 = vmatprep.subr.bf16.mxu1 %v8451_v61  ;;  %v8528_v9 = vld [vmem:[#allocation6 + $0xb00] ss:$8 sps:$4 sm:$0xff]  }
 0x2e6   :  { %6181 = vmatprep.subr.bf16.mxu0 %v8454_v10  ;;  %v8532_v61 = vld [vmem:[#allocation6 + $0x1700] ss:$8 sps:$4 sm:$0xff]   ;;  %v8537_v10 = vld [vmem:[#allocation6 + $0xb14] ss:$8 sps:$4 sm:$0xff]  }
 0x2e8   :  { %5690 = vmatpush1.bf16.msra.mxu1 %v8449_v11  ;;  %v8540_v11 = vld [vmem:[#allocation6 + $0x1714] ss:$8 sps:$4 sm:$0xff]  }
 0x2e9   :  { %6182 = vmatpush1.bf16.msra.mxu0 %v8452_v12  ;;  %5691 = vmatprep.subr.bf16.mxu1 %v8457_v13  ;;  %v1053_v12 = vcombine.high %v9117_v5, %v9117_v5  ;;  %v1200_v13 = vcombine.high %v9120_v6, %v9120_v6  ;;  %v8541_v5 = vld [vmem:[#allocation6 + $0xb20] ss:$8 sps:$4 sm:$0xff]   ;;  %v8549_v6 = vld [vmem:[#allocation6 + $0xb34] ss:$8 sps:$4 sm:$0xff]  }
 0x2ea   :  { %6183 = vmatprep.subr.bf16.mxu0 %v8460_v14  ;;  %v8543_v14 = vld [vmem:[#allocation6 + $0xb24] ss:$8 sps:$4 sm:$0xff]  }
 0x2ec   :  { %5692 = vmatpush1.bf16.msra.mxu1 %v8455_v15  ;;  %v8546_v15 = vld [vmem:[#allocation6 + $0x1724] ss:$8 sps:$4 sm:$0xff]  }
 0x2ed   :  { %6184 = vmatpush1.bf16.msra.mxu0 %v8458_v18  ;;  %5693 = vmatprep.subr.bf16.mxu1 %v8463_v19  ;;  %v8544_v18 = vld [vmem:[#allocation6 + $0x1720] ss:$8 sps:$4 sm:$0xff]   ;;  %v8552_v19 = vld [vmem:[#allocation6 + $0x1734] ss:$8 sps:$4 sm:$0xff]  }
 0x2ee   :  { %6185 = vmatprep.subr.bf16.mxu0 %v8466_v42  ;;  %v8547_v42 = vld [vmem:[#allocation6 + $0xb30] ss:$8 sps:$4 sm:$0xff]  }
 0x2f0   :  { %5694 = vmatpush1.bf16.msra.mxu1 %v8461_v0  ;;  %v8550_v0 = vld [vmem:[#allocation6 + $0x1730] ss:$8 sps:$4 sm:$0xff]  }
 0x2f1   :  { %6186 = vmatpush1.bf16.msra.mxu0 %v8464_v27  ;;  %5695 = vmatprep.subr.bf16.mxu1 %v8469_v56  ;;  %v8555_v27 = vld [vmem:[#allocation6 + $0xb44] ss:$8 sps:$4 sm:$0xff]  }
 0x2f2   :  { %6187 = vmatprep.subr.bf16.mxu0 %v8472_v28  ;;  %v8558_v56 = vld [vmem:[#allocation6 + $0x1744] ss:$8 sps:$4 sm:$0xff]   ;;  %v8553_v28 = vld [vmem:[#allocation6 + $0xb40] ss:$8 sps:$4 sm:$0xff]  }
 0x2f4   :  { %5696 = vmatpush1.bf16.msra.mxu1 %v8467_v29  ;;  %v8556_v29 = vld [vmem:[#allocation6 + $0x1740] ss:$8 sps:$4 sm:$0xff]  }
 0x2f5   :  { %6188 = vmatpush1.bf16.msra.mxu0 %v8470_v7  ;;  %5697 = vmatprep.subr.bf16.mxu1 %v8475_v31  ;;  %v8561_v7 = vld [vmem:[#allocation6 + $0xb54] ss:$8 sps:$4 sm:$0xff]  }
 0x2f6   :  { %6189 = vmatprep.subr.bf16.mxu0 %v8478_v32  ;;  %v8564_v31 = vld [vmem:[#allocation6 + $0x1754] ss:$8 sps:$4 sm:$0xff]   ;;  %v8559_v32 = vld [vmem:[#allocation6 + $0xb50] ss:$8 sps:$4 sm:$0xff]  }
 0x2f8   :  { %5698 = vmatpush1.bf16.msra.mxu1 %v8473_v20  ;;  %v8562_v20 = vld [vmem:[#allocation6 + $0x1750] ss:$8 sps:$4 sm:$0xff]  }
 0x2f9   :  { %6190 = vmatpush1.bf16.msra.mxu0 %v8476_v33  ;;  %5699 = vmatprep.subr.bf16.mxu1 %v8481_v21  ;;  %v8567_v33 = vld [vmem:[#allocation6 + $0xb64] ss:$8 sps:$4 sm:$0xff]  }
 0x2fa   :  { %6191 = vmatprep.subr.bf16.mxu0 %v8484_v34  ;;  %v8570_v21 = vld [vmem:[#allocation6 + $0x1764] ss:$8 sps:$4 sm:$0xff]   ;;  %v8565_v34 = vld [vmem:[#allocation6 + $0xb60] ss:$8 sps:$4 sm:$0xff]  }
 0x2fc   :  { %5700 = vmatpush1.bf16.msra.mxu1 %v8479_v35  ;;  %v8568_v35 = vld [vmem:[#allocation6 + $0x1760] ss:$8 sps:$4 sm:$0xff]  }
 0x2fd   :  { %6192 = vmatpush1.bf16.msra.mxu0 %v8482_v36  ;;  %5701 = vmatprep.subr.bf16.mxu1 %v8487_v16  ;;  %v8573_v36 = vld [vmem:[#allocation6 + $0xb74] ss:$8 sps:$4 sm:$0xff]  }
 0x2fe   :  { %6193 = vmatprep.subr.bf16.mxu0 %v8490_v17  ;;  %v8576_v16 = vld [vmem:[#allocation6 + $0x1774] ss:$8 sps:$4 sm:$0xff]   ;;  %v8571_v17 = vld [vmem:[#allocation6 + $0xb70] ss:$8 sps:$4 sm:$0xff]  }
 0x300   :  { %5702 = vmatpush1.bf16.msra.mxu1 %v8485_v40  ;;  %v8574_v40 = vld [vmem:[#allocation6 + $0x1770] ss:$8 sps:$4 sm:$0xff]  }
 0x301   :  { %6194 = vmatpush1.bf16.msra.mxu0 %v8488_v23  ;;  %5703 = vmatprep.subr.bf16.mxu1 %v8493_v24  ;;  %v8579_v23 = vld [vmem:[#allocation6 + $0xb84] ss:$8 sps:$4 sm:$0xff]  }
 0x302   :  { %6195 = vmatprep.subr.bf16.mxu0 %v8496_v48  ;;  %v8582_v24 = vld [vmem:[#allocation6 + $0x1784] ss:$8 sps:$4 sm:$0xff]   ;;  %v8577_v48 = vld [vmem:[#allocation6 + $0xb80] ss:$8 sps:$4 sm:$0xff]  }
 0x304   :  { %5704 = vmatpush1.bf16.msra.mxu1 %v8491_v50  ;;  %v8580_v50 = vld [vmem:[#allocation6 + $0x1780] ss:$8 sps:$4 sm:$0xff]  }
 0x305   :  { %6196 = vmatpush1.bf16.msra.mxu0 %v8494_v25  ;;  %5705 = vmatprep.subr.bf16.mxu1 %v8499_v53  ;;  %v8585_v25 = vld [vmem:[#allocation6 + $0xb94] ss:$8 sps:$4 sm:$0xff]  }
 0x306   :  { %6197 = vmatprep.subr.bf16.mxu0 %v8502_v37  ;;  %v8588_v53 = vld [vmem:[#allocation6 + $0x1794] ss:$8 sps:$4 sm:$0xff]   ;;  %v8583_v37 = vld [vmem:[#allocation6 + $0xb90] ss:$8 sps:$4 sm:$0xff]  }
 0x308   :  { %5706 = vmatpush1.bf16.msra.mxu1 %v8497_v54  ;;  %v8586_v54 = vld [vmem:[#allocation6 + $0x1790] ss:$8 sps:$4 sm:$0xff]  }
 0x309   :  { %6198 = vmatpush1.bf16.msra.mxu0 %v8500_v39  ;;  %5707 = vmatprep.subr.bf16.mxu1 %v8505_v55  ;;  %v8591_v39 = vld [vmem:[#allocation6 + $0xba4] ss:$8 sps:$4 sm:$0xff]  }
 0x30a   :  { %6199 = vmatprep.subr.bf16.mxu0 %v8508_v57  ;;  %v8594_v55 = vld [vmem:[#allocation6 + $0x17a4] ss:$8 sps:$4 sm:$0xff]   ;;  %v8589_v57 = vld [vmem:[#allocation6 + $0xba0] ss:$8 sps:$4 sm:$0xff]  }
 0x30c   :  { %5708 = vmatpush1.bf16.msra.mxu1 %v8503_v30  ;;  %v8592_v30 = vld [vmem:[#allocation6 + $0x17a0] ss:$8 sps:$4 sm:$0xff]  }
 0x30d   :  { %6200 = vmatpush1.bf16.msra.mxu0 %v8506_v22  ;;  %5709 = vmatprep.subr.bf16.mxu1 %v8511_v59  ;;  %v8597_v22 = vld [vmem:[#allocation6 + $0xbb4] ss:$8 sps:$4 sm:$0xff]  }
 0x30e   :  { %6201 = vmatprep.subr.bf16.mxu0 %v8514_v52  ;;  %v8600_v59 = vld [vmem:[#allocation6 + $0x17b4] ss:$8 sps:$4 sm:$0xff]   ;;  %v8595_v52 = vld [vmem:[#allocation6 + $0xbb0] ss:$8 sps:$4 sm:$0xff]  }
 0x310   :  { %5710 = vmatpush1.bf16.msra.mxu1 %v8509_v44  ;;  %v8598_v44 = vld [vmem:[#allocation6 + $0x17b0] ss:$8 sps:$4 sm:$0xff]  }
 0x311   :  { %6202 = vmatpush1.bf16.msra.mxu0 %v8512_v62  ;;  %5711 = vmatprep.subr.bf16.mxu1 %v8517_v47  ;;  %v8603_v62 = vld [vmem:[#allocation6 + $0xbc4] ss:$8 sps:$4 sm:$0xff]  }
 0x312   :  { %6203 = vmatprep.subr.bf16.mxu0 %v8520_v63  ;;  %v8606_v47 = vld [vmem:[#allocation6 + $0x17c4] ss:$8 sps:$4 sm:$0xff]   ;;  %v8601_v63 = vld [vmem:[#allocation6 + $0xbc0] ss:$8 sps:$4 sm:$0xff]  }
 0x314   :  { %5712 = vmatpush1.bf16.msra.mxu1 %v8515_v41  ;;  %v8604_v41 = vld [vmem:[#allocation6 + $0x17c0] ss:$8 sps:$4 sm:$0xff]  }
 0x315   :  { %6204 = vmatpush1.bf16.msra.mxu0 %v8518_v1  ;;  %5713 = vmatprep.subr.bf16.mxu1 %v8523_v2  ;;  %v8609_v1 = vld [vmem:[#allocation6 + $0xbd4] ss:$8 sps:$4 sm:$0xff]  }
 0x316   :  { %6205 = vmatprep.subr.bf16.mxu0 %v8526_v3  ;;  %v8612_v2 = vld [vmem:[#allocation6 + $0x17d4] ss:$8 sps:$4 sm:$0xff]   ;;  %v8607_v3 = vld [vmem:[#allocation6 + $0xbd0] ss:$8 sps:$4 sm:$0xff]  }
 0x318   :  { %5714 = vmatpush1.bf16.msra.mxu1 %v8521_v4  ;;  %v8610_v4 = vld [vmem:[#allocation6 + $0x17d0] ss:$8 sps:$4 sm:$0xff]  }
 0x319   :  { %6206 = vmatpush1.bf16.msra.mxu0 %v8524_v26  ;;  %5724 = vmatprep.subr.bf16.mxu1 %v8530_v51  ;;  %v8615_v26 = vld [vmem:[#allocation6 + $0xbe4] ss:$8 sps:$4 sm:$0xff]  }
 0x31a   :  { %6216 = vmatprep.subr.bf16.mxu0 %v8534_v45  ;;  %v8618_v51 = vld [vmem:[#allocation6 + $0x17e4] ss:$8 sps:$4 sm:$0xff]   ;;  %v8613_v45 = vld [vmem:[#allocation6 + $0xbe0] ss:$8 sps:$4 sm:$0xff]  }
 0x31b   :  { %5716 = vmatmul.mubr.bf16.vlgmr.msra.gmra.mrb[0].mxu1 %v9126_v8 }
 0x31c   :  { %6208 = vmatmul.mubr.bf16.vlgmr.msra.gmra.mrb[0].mxu0 %v9130_v60  ;;  %5725 = vmatpush1.bf16.msra.mxu1 %v8528_v9  ;;  %v8616_v9 = vld [vmem:[#allocation6 + $0x17e0] ss:$8 sps:$4 sm:$0xff]  }
 0x31d   :  { %6217 = vmatpush1.bf16.msra.mxu0 %v8532_v61  ;;  %5726 = vmatprep.subr.bf16.mxu1 %v8537_v10  ;;  %v8621_v61 = vld [vmem:[#allocation6 + $0xbf4] ss:$8 sps:$4 sm:$0xff]  }
 0x31e   :  { %6218 = vmatprep.subr.bf16.mxu0 %v8540_v11  ;;  %5756 = vmatprep.mubr.bf16.mxu1 %v1053_v12  ;;  %v8624_v10 = vld [vmem:[#allocation6 + $0x17f4] ss:$8 sps:$4 sm:$0xff]   ;;  %v8619_v12 = vld [vmem:[#allocation6 + $0xbf0] ss:$8 sps:$4 sm:$0xff]  }
 0x31f   :  { %6248 = vmatprep.mubr.bf16.mxu0 %v1200_v13  ;;  %v9138_v11 = vld.sshfl [vmem:[#allocation3 + $0x30] sm:$0x11 pattern:$0x75316420]  ;;  %v8622_v13 = vld [vmem:[#allocation6 + $0x17f0] ss:$8 sps:$4 sm:$0xff]  }
 0x320   :  { %5727 = vmatpush1.bf16.msra.mxu1 %v8535_v46  ;;  %v1208_v46 = vcombine.high %v9138_v11, %v9138_v11 }
 0x321   :  { %6219 = vmatpush1.bf16.msra.mxu0 %v8538_v58  ;;  %5728 = vmatprep.subr.bf16.mxu1 %v8543_v14  ;;  %v8627_v58 = vld [vmem:[#allocation6 + $0x1804] ss:$8 sps:$4 sm:$0xff]   ;;  %v1051_v14 = vcombine.high %v9126_v8, %v9126_v8  ;;  %v8636_v8 = vld [vmem:[#allocation6 + $0x1834] ss:$8 sps:$4 sm:$0xff]  }
 0x322   :  { %6220 = vmatprep.subr.bf16.mxu0 %v8546_v15  ;;  %v1198_v15 = vcombine.high %v9130_v60, %v9130_v60  ;;  %v8634_v60 = vld [vmem:[#allocation6 + $0x1830] ss:$8 sps:$4 sm:$0xff]  }
 0x324   :  { %5729 = vmatpush1.bf16.msra.mxu1 %v8541_v5  ;;  %v8625_v5 = vld [vmem:[#allocation6 + $0x1800] ss:$8 sps:$4 sm:$0xff]  }
 0x325   :  { %6221 = vmatpush1.bf16.msra.mxu0 %v8544_v18  ;;  %5730 = vmatprep.subr.bf16.mxu1 %v8549_v6  ;;  %v1222_v18 = vrot.slane %v1208_v46, %v8926_v49  ;;  %v8630_v6 = vld [vmem:[#allocation6 + $0x1814] ss:$8 sps:$4 sm:$0xff]   ;;  %v6360_v46 = vld [vmem:[#allocation9 + $0xc0] sm:$0xff] }
 0x326   :  { %6222 = vmatprep.subr.bf16.mxu0 %v8552_v19  ;;  %v8628_v19 = vld [vmem:[#allocation6 + $0x1810] ss:$8 sps:$4 sm:$0xff]  }
 0x328   :  { %5731 = vmatpush1.bf16.msra.mxu1 %v8547_v42  ;;  %v8633_v42 = vld [vmem:[#allocation6 + $0x1824] ss:$8 sps:$4 sm:$0xff]  }
 0x329   :  { %6223 = vmatpush1.bf16.msra.mxu0 %v8550_v0  ;;  %5732 = vmatprep.subr.bf16.mxu1 %v8555_v27  ;;  %v8631_v0 = vld [vmem:[#allocation6 + $0x1820] ss:$8 sps:$4 sm:$0xff]   ;;  %v8639_v27 = vld [vmem:[#allocation6 + $0x1844] ss:$8 sps:$4 sm:$0xff]  }
 0x32a   :  { %6224 = vmatprep.subr.bf16.mxu0 %v8558_v56  ;;  %v8637_v56 = vld [vmem:[#allocation6 + $0x1840] ss:$8 sps:$4 sm:$0xff]  }
 0x32c   :  { %5733 = vmatpush1.bf16.msra.mxu1 %v8553_v28  ;;  %v8642_v28 = vld [vmem:[#allocation6 + $0x1854] ss:$8 sps:$4 sm:$0xff]  }
 0x32d   :  { %6225 = vmatpush1.bf16.msra.mxu0 %v8556_v29  ;;  %5734 = vmatprep.subr.bf16.mxu1 %v8561_v7  ;;  %v8640_v29 = vld [vmem:[#allocation6 + $0x1850] ss:$8 sps:$4 sm:$0xff]   ;;  %v8645_v7 = vld [vmem:[#allocation6 + $0x1864] ss:$8 sps:$4 sm:$0xff]  }
 0x32e   :  { %6226 = vmatprep.subr.bf16.mxu0 %v8564_v31  ;;  %v8643_v31 = vld [vmem:[#allocation6 + $0x1860] ss:$8 sps:$4 sm:$0xff]  }
 0x330   :  { %5735 = vmatpush1.bf16.msra.mxu1 %v8559_v32  ;;  %v8648_v32 = vld [vmem:[#allocation6 + $0x1874] ss:$8 sps:$4 sm:$0xff]  }
 0x331   :  { %6227 = vmatpush1.bf16.msra.mxu0 %v8562_v20  ;;  %5736 = vmatprep.subr.bf16.mxu1 %v8567_v33  ;;  %v8646_v20 = vld [vmem:[#allocation6 + $0x1870] ss:$8 sps:$4 sm:$0xff]   ;;  %v8651_v33 = vld [vmem:[#allocation6 + $0x1884] ss:$8 sps:$4 sm:$0xff]  }
 0x332   :  { %6228 = vmatprep.subr.bf16.mxu0 %v8570_v21  ;;  %v8649_v21 = vld [vmem:[#allocation6 + $0x1880] ss:$8 sps:$4 sm:$0xff]  }
 0x334   :  { %5737 = vmatpush1.bf16.msra.mxu1 %v8565_v34  ;;  %v8654_v34 = vld [vmem:[#allocation6 + $0x1894] ss:$8 sps:$4 sm:$0xff]  }
 0x335   :  { %6229 = vmatpush1.bf16.msra.mxu0 %v8568_v35  ;;  %5738 = vmatprep.subr.bf16.mxu1 %v8573_v36  ;;  %v8652_v35 = vld [vmem:[#allocation6 + $0x1890] ss:$8 sps:$4 sm:$0xff]   ;;  %v8657_v36 = vld [vmem:[#allocation6 + $0x18a4] ss:$8 sps:$4 sm:$0xff]  }
 0x336   :  { %6230 = vmatprep.subr.bf16.mxu0 %v8576_v16  ;;  %v8655_v16 = vld [vmem:[#allocation6 + $0x18a0] ss:$8 sps:$4 sm:$0xff]  }
 0x338   :  { %5739 = vmatpush1.bf16.msra.mxu1 %v8571_v17  ;;  %v8660_v17 = vld [vmem:[#allocation6 + $0x18b4] ss:$8 sps:$4 sm:$0xff]  }
 0x339   :  { %6231 = vmatpush1.bf16.msra.mxu0 %v8574_v40  ;;  %5740 = vmatprep.subr.bf16.mxu1 %v8579_v23  ;;  %v8658_v40 = vld [vmem:[#allocation6 + $0x18b0] ss:$8 sps:$4 sm:$0xff]   ;;  %v8663_v23 = vld [vmem:[#allocation6 + $0x18c4] ss:$8 sps:$4 sm:$0xff]  }
 0x33a   :  { %6232 = vmatprep.subr.bf16.mxu0 %v8582_v24  ;;  %v8661_v24 = vld [vmem:[#allocation6 + $0x18c0] ss:$8 sps:$4 sm:$0xff]  }
 0x33c   :  { %5741 = vmatpush1.bf16.msra.mxu1 %v8577_v48  ;;  %v8666_v48 = vld [vmem:[#allocation6 + $0x18d4] ss:$8 sps:$4 sm:$0xff]  }
 0x33d   :  { %6233 = vmatpush1.bf16.msra.mxu0 %v8580_v50  ;;  %5742 = vmatprep.subr.bf16.mxu1 %v8585_v25  ;;  %v8664_v50 = vld [vmem:[#allocation6 + $0x18d0] ss:$8 sps:$4 sm:$0xff]   ;;  %v8669_v25 = vld [vmem:[#allocation6 + $0x18e4] ss:$8 sps:$4 sm:$0xff]  }
 0x33e   :  { %6234 = vmatprep.subr.bf16.mxu0 %v8588_v53  ;;  %v8667_v53 = vld [vmem:[#allocation6 + $0x18e0] ss:$8 sps:$4 sm:$0xff]  }
 0x340   :  { %5743 = vmatpush1.bf16.msra.mxu1 %v8583_v37  ;;  %v8672_v37 = vld [vmem:[#allocation6 + $0x18f4] ss:$8 sps:$4 sm:$0xff]  }
 0x341   :  { %6235 = vmatpush1.bf16.msra.mxu0 %v8586_v54  ;;  %5744 = vmatprep.subr.bf16.mxu1 %v8591_v39  ;;  %v8670_v54 = vld [vmem:[#allocation6 + $0x18f0] ss:$8 sps:$4 sm:$0xff]   ;;  %v1215_v39 = vrot.slane %v9138_v11, %v8926_v49  ;;  %v6356_v49 = vld [vmem:[#allocation9 + $0xa0] sm:$0xff] }
 0x342   :  { %6236 = vmatprep.subr.bf16.mxu0 %v8594_v55  ;;  %v6352_v55 = vld [vmem:[#allocation9 + $0x80] sm:$0xff]  ;;  %v6342_v11 = vld [vmem:[#allocation9 + $0x30] sm:$0xff] }
 0x344   :  { %5745 = vmatpush1.bf16.msra.mxu1 %v8589_v57  ;;  %v6353_v57 = vld [vmem:[#allocation9 + $0x88] sm:$0xff] }
 0x345   :  { %6237 = vmatpush1.bf16.msra.mxu0 %v8592_v30  ;;  %5746 = vmatprep.subr.bf16.mxu1 %v8597_v22  ;;  %v6336_v30 = vld [vmem:[#allocation9] sm:$0xff]  ;;  %v7330_v22 = vpack.c.bf16 %v6353_v57, %v6352_v55  ;;  %v6319_v55 = vsub.s32 0, %v8923_v43  ;;  %v6323_v57 = vsub.s32 1, %v8923_v43 }
 0x346   :  { %6238 = vmatprep.subr.bf16.mxu0 %v8600_v59  ;;  %v6337_v59 = vld [vmem:[#allocation9 + $0x8] sm:$0xff] }
 0x348   :  { %5747 = vmatpush1.bf16.msra.mxu1 %v8595_v52  ;;  %v6354_v52 = vld [vmem:[#allocation9 + $0x90] sm:$0xff] }
 0x349   :  { %6239 = vmatpush1.bf16.msra.mxu0 %v8598_v44  ;;  %5748 = vmatprep.subr.bf16.mxu1 %v8603_v62  ;;  %v6355_v44 = vld [vmem:[#allocation9 + $0x98] sm:$0xff]  ;;  %v7332_v62 = vpack.c.bf16 %v6337_v59, %v6336_v30 }
 0x34a   :  { %6240 = vmatprep.subr.bf16.mxu0 %v8606_v47  ;;  %v7334_v47 = vpack.c.bf16 %v6355_v44, %v6354_v52 }
 0x34c   :  { %5749 = vmatpush1.bf16.msra.mxu1 %v8601_v63  ;;  %v6338_v63 = vld [vmem:[#allocation9 + $0x10] sm:$0xff] }
 0x34d   :  { %6241 = vmatpush1.bf16.msra.mxu0 %v8604_v41  ;;  %5750 = vmatprep.subr.bf16.mxu1 %v8609_v1  ;;  %v6339_v41 = vld [vmem:[#allocation9 + $0x18] sm:$0xff] }
 0x34e   :  { %6242 = vmatprep.subr.bf16.mxu0 %v8612_v2  ;;  %v7336_v1 = vpack.c.bf16 %v6339_v41, %v6338_v63  ;;  %v8829_v2 = vmov 0.0  }
 0x34f   :  { %87 = vst [vmem:[#allocation2] sm:$0xf] %v8829_v2 }
 0x350   :  { %5751 = vmatpush1.bf16.msra.mxu1 %v8607_v3  ;;  %v6357_v3 = vld [vmem:[#allocation9 + $0xa8] sm:$0xff] }
 0x351   :  { %6243 = vmatpush1.bf16.msra.mxu0 %v8610_v4  ;;  %5752 = vmatprep.subr.bf16.mxu1 %v8615_v26  ;;  %v7338_v4 = vpack.c.bf16 %v6357_v3, %v6356_v49  ;;  %v6340_v26 = vld [vmem:[#allocation9 + $0x20] sm:$0xff] }
 0x352   :  { %6244 = vmatprep.subr.bf16.mxu0 %v8618_v51  ;;  %v6341_v51 = vld [vmem:[#allocation9 + $0x28] sm:$0xff] }
 0x354   :  { %5753 = vmatpush1.bf16.msra.mxu1 %v8613_v45  ;;  %v7340_v45 = vpack.c.bf16 %v6341_v51, %v6340_v26 }
 0x355   :  { %6245 = vmatpush1.bf16.msra.mxu0 %v8616_v9  ;;  %5754 = vmatprep.subr.bf16.mxu1 %v8621_v61  ;;  %v6358_v9 = vld [vmem:[#allocation9 + $0xb0] sm:$0xff]  ;;  %v6359_v61 = vld [vmem:[#allocation9 + $0xb8] sm:$0xff] }
 0x356   :  { %6246 = vmatprep.subr.bf16.mxu0 %v8624_v10  ;;  %v7342_v10 = vpack.c.bf16 %v6359_v61, %v6358_v9  ;;  %v99_v52 = vld [vmem:[#allocation2] sm:$0xf] }
 0x358   :  { %5755 = vmatpush1.bf16.msra.mxu1 %v8619_v12  ;;  %v6343_v12 = vld [vmem:[#allocation9 + $0x38] sm:$0xff] }
 0x359   :  { %6247 = vmatpush1.bf16.msra.mxu0 %v8622_v13  ;;  %7331 = vmatprep.subr.bf16.mxu1 %v7330_v22  ;;  %v7344_v13 = vpack.c.bf16 %v6343_v12, %v6342_v11  ;;  %v6315_v22 = vld [vmem:[#allocation8] sm:$0x3] }
 0x35a   :  { %6257 = vmatprep.subr.bf16.mxu0 %v8627_v58  ;;  %v6361_v58 = vld [vmem:[#allocation9 + $0xc8] sm:$0xff] }
 0x35b   :  { %5757 = vmatmul.mubr.bf16.vlgmr.msra.gmra.mrb[0].mxu1 %v1051_v14  ;;  %v7346_v14 = vpack.c.bf16 %v6361_v58, %v6360_v46 }
 0x35c   :  { %6249 = vmatmul.mubr.bf16.vlgmr.msra.gmra.mrb[0].mxu0 %v1198_v15  ;;  %7333 = vmatpush3.bf16.msra.mxu1 %v7332_v62  ;;  %v6344_v15 = vld [vmem:[#allocation9 + $0x40] sm:$0xff]  ;;  %v6320_v62 = vrot.slane %v6315_v22, %v6319_v55 }
 0x35d   :  { %6258 = vmatpush1.bf16.msra.mxu0 %v8625_v5  ;;  %6289 = vmatprep.mubr.bf16.mxu0 %v1222_v18  ;;  %v6345_v5 = vld [vmem:[#allocation9 + $0x48] sm:$0xff] }
 0x35e   :  { %6259 = vmatprep.subr.bf16.mxu0 %v8630_v6  ;;  %7335 = vmatprep.subr.bf16.mxu1 %v7334_v47  ;;  %v7348_v18 = vpack.c.bf16 %v6345_v5, %v6344_v15  ;;  %v6362_v6 = vld [vmem:[#allocation9 + $0xd0] sm:$0xff]  ;;  %v6324_v47 = vrot.slane %v6315_v22, %v6323_v57 }
 0x360   :  { %7337 = vmatpush3.bf16.msra.mxu1 %v7336_v1  ;;  %v6325_v41 = vcombine.low %v6320_v62, %v6324_v47 }
 0x361   :  { %6260 = vmatpush1.bf16.msra.mxu0 %v8628_v19  ;;  %7339 = vmatprep.subr.bf16.mxu1 %v7338_v4  ;;  %v6363_v19 = vld [vmem:[#allocation9 + $0xd8] sm:$0xff] }
 0x362   :  { %6261 = vmatprep.subr.bf16.mxu0 %v8633_v42  ;;  %v6346_v42 = vld [vmem:[#allocation9 + $0x50] sm:$0xff] }
 0x364   :  { %7341 = vmatpush3.bf16.msra.mxu1 %v7340_v45  ;;  %v7294_v45 = vld [vmem:[#allocation11] ss:$0 sm:$0xff] }
 0x365   :  { %6262 = vmatpush1.bf16.msra.mxu0 %v8631_v0  ;;  %7343 = vmatprep.subr.bf16.mxu1 %v7342_v10  ;;  %v7350_v0 = vpack.c.bf16 %v6363_v19, %v6362_v6 }
 0x366   :  { %6263 = vmatprep.subr.bf16.mxu0 %v8636_v8  ;;  %v6347_v8 = vld [vmem:[#allocation9 + $0x58] sm:$0xff] }
 0x368   :  { %7345 = vmatpush3.bf16.msra.mxu1 %v7344_v13 }
 0x369   :  { %6264 = vmatpush1.bf16.msra.mxu0 %v8634_v60  ;;  %7347 = vmatprep.subr.bf16.mxu1 %v7346_v14  ;;  %v6364_v60 = vld [vmem:[#allocation9 + $0xe0] sm:$0xff] }
 0x36a   :  { %6265 = vmatprep.subr.bf16.mxu0 %v8639_v27  ;;  %v6365_v27 = vld [vmem:[#allocation9 + $0xe8] sm:$0xff] }
 0x36c   :  { %7349 = vmatpush3.bf16.msra.mxu1 %v7348_v18 }
 0x36d   :  { %6266 = vmatpush1.bf16.msra.mxu0 %v8637_v56  ;;  %v7352_v56 = vpack.c.bf16 %v6347_v8, %v6346_v42  ;;  %7351 = vmatprep.subr.bf16.mxu1 %v7350_v0 }
 0x36e   :  { %6267 = vmatprep.subr.bf16.mxu0 %v8642_v28  ;;  %v7354_v28 = vpack.c.bf16 %v6365_v27, %v6364_v60 }
 0x370   :  { %7353 = vmatpush3.bf16.msra.mxu1 %v7352_v56 }
 0x371   :  { %6268 = vmatpush1.bf16.msra.mxu0 %v8640_v29  ;;  %v6348_v29 = vld [vmem:[#allocation9 + $0x60] sm:$0xff]  ;;  %7355 = vmatprep.subr.bf16.mxu1 %v7354_v28 }
 0x372   :  { %6269 = vmatprep.subr.bf16.mxu0 %v8645_v7  ;;  %v6349_v7 = vld [vmem:[#allocation9 + $0x68] sm:$0xff] }
 0x375   :  { %6270 = vmatpush1.bf16.msra.mxu0 %v8643_v31  ;;  %v6366_v31 = vld [vmem:[#allocation9 + $0xf0] sm:$0xff] }
 0x376   :  { %6271 = vmatprep.subr.bf16.mxu0 %v8648_v32  ;;  %v6367_v32 = vld [vmem:[#allocation9 + $0xf8] sm:$0xff] }
 0x379   :  { %6272 = vmatpush1.bf16.msra.mxu0 %v8646_v20  ;;  %v7356_v20 = vpack.c.bf16 %v6349_v7, %v6348_v29 }
 0x37a   :  { %6273 = vmatprep.subr.bf16.mxu0 %v8651_v33  ;;  %v7358_v33 = vpack.c.bf16 %v6367_v32, %v6366_v31 }
 0x37b   :  { %7357 = vmatpush3.bf16.msra.mxu1 %v7356_v20 }
 0x37c   :  { %7359 = vmatprep.subr.bf16.mxu1 %v7358_v33 }
 0x37d   :  { %6274 = vmatpush1.bf16.msra.mxu0 %v8649_v21  ;;  %v6350_v21 = vld [vmem:[#allocation9 + $0x70] sm:$0xff] }
 0x37e   :  { %6275 = vmatprep.subr.bf16.mxu0 %v8654_v34  ;;  %v6351_v34 = vld [vmem:[#allocation9 + $0x78] sm:$0xff] }
 0x381   :  { %6276 = vmatpush1.bf16.msra.mxu0 %v8652_v35  ;;  %v7360_v35 = vpack.c.bf16 %v6351_v34, %v6350_v21 }
 0x382   :  { %6277 = vmatprep.subr.bf16.mxu0 %v8657_v36 }
 0x383   :  { %7361 = vmatpush3.bf16.msra.mxu1 %v7360_v35 }
 0x385   :  { %6278 = vmatpush1.bf16.msra.mxu0 %v8655_v16 }
 0x386   :  { %6279 = vmatprep.subr.bf16.mxu0 %v8660_v17 }
 0x389   :  { %6280 = vmatpush1.bf16.msra.mxu0 %v8658_v40 }
 0x38a   :  { %6281 = vmatprep.subr.bf16.mxu0 %v8663_v23  ;;  %v8830_v23 = vmov 1983009808  }
 0x38d   :  { %6282 = vmatpush1.bf16.msra.mxu0 %v8661_v24  ;;  %v6302_v24 = vunpack.c.l.s4 %v8830_v23 }
 0x38e   :  { %6283 = vmatprep.subr.bf16.mxu0 %v8666_v48 }
 0x38f   :  { %v6303_v48 = vunpack.c.0.s8 %v6302_v24 }
 0x391   :  { %6284 = vmatpush1.bf16.msra.mxu0 %v8664_v50 }
 0x392   :  { %6285 = vmatprep.subr.bf16.mxu0 %v8669_v25 }
 0x395   :  { %6286 = vmatpush1.bf16.msra.mxu0 %v8667_v53 }
 0x396   :  { %6287 = vmatprep.subr.bf16.mxu0 %v8672_v37 }
 0x399   :  { %6288 = vmatpush1.bf16.msra.mxu0 %v8670_v54  ;;  %v6306_v54 = vsub.s32 %v6303_v48, %v8923_v43  ;;  %v6457_v43 = vand.u32 127, %v911_v38 }
 0x39b   :  { %v6332_v1 = vrot.slane %v6325_v41, %v6306_v54  ;;  %vm6458_vm0 = vcmp.lt.s32.totalorder %v6457_v43, 2  ;;  %vm6472_vm2 = vcmp.eq.s32.totalorder %v6457_v43, 2 }
 0x39c   :  { %6290 = vmatmul.mubr.bf16.vlgmr.msra.gmra.mrb[0].mxu0 %v1215_v39 }
 0x42e   :  { %v5758_v36 = vpop.f32.mrb[0].mxu1 }
 0x42f   :  { %v5760_v16 = vpop.f32.mrb[1].mxu1 }
 0x430   :  { %v5762_v17 = vpop.f32.mrb[2].mxu1 }
 0x431   :  { %v5763_v40 = vpop.f32.mrb[3].mxu1 }
 0x46f   :  { %v6291_v50 = vpop.f32.mrb[0].mxu0 }
 0x470   :  { %v7362_v25 = vadd.f32 %v6291_v50, %v5758_v36  ;;  %v6293_v53 = vpop.f32.mrb[1].mxu0 }
 0x471   :  { %v7363_v37 = vadd.f32 %v6293_v53, %v5760_v16  ;;  %v6295_v39 = vpop.f32.mrb[2].mxu0 }
 0x472   :  { %v6296_v30 = vpop.f32.mrb[3].mxu0 }
 0x473   :  { %v6300_v59 = vcombine.low %v7362_v25, %v7363_v37 }
 0x475   :  { %v6307_v44 = vrot.slane %v6300_v59, %v6306_v54 }
 0x477   :  { %v6309_v63 = vadd.f32 %v6307_v44, %v99_v52 }
 0x479   :  { %6310 = vst [vmem:[#allocation2] sm:$0xf] %v6309_v63 }
 0x480   :  { %v6314_v2 = vld [vmem:[#allocation2] sm:$0xf] }
 0x481   :  { %v6334_v49 = vadd.f32 %v6332_v1, %v6314_v2 }
 0x483   :  { %v6335_v3 = vmax.f32 %v6334_v49, 0.0 }
 0x485   :  { %v6382_v4 = vrot.slane %v6335_v3, %v6306_v54 }
 0x487   :  { %v6383_v26 = vcombine.high %v6382_v4, %v6382_v4 }
 0x489   :  { %6450 = vmatprep.mubr.f32.mxu1 %v6383_v26 }
 0x48a   :  { %6451 = vmatmul.mubr.f32.vlgmr.msra.gmra.mrb[4].mxu1 %v6382_v4 }
 0x55d   :  { %v7327_v51 = vpop.f32.mrb[4].mxu1 }
 0x55e   :  { %v7328_v9 = vpop.f32.mrb[5].mxu1 }
 0x55f   :  { %v7329_v61 = vadd.f32 %v7328_v9, %v7327_v51 }
 0x561   :  { %v6453_v10 = vadd.f32 %v7329_v61, %v7294_v45 }
 0x563   :  { %v6459_v11 = vsel %vm6458_vm0, %v6453_v10, -inf }
 0x564   :  { %v6461_v12 = vsel %vm6460_vm1, %v6459_v11, -inf }
 0x565   :  { %6462 = vmax.xlane.f32.xlu0 %v6461_v12 }
 0x5f2   :  { %v6463_v13 = vpop.xlane.xlu0 %6462 }
 0x5f3   :  { %v6464_v46 = vsub.f32 %v6459_v11, %v6463_v13 }
 0x5f5   :  { %v6465_v58 = vmul.f32 1.442695, %v6464_v46 }
 0x5f7   :  { %8673 = vpow2.f32 %v6465_v58 }
 0x601   :  { %v8674_v14 = vpop.eup %8673 }
 0x602   :  { %v6467_v15 = vsel %vm6460_vm1, %v8674_v14, 0.0 }
 0x603   :  { %6468 = vadd.xlane.f32.xlu0 %v6467_v15 }
 0x690   :  { %v6469_v5 = vpop.xlane.xlu0 %6468 }
 0x691   :  { %8675 = vrcp.f32 %v6469_v5 }
 0x69b   :  { %v8676_v38 = vpop.eup %8675 }
 0x69c   :  { %v6471_v18 = vmul.f32 %v8676_v38, %v8674_v14 }
 0x69e   :  { %v6473_v6 = vsel %vm6472_vm2, %v6453_v10, %v6471_v18 }
 0x69f   :  { %6474 = vst [vmem:[#allocation12] sm:$0x3] %v6473_v6 }
 0x6a0   :  { %8802 = shalt.err (!%p8799_p2)
}
 0x6a1   :  { %s8803_s29 = scalar_lea.hbm %s9170_s5, 32 }
 0x6a2   :  { %p8804_p3 = scmp.ne.s32.totalorder %s9170_s5, %s8803_s29  ;;  %p8807_p4 = scmp.lt.u32.totalorder %s8803_s29, %s9170_s5 }
 0x6a4   :  { %p8809_p5 = pnand %p8807_p4, %p8804_p3 }
 0x6a6   :  { %8812 = shalt.err (!%p8809_p5)
}
 0x6a7   :  { %6484 = dma.vmem_to_hbm [thread:$0]  %s6482_s26, 32, %s9170_s5, [#allocation5]  }
 0x6a8   :  { %8819 = dma.done.wait [#allocation5], 32  }
 0x6a9   :  { %8820 = vsyncadd [#allocation5], 4294967264 }
 0x6aa   :  { %6488 = vsyncpa [#allocation4], 1 }
 0x6ab   :  { %6489 = vsyncpa [#allocation7], 1 }
 0x6ac   :  { %6490 = vsyncpa [#allocation10], 1 }
 0x6ad   :  { %6491 = vsyncpa [#allocation5], 1 }

</bundles_post_ra>
